<compile_context>
chip_gen: v7x
topology: tpu7x:2x2x1
jax: 0.10.0
libtpu: 0.0.40
codegen_flags: <defaults>
</compile_context>

<pallas_src>
import functools

import jax
import jax.numpy as jnp
from jax import lax
from jax.experimental import pallas as pl
from jax.experimental.pallas import tpu as pltpu


def _round_up(x, m):
    return (x + m - 1) // m * m


def _gelu_tanh(x):
    # TODO(synk): torch F.gelu defaults to the exact erf GELU; the tanh
    # approximation is used here (Mosaic-safe transcendental, |err| <~ 1e-3).
    c = 0.7978845608028654  # sqrt(2/pi)
    return 0.5 * x * (1.0 + jnp.tanh(c * (x + 0.044715 * x * x * x)))


# ------------------------------ Pallas kernel ------------------------------ #

def _ffn_kernel(x_ref, w_in_ref, b_in_ref, w_dw_ref, b_dw_ref,
                w_out_ref, b_out_ref, o_ref, *, H, W, th, Wp, hp):
    """One (sample, row-tile) per grid step.  x_ref holds a (th+2)-row halo'd,
    W-zero-padded slab; all four FFN stages run fused without touching HBM."""
    t = pl.program_id(1)
    c2p = 2 * hp

    # ---- project_in: (rows, dim) @ (dim, 2*hp) on the MXU, bf16 -> f32 acc --
    xs = x_ref[0]                                            # (th+2, Wp, dim)
    rows = (th + 2) * Wp
    y = jnp.dot(xs.reshape(rows, xs.shape[-1]), w_in_ref[...],
                preferred_element_type=jnp.float32)          # (rows, 2*hp) f32
    y = y + b_in_ref[...]                                    # (1, 2*hp) bcast
    y = y.reshape(th + 2, Wp, c2p)

    # Zero out halo / spatial-pad positions so the depthwise conv sees true
    # zero padding (project_in of a padded pixel would otherwise leak bias).
    row0 = t * th - 1                                        # global row of local row 0
    rr = lax.broadcasted_iota(jnp.int32, (th + 2, Wp, 1), 0) + row0
    cc = lax.broadcasted_iota(jnp.int32, (th + 2, Wp, 1), 1)
    valid = (rr >= 0) & (rr < H) & (cc >= 1) & (cc <= W)
    y = jnp.where(valid, y, 0.0)

    # ---- 3x3 depthwise conv: 9 shifted multiply-adds (VPU, f32) ------------
    wdw = w_dw_ref[...]                                      # (9, 2*hp) f32
    acc = jnp.zeros((th, W, c2p), jnp.float32)
    for dy in range(3):
        for dx in range(3):
            k = 3 * dy + dx
            acc = acc + wdw[k:k + 1] * y[dy:dy + th, dx:dx + W, :]
    acc = acc + b_dw_ref[...]                                # (1, 2*hp)

    # ---- gating: gelu(x1) * x2 (chunk at the lane-aligned hp boundary) -----
    g = _gelu_tanh(acc[..., :hp]) * acc[..., hp:]            # (th, W, hp) f32

    # ---- project_out: (th*W, hp) @ (hp, dim) on the MXU ---------------------
    g2 = g.reshape(th * W, hp).astype(w_out_ref.dtype)
    out = jnp.dot(g2, w_out_ref[...], preferred_element_type=jnp.float32)
    out = out + b_out_ref[...]                               # (1, dim)
    o_ref[0] = out.reshape(th, W, -1).astype(o_ref.dtype)


# -------------------------------- wrapper ---------------------------------- #

def feedforward_pallas(x_nchw, params, *, tile_h=8, compute_dtype=jnp.bfloat16):
    """Fused FeedForward forward.  x: (N, dim, H, W) NCHW; params in torch
    Conv2d layouts.  Returns (N, dim, H, W) float32."""
    w_in, b_in = params["project_in_w"], params["project_in_b"]
    w_dw, b_dw = params["dwconv_w"], params["dwconv_b"]
    w_out, b_out = params["project_out_w"], params["project_out_b"]

    n, dim, H, W = x_nchw.shape
    c2 = w_in.shape[0]
    hidden = c2 // 2
    hp = _round_up(max(hidden, 1), 128)          # lane-dense padded hidden
    c2p = 2 * hp

    th = tile_h if (H % tile_h == 0) else H      # row tile (halo recomputed)
    T = H // th
    Wp = _round_up(W + 2, 16)                    # padded slab width (aligned)

    # ---- weights: torch layouts -> lane-dense, zero-padded matmul layouts ---
    def pad_halves(a, axis):
        # keep [0:hidden] in slots [0:hidden] and [hidden:2h] in [hp:hp+hidden]
        a1, a2 = jnp.split(a, 2, axis=axis)
        pad = [(0, 0)] * a.ndim
        pad[axis] = (0, hp - hidden)
        return jnp.concatenate([jnp.pad(a1, pad), jnp.pad(a2, pad)], axis=axis)

    w_in_m = pad_halves(w_in[:, :, 0, 0].T, axis=1).astype(compute_dtype)   # (dim, 2hp)
    b_in_m = pad_halves(b_in, axis=0).reshape(1, c2p).astype(jnp.float32)
    w_dw_m = pad_halves(jnp.transpose(w_dw[:, 0], (1, 2, 0)).reshape(9, c2),
                        axis=1).astype(jnp.float32)                         # (9, 2hp)
    b_dw_m = pad_halves(b_dw, axis=0).reshape(1, c2p).astype(jnp.float32)
    w_out_m = jnp.pad(w_out[:, :, 0, 0].T,
                      ((0, hp - hidden), (0, 0))).astype(compute_dtype)     # (hp, dim)
    b_out_m = b_out.reshape(1, dim).astype(jnp.float32)

    # ---- activations: NCHW -> NHWC, zero spatial pad, overlapping row tiles -
    x_nhwc = jnp.transpose(x_nchw, (0, 2, 3, 1))
    xp = jnp.pad(x_nhwc, ((0, 0), (1, 1), (1, Wp - W - 1), (0, 0)))
    ridx = jnp.arange(T)[:, None] * th + jnp.arange(th + 2)[None, :]
    x_halo = xp[:, ridx]                                     # (N, T, th+2, Wp, dim)
    x_halo = x_halo.reshape(n * T, th + 2, Wp, dim).astype(compute_dtype)

    kernel = functools.partial(_ffn_kernel, H=H, W=W, th=th, Wp=Wp, hp=hp)
    const = lambda i, j: (0, 0)                              # resident weights

    out = pl.pallas_call(
        kernel,
        out_shape=jax.ShapeDtypeStruct((n, H, W, dim), jnp.float32),
        grid=(n, T),
        in_specs=[
            pl.BlockSpec((1, th + 2, Wp, dim), lambda i, j: (i * T + j, 0, 0, 0)),
            pl.BlockSpec((dim, c2p), const),
            pl.BlockSpec((1, c2p), const),
            pl.BlockSpec((9, c2p), const),
            pl.BlockSpec((1, c2p), const),
            pl.BlockSpec((hp, dim), const),
            pl.BlockSpec((1, dim), const),
        ],
        out_specs=pl.BlockSpec((1, th, W, dim), lambda i, j: (i, j, 0, 0)),
        compiler_params=pltpu.CompilerParams(
            dimension_semantics=("parallel", "parallel"),
            vmem_limit_bytes=32 * 1024 * 1024,
        ),
    )(x_halo, w_in_m, b_in_m, w_dw_m, b_dw_m, w_out_m, b_out_m)

    return jnp.transpose(out, (0, 3, 1, 2))                  # NHWC -> NCHW


# -------------------------- params / pure-JAX ref --------------------------- #

def init_feedforward_params(key, dim, ffn_expansion_factor, bias=True):
    """Torch-shaped Conv2d weights for FeedForward (fan-in scaled)."""
    hidden = int(dim * ffn_expansion_factor)
    c2 = 2 * hidden
    ks = jax.random.split(key, 6)

    def conv_w(k, co, ci, kh, kw):
        return jax.random.normal(k, (co, ci, kh, kw), jnp.float32) / jnp.sqrt(ci * kh * kw)

    def conv_b(k, co):
        return (0.1 * jax.random.normal(k, (co,), jnp.float32) if bias
                else jnp.zeros((co,), jnp.float32))

    return {
        "project_in_w": conv_w(ks[0], c2, dim, 1, 1),
        "project_in_b": conv_b(ks[3], c2),
        "dwconv_w": conv_w(ks[1], c2, 1, 3, 3),
        "dwconv_b": conv_b(ks[4], c2),
        "project_out_w": conv_w(ks[2], dim, hidden, 1, 1),
        "project_out_b": conv_b(ks[5], dim),
    }


def feedforward_ref(x_nchw, params):
    """Pure-JAX f32 reference of the same forward pass (unpadded weights)."""
    dn = ("NHWC", "HWIO", "NHWC")
    x = jnp.transpose(x_nchw, (0, 2, 3, 1))
    w_in = jnp.transpose(params["project_in_w"], (2, 3, 1, 0))
    y = lax.conv_general_dilated(x, w_in, (1, 1), "VALID", dimension_numbers=dn)
    y = y + params["project_in_b"]
    c2 = w_in.shape[-1]
    w_dw = jnp.transpose(params["dwconv_w"], (2, 3, 1, 0))
    z = lax.conv_general_dilated(y, w_dw, (1, 1), [(1, 1), (1, 1)],
                                 dimension_numbers=dn, feature_group_count=c2)
    z = z + params["dwconv_b"]
    x1, x2 = jnp.split(z, 2, axis=-1)
    g = _gelu_tanh(x1) * x2
    w_out = jnp.transpose(params["project_out_w"], (2, 3, 1, 0))
    o = lax.conv_general_dilated(g, w_out, (1, 1), "VALID", dimension_numbers=dn)
    o = o + params["project_out_b"]
    return jnp.transpose(o, (0, 3, 1, 2))


if __name__ == "__main__":
    key = jax.random.PRNGKey(0)
    kx, kp = jax.random.split(key)

    N, DIM, H, W = 2, 4, 16, 16
    FFN_EXPANSION, BIAS = 2.0, True          # hidden = 8, dwconv channels = 16

    x = jax.random.normal(kx, (N, DIM, H, W), jnp.float32)   # PyTorch NCHW input
    params = init_feedforward_params(kp, DIM, FFN_EXPANSION, bias=BIAS)

    out = feedforward_pallas(x, params, tile_h=8)
    out = jax.block_until_ready(out)
    assert out.shape == (N, DIM, H, W), out.shape

    ref = feedforward_ref(x, params)
    err = jnp.abs(out - ref)
    max_err = float(jnp.max(err))
    mean_err = float(jnp.mean(err))
    ref_max = float(jnp.max(jnp.abs(ref)))
    ref_mean = float(jnp.mean(jnp.abs(ref)))
    # Tolerances account for bf16 MXU inputs (f32 accumulation everywhere).
    assert max_err < 1e-1 * max(1.0, ref_max), (max_err, ref_max)
    assert mean_err < 3e-2 * max(1e-3, ref_mean), (mean_err, ref_mean)

    print("KERNEL_OK")
</pallas_src>

<mosaic_0001>
module attributes {stable_mosaic.version = 11 : i64} {
  func.func @_ffn_kernel(%arg0: i32, %arg1: i32, %arg2: memref<1x10x32x4xbf16, #tpu.memory_space<vmem>>, %arg3: memref<4x256xbf16, #tpu.memory_space<vmem>>, %arg4: memref<1x256xf32, #tpu.memory_space<vmem>>, %arg5: memref<9x256xf32, #tpu.memory_space<vmem>>, %arg6: memref<1x256xf32, #tpu.memory_space<vmem>>, %arg7: memref<128x4xbf16, #tpu.memory_space<vmem>>, %arg8: memref<1x4xf32, #tpu.memory_space<vmem>>, %arg9: memref<1x8x16x4xf32, #tpu.memory_space<vmem>>) attributes {dimension_semantics = [#tpu.dimension_semantics<parallel>, #tpu.dimension_semantics<parallel>], iteration_bounds = array<i64: 2, 2>, scalar_prefetch = 0 : i64, scratch_operands = 0 : i64, tpu.core_type = #tpu.core_type<tc>, window_params = [{transform_indices = @transform_0, window_bounds = array<i64: 1, 10, 32, 4>}, {pipeline_mode = #tpu.pipeline_mode<synchronous>, transform_indices = @transform_1, window_bounds = array<i64: 4, 256>}, {pipeline_mode = #tpu.pipeline_mode<synchronous>, transform_indices = @transform_2, window_bounds = array<i64: 1, 256>}, {pipeline_mode = #tpu.pipeline_mode<synchronous>, transform_indices = @transform_3, window_bounds = array<i64: 9, 256>}, {pipeline_mode = #tpu.pipeline_mode<synchronous>, transform_indices = @transform_4, window_bounds = array<i64: 1, 256>}, {pipeline_mode = #tpu.pipeline_mode<synchronous>, transform_indices = @transform_5, window_bounds = array<i64: 128, 4>}, {pipeline_mode = #tpu.pipeline_mode<synchronous>, transform_indices = @transform_6, window_bounds = array<i64: 1, 4>}, {transform_indices = @transform_7, window_bounds = array<i64: 1, 8, 16, 4>}]} {
    %c0 = arith.constant 0 : index
    %c0_0 = arith.constant 0 : index
    %c0_1 = arith.constant 0 : index
    %c0_2 = arith.constant 0 : index
    %0 = vector.load %arg2[%c0, %c0_0, %c0_1, %c0_2] : memref<1x10x32x4xbf16, #tpu.memory_space<vmem>>, vector<1x10x32x4xbf16>
    %1 = vector.shape_cast %0 : vector<1x10x32x4xbf16> to vector<10x32x4xbf16>
    %2 = vector.shape_cast %1 : vector<10x32x4xbf16> to vector<320x4xbf16>
    %c0_3 = arith.constant 0 : index
    %c0_4 = arith.constant 0 : index
    %3 = vector.load %arg3[%c0_3, %c0_4] : memref<4x256xbf16, #tpu.memory_space<vmem>>, vector<4x256xbf16>
    %cst = arith.constant dense<0.000000e+00> : vector<320x256xf32>
    %4 = tpu.matmul %2, %3, %cst {dimension_numbers = #tpu.dot_dimension_numbers<[1], [0], [0], [1], [0, 0, 1, 1], [], []>} : vector<320x4xbf16>, vector<4x256xbf16>, vector<320x256xf32> -> vector<320x256xf32>
    %c0_5 = arith.constant 0 : index
    %c0_6 = arith.constant 0 : index
    %5 = vector.load %arg4[%c0_5, %c0_6] : memref<1x256xf32, #tpu.memory_space<vmem>>, vector<1x256xf32>
    %6 = vector.broadcast %5 : vector<1x256xf32> to vector<320x256xf32>
    %7 = arith.addf %4, %6 : vector<320x256xf32>
    %8 = vector.shape_cast %7 : vector<320x256xf32> to vector<10x32x256xf32>
    %c8_i32 = arith.constant 8 : i32
    %9 = arith.muli %arg1, %c8_i32 : i32
    %c1_i32 = arith.constant 1 : i32
    %10 = arith.subi %9, %c1_i32 : i32
    %11 = tpu.iota {dimensions = array<i32: 0>} : vector<10x32x1xi32>
    %12 = vector.broadcast %10 : i32 to vector<10x32x1xi32>
    %13 = arith.addi %11, %12 : vector<10x32x1xi32>
    %14 = tpu.iota {dimensions = array<i32: 1>} : vector<10x32x1xi32>
    %c0_i32 = arith.constant 0 : i32
    %15 = vector.broadcast %c0_i32 : i32 to vector<10x32x1xi32>
    %16 = arith.cmpi sge, %13, %15 : vector<10x32x1xi32>
    %c16_i32 = arith.constant 16 : i32
    %17 = vector.broadcast %c16_i32 : i32 to vector<10x32x1xi32>
    %18 = arith.cmpi slt, %13, %17 : vector<10x32x1xi32>
    %19 = arith.andi %16, %18 : vector<10x32x1xi1>
    %c1_i32_7 = arith.constant 1 : i32
    %20 = vector.broadcast %c1_i32_7 : i32 to vector<10x32x1xi32>
    %21 = arith.cmpi sge, %14, %20 : vector<10x32x1xi32>
    %22 = arith.andi %19, %21 : vector<10x32x1xi1>
    %c16_i32_8 = arith.constant 16 : i32
    %23 = vector.broadcast %c16_i32_8 : i32 to vector<10x32x1xi32>
    %24 = arith.cmpi sle, %14, %23 : vector<10x32x1xi32>
    %25 = arith.andi %22, %24 : vector<10x32x1xi1>
    %cst_9 = arith.constant 0.000000e+00 : f32
    %26 = vector.shape_cast %25 : vector<10x32x1xi1> to vector<10x32x1xi1>
    %27 = vector.broadcast %26 : vector<10x32x1xi1> to vector<10x32x256xi1>
    %28 = vector.broadcast %cst_9 : f32 to vector<10x32x256xf32>
    %29 = arith.select %27, %8, %28 : vector<10x32x256xi1>, vector<10x32x256xf32>
    %c0_10 = arith.constant 0 : index
    %c0_11 = arith.constant 0 : index
    %30 = vector.load %arg5[%c0_10, %c0_11] : memref<9x256xf32, #tpu.memory_space<vmem>>, vector<9x256xf32>
    %cst_12 = arith.constant 0.000000e+00 : f32
    %31 = vector.broadcast %cst_12 : f32 to vector<8x16x256xf32>
    %32 = vector.extract_strided_slice %30 {offsets = [0, 0], sizes = [1, 256], strides = [1, 1]} : vector<9x256xf32> to vector<1x256xf32>
    %33 = vector.extract_strided_slice %29 {offsets = [0, 0, 0], sizes = [8, 16, 256], strides = [1, 1, 1]} : vector<10x32x256xf32> to vector<8x16x256xf32>
    %34 = vector.shape_cast %32 : vector<1x256xf32> to vector<1x1x256xf32>
    %35 = vector.broadcast %34 : vector<1x1x256xf32> to vector<8x16x256xf32>
    %36 = arith.mulf %35, %33 : vector<8x16x256xf32>
    %37 = arith.addf %31, %36 : vector<8x16x256xf32>
    %38 = vector.extract_strided_slice %30 {offsets = [1, 0], sizes = [1, 256], strides = [1, 1]} : vector<9x256xf32> to vector<1x256xf32>
    %39 = vector.extract_strided_slice %29 {offsets = [0, 1, 0], sizes = [8, 16, 256], strides = [1, 1, 1]} : vector<10x32x256xf32> to vector<8x16x256xf32>
    %40 = vector.shape_cast %38 : vector<1x256xf32> to vector<1x1x256xf32>
    %41 = vector.broadcast %40 : vector<1x1x256xf32> to vector<8x16x256xf32>
    %42 = arith.mulf %41, %39 : vector<8x16x256xf32>
    %43 = arith.addf %37, %42 : vector<8x16x256xf32>
    %44 = vector.extract_strided_slice %30 {offsets = [2, 0], sizes = [1, 256], strides = [1, 1]} : vector<9x256xf32> to vector<1x256xf32>
    %45 = vector.extract_strided_slice %29 {offsets = [0, 2, 0], sizes = [8, 16, 256], strides = [1, 1, 1]} : vector<10x32x256xf32> to vector<8x16x256xf32>
    %46 = vector.shape_cast %44 : vector<1x256xf32> to vector<1x1x256xf32>
    %47 = vector.broadcast %46 : vector<1x1x256xf32> to vector<8x16x256xf32>
    %48 = arith.mulf %47, %45 : vector<8x16x256xf32>
    %49 = arith.addf %43, %48 : vector<8x16x256xf32>
    %50 = vector.extract_strided_slice %30 {offsets = [3, 0], sizes = [1, 256], strides = [1, 1]} : vector<9x256xf32> to vector<1x256xf32>
    %51 = vector.extract_strided_slice %29 {offsets = [1, 0, 0], sizes = [8, 16, 256], strides = [1, 1, 1]} : vector<10x32x256xf32> to vector<8x16x256xf32>
    %52 = vector.shape_cast %50 : vector<1x256xf32> to vector<1x1x256xf32>
    %53 = vector.broadcast %52 : vector<1x1x256xf32> to vector<8x16x256xf32>
    %54 = arith.mulf %53, %51 : vector<8x16x256xf32>
    %55 = arith.addf %49, %54 : vector<8x16x256xf32>
    %56 = vector.extract_strided_slice %30 {offsets = [4, 0], sizes = [1, 256], strides = [1, 1]} : vector<9x256xf32> to vector<1x256xf32>
    %57 = vector.extract_strided_slice %29 {offsets = [1, 1, 0], sizes = [8, 16, 256], strides = [1, 1, 1]} : vector<10x32x256xf32> to vector<8x16x256xf32>
    %58 = vector.shape_cast %56 : vector<1x256xf32> to vector<1x1x256xf32>
    %59 = vector.broadcast %58 : vector<1x1x256xf32> to vector<8x16x256xf32>
    %60 = arith.mulf %59, %57 : vector<8x16x256xf32>
    %61 = arith.addf %55, %60 : vector<8x16x256xf32>
    %62 = vector.extract_strided_slice %30 {offsets = [5, 0], sizes = [1, 256], strides = [1, 1]} : vector<9x256xf32> to vector<1x256xf32>
    %63 = vector.extract_strided_slice %29 {offsets = [1, 2, 0], sizes = [8, 16, 256], strides = [1, 1, 1]} : vector<10x32x256xf32> to vector<8x16x256xf32>
    %64 = vector.shape_cast %62 : vector<1x256xf32> to vector<1x1x256xf32>
    %65 = vector.broadcast %64 : vector<1x1x256xf32> to vector<8x16x256xf32>
    %66 = arith.mulf %65, %63 : vector<8x16x256xf32>
    %67 = arith.addf %61, %66 : vector<8x16x256xf32>
    %68 = vector.extract_strided_slice %30 {offsets = [6, 0], sizes = [1, 256], strides = [1, 1]} : vector<9x256xf32> to vector<1x256xf32>
    %69 = vector.extract_strided_slice %29 {offsets = [2, 0, 0], sizes = [8, 16, 256], strides = [1, 1, 1]} : vector<10x32x256xf32> to vector<8x16x256xf32>
    %70 = vector.shape_cast %68 : vector<1x256xf32> to vector<1x1x256xf32>
    %71 = vector.broadcast %70 : vector<1x1x256xf32> to vector<8x16x256xf32>
    %72 = arith.mulf %71, %69 : vector<8x16x256xf32>
    %73 = arith.addf %67, %72 : vector<8x16x256xf32>
    %74 = vector.extract_strided_slice %30 {offsets = [7, 0], sizes = [1, 256], strides = [1, 1]} : vector<9x256xf32> to vector<1x256xf32>
    %75 = vector.extract_strided_slice %29 {offsets = [2, 1, 0], sizes = [8, 16, 256], strides = [1, 1, 1]} : vector<10x32x256xf32> to vector<8x16x256xf32>
    %76 = vector.shape_cast %74 : vector<1x256xf32> to vector<1x1x256xf32>
    %77 = vector.broadcast %76 : vector<1x1x256xf32> to vector<8x16x256xf32>
    %78 = arith.mulf %77, %75 : vector<8x16x256xf32>
    %79 = arith.addf %73, %78 : vector<8x16x256xf32>
    %80 = vector.extract_strided_slice %30 {offsets = [8, 0], sizes = [1, 256], strides = [1, 1]} : vector<9x256xf32> to vector<1x256xf32>
    %81 = vector.extract_strided_slice %29 {offsets = [2, 2, 0], sizes = [8, 16, 256], strides = [1, 1, 1]} : vector<10x32x256xf32> to vector<8x16x256xf32>
    %82 = vector.shape_cast %80 : vector<1x256xf32> to vector<1x1x256xf32>
    %83 = vector.broadcast %82 : vector<1x1x256xf32> to vector<8x16x256xf32>
    %84 = arith.mulf %83, %81 : vector<8x16x256xf32>
    %85 = arith.addf %79, %84 : vector<8x16x256xf32>
    %c0_13 = arith.constant 0 : index
    %c0_14 = arith.constant 0 : index
    %86 = vector.load %arg6[%c0_13, %c0_14] : memref<1x256xf32, #tpu.memory_space<vmem>>, vector<1x256xf32>
    %87 = vector.shape_cast %86 : vector<1x256xf32> to vector<1x1x256xf32>
    %88 = vector.broadcast %87 : vector<1x1x256xf32> to vector<8x16x256xf32>
    %89 = arith.addf %85, %88 : vector<8x16x256xf32>
    %90 = vector.extract_strided_slice %89 {offsets = [0, 0, 0], sizes = [8, 16, 128], strides = [1, 1, 1]} : vector<8x16x256xf32> to vector<8x16x128xf32>
    %cst_15 = arith.constant 5.000000e-01 : f32
    %91 = vector.broadcast %cst_15 : f32 to vector<8x16x128xf32>
    %92 = arith.mulf %91, %90 : vector<8x16x128xf32>
    %cst_16 = arith.constant 4.471500e-02 : f32
    %93 = vector.broadcast %cst_16 : f32 to vector<8x16x128xf32>
    %94 = arith.mulf %93, %90 : vector<8x16x128xf32>
    %95 = arith.mulf %94, %90 : vector<8x16x128xf32>
    %96 = arith.mulf %95, %90 : vector<8x16x128xf32>
    %97 = arith.addf %90, %96 : vector<8x16x128xf32>
    %cst_17 = arith.constant 0.797884583 : f32
    %98 = vector.broadcast %cst_17 : f32 to vector<8x16x128xf32>
    %99 = arith.mulf %98, %97 : vector<8x16x128xf32>
    %100 = math.tanh %99 : vector<8x16x128xf32>
    %cst_18 = arith.constant 1.000000e+00 : f32
    %101 = vector.broadcast %cst_18 : f32 to vector<8x16x128xf32>
    %102 = arith.addf %101, %100 : vector<8x16x128xf32>
    %103 = arith.mulf %92, %102 : vector<8x16x128xf32>
    %104 = vector.extract_strided_slice %89 {offsets = [0, 0, 128], sizes = [8, 16, 128], strides = [1, 1, 1]} : vector<8x16x256xf32> to vector<8x16x128xf32>
    %105 = arith.mulf %103, %104 : vector<8x16x128xf32>
    %106 = vector.shape_cast %105 : vector<8x16x128xf32> to vector<128x128xf32>
    %107 = arith.truncf %106 : vector<128x128xf32> to vector<128x128xbf16>
    %c0_19 = arith.constant 0 : index
    %c0_20 = arith.constant 0 : index
    %108 = vector.load %arg7[%c0_19, %c0_20] : memref<128x4xbf16, #tpu.memory_space<vmem>>, vector<128x4xbf16>
    %cst_21 = arith.constant dense<0.000000e+00> : vector<128x4xf32>
    %109 = tpu.matmul %107, %108, %cst_21 {dimension_numbers = #tpu.dot_dimension_numbers<[1], [0], [0], [1], [0, 0, 1, 1], [], []>} : vector<128x128xbf16>, vector<128x4xbf16>, vector<128x4xf32> -> vector<128x4xf32>
    %c0_22 = arith.constant 0 : index
    %c0_23 = arith.constant 0 : index
    %110 = vector.load %arg8[%c0_22, %c0_23] : memref<1x4xf32, #tpu.memory_space<vmem>>, vector<1x4xf32>
    %111 = vector.broadcast %110 : vector<1x4xf32> to vector<128x4xf32>
    %112 = arith.addf %109, %111 : vector<128x4xf32>
    %113 = vector.shape_cast %112 : vector<128x4xf32> to vector<8x16x4xf32>
    %c0_24 = arith.constant 0 : index
    %c0_25 = arith.constant 0 : index
    %c0_26 = arith.constant 0 : index
    %c0_27 = arith.constant 0 : index
    %114 = vector.load %arg9[%c0_24, %c0_25, %c0_26, %c0_27] : memref<1x8x16x4xf32, #tpu.memory_space<vmem>>, vector<1x8x16x4xf32>
    %115 = vector.shape_cast %114 : vector<1x8x16x4xf32> to vector<8x16x4xf32>
    %116 = vector.shape_cast %113 : vector<8x16x4xf32> to vector<1x8x16x4xf32>
    tpu.vector_store %arg9[%c0_24, %c0_25, %c0_26, %c0_27], %116 {strides = array<i32>} : memref<1x8x16x4xf32, #tpu.memory_space<vmem>>, vector<1x8x16x4xf32>,
    return
  }
  func.func @transform_0(%arg0: i32, %arg1: i32) -> (i32, i32, i32, i32) {
    %c2_i32 = arith.constant 2 : i32
    %0 = arith.muli %arg0, %c2_i32 : i32
    %1 = arith.addi %0, %arg1 : i32
    %c0_i32 = arith.constant 0 : i32
    %c0_i32_0 = arith.constant 0 : i32
    %c0_i32_1 = arith.constant 0 : i32
    %c0_i32_2 = arith.constant 0 : i32
    return %1, %c0_i32, %c0_i32_0, %c0_i32_1 : i32, i32, i32, i32
  }
  func.func @transform_1(%arg0: i32, %arg1: i32) -> (i32, i32) {
    %c0_i32 = arith.constant 0 : i32
    %c0_i32_0 = arith.constant 0 : i32
    %c0_i32_1 = arith.constant 0 : i32
    return %c0_i32, %c0_i32_0 : i32, i32
  }
  func.func @transform_2(%arg0: i32, %arg1: i32) -> (i32, i32) {
    %c0_i32 = arith.constant 0 : i32
    %c0_i32_0 = arith.constant 0 : i32
    %c0_i32_1 = arith.constant 0 : i32
    return %c0_i32, %c0_i32_0 : i32, i32
  }
  func.func @transform_3(%arg0: i32, %arg1: i32) -> (i32, i32) {
    %c0_i32 = arith.constant 0 : i32
    %c0_i32_0 = arith.constant 0 : i32
    %c0_i32_1 = arith.constant 0 : i32
    return %c0_i32, %c0_i32_0 : i32, i32
  }
  func.func @transform_4(%arg0: i32, %arg1: i32) -> (i32, i32) {
    %c0_i32 = arith.constant 0 : i32
    %c0_i32_0 = arith.constant 0 : i32
    %c0_i32_1 = arith.constant 0 : i32
    return %c0_i32, %c0_i32_0 : i32, i32
  }
  func.func @transform_5(%arg0: i32, %arg1: i32) -> (i32, i32) {
    %c0_i32 = arith.constant 0 : i32
    %c0_i32_0 = arith.constant 0 : i32
    %c0_i32_1 = arith.constant 0 : i32
    return %c0_i32, %c0_i32_0 : i32, i32
  }
  func.func @transform_6(%arg0: i32, %arg1: i32) -> (i32, i32) {
    %c0_i32 = arith.constant 0 : i32
    %c0_i32_0 = arith.constant 0 : i32
    %c0_i32_1 = arith.constant 0 : i32
    return %c0_i32, %c0_i32_0 : i32, i32
  }
  func.func @transform_7(%arg0: i32, %arg1: i32) -> (i32, i32, i32, i32) {
    %c0_i32 = arith.constant 0 : i32
    %c0_i32_0 = arith.constant 0 : i32
    %c0_i32_1 = arith.constant 0 : i32
    return %arg0, %arg1, %c0_i32, %c0_i32_0 : i32, i32, i32, i32
  }
}

</mosaic_0001>

<bundles_post_ra>
// kernel: tpu_custom_call.1
= control target key start
LH: loop header
LB: loop body
LE: loop exit
PB: predicated region body
PF: predicated region fallthrough
CT: control target
= control target key end

     0   :  { %s3497_s24 = smov 0   ;;  %s3499_s25 = smov 0   ;;  %s6398_s0 = inlined_call_operand.vmem [shape: bf16[4,10,32,4], index: 0, kind: input, shape index: {}]   ;;  %s6399_s1 = inlined_call_operand.vmem [shape: bf16[4,256], index: 1, kind: input, shape index: {}]   ;;  %s6400_s2 = inlined_call_operand.vmem [shape: f32[1,256], index: 2, kind: input, shape index: {}]   ;;  %s6401_s3 = inlined_call_operand.vmem [shape: f32[9,256], index: 3, kind: input, shape index: {}]   ;;  %s6402_s4 = inlined_call_operand.vmem [shape: f32[1,256], index: 4, kind: input, shape index: {}]   ;;  %s6403_s5 = inlined_call_operand.vmem [shape: bf16[128,4], index: 5, kind: input, shape index: {}]   ;;  %s6404_s6 = inlined_call_operand.vmem [shape: f32[1,4], index: 6, kind: input, shape index: {}]   ;;  %s6405_s7 = inlined_call_operand.vmem [shape: f32[2,16,16,4], index: 7, kind: output, shape index: {}]  }
   0x1   :  { %s3501_s26 = smov 0   ;;  %s3503_s27 = smov 0  }
   0x2   :  { %s3505_s28 = smov 0  }
   0x3 LB: > { %s26_s29 = sadd.s32 1, %s3446_s26  ;;  %s29_s30 = sadd.s32 1, %s3450_s27  ;;  %s3454_s28 = sphi %s3505_s28, %s17_s28   ;;  %s3450_s27 = sphi %s3503_s27, %s7161_s27   ;;  %s3446_s26 = sphi %s3501_s26, %s7160_s26   ;;  %s3442_s25 = sphi %s3499_s25, %s7159_s25   ;;  %s3438_s24 = sphi %s3497_s24, %s7158_s24  }
   0x4   : > { %p27_p0 = scmp.ge.s32.totalorder %s26_s29, 2  ;;  %p3196_p1 = scmp.ge.s32.totalorder %s3454_s28, 1 }
   0x5   : > { %p259_p2 = scmp.lt.s32.totalorder %s3454_s28, 5 }
   0x6   : > { %s7163_s29 = smov (%p27_p0, %s26_s29), 0  ;;  %s7165_s30 = smov (!%p27_p0, %s29_s30), %s3450_s27 }
   0x7   : > { %p260_p3 = pnand %p3196_p1, %p259_p2  ;;  %p31_p4 = scmp.ge.s32.totalorder %s7165_s30, 2 }
   0x9   : > { %s7167_s30 = smov (%p31_p4, %s7165_s30), 0  ;;  %263 = sbr.rel (%p260_p3) target bundleno = 857 (0x359), region = 48 }
  0x10   : > { %v3223_v0 = vld.sshfl [vmem:[%s6399_s1] sm:$0x33 pattern:$0x76325410]  ;;  %vm542_vm0 = vcmask 1041408   ;;  %v3456_v3 = vmov 0   ;;  %v362_v24 = vlaneseq }
  0x11   : > { %v480_v1 = vcombine.high %v3223_v0, %v3223_v0  ;;  %v544_v2 = vsel %vm542_vm0, %v3223_v0, 0  ;;  %581 = vmatprep.mubr.bf16.mxu0 %v3456_v3  ;;  %689 = vmatprep.mubr.bf16.mxu1 %v3456_v3  ;;  %s3197_s10 = sshll.u32 %s3442_s25, 1  ;;  %vm481_vm1 = vcmask 31744   ;;  %s3602_s16 = sshll.u32 %s3438_s24, 3  ;;  %v360_v29 = vld [vmem:[%s6400_s2] sm:$0x3] }
  0x12   : > { %s299_s11 = sadd.s32 %s3438_s24, %s3197_s10  ;;  %v3604_v25 = vshrl.u32 %v362_v24, 7  ;;  %s3246_s17 = sadd.s32 4294967295, %s3602_s16  ;;  %v994_v31 = vld [vmem:[%s6401_s3] sm:$0xff]  ;;  %v995_v34 = vld [vmem:[%s6401_s3 + $0x8] sm:$0xff]  ;;  %vm1174_vm6 = vcmask 1046528   ;;  %vm1423_vm8 = vcmask 1045504  }
  0x13   : > { %3224 = vmatprep.subr.msk.bf16.mxu0 %vm542_vm0, %v480_v1  ;;  %3308 = vmatprep.subr.msk.bf16.mxu1 %vm542_vm0, %v480_v1  ;;  %p300_p5 = scmp.lt.s32.totalorder %s299_s11, 3  ;;  %v3613_v28 = vstv %s3246_s17  ;;  %p308_p6 = scmp.lt.s32.totalorder %s3442_s25, 1 }
  0x14   : > { %550 = vmatpush1.bf16.msra.mxu0 %v544_v2  ;;  %3309 = vmatpush1.bf16.msra.mxu1 %v544_v2  ;;  %6564 = vst [vmem:[#allocation2_spill] sm:$0xff] %v3604_v25  ;;  %v3608_v26 = vsub.s32 0, %v3604_v25  ;;  %v3611_v27 = vsub.s32 1, %v3604_v25  ;;  %6566 = vst [vmem:[#allocation4_spill] sm:$0xff] %v3613_v28  ;;  %v1321_v30 = vsub.s32 2, %v3604_v25  ;;  %vm778_vm2 = vcmp.ge.s32.totalorder %v3613_v28, 0 }
  0x15   : > { %s7169_s11 = smov (!%p300_p5, %s299_s11), 3  ;;  %vm788_vm3 = vcmp.lt.s32.totalorder %v3613_v28, 16  ;;  %v3634_v35 = vadd.s32 16, %v3604_v25  ;;  %v1570_v36 = vsub.s32 3, %v3604_v25  ;;  %v1642_v37 = vsub.s32 4, %v3604_v25  ;;  %p310_p7 = scmp.lt.s32.totalorder %s3602_s16, 15 }
  0x16   : > { %s3310_s12 = smul.u32 160, %s7169_s11  ;;  %6565 = vst [vmem:[#allocation3_spill] sm:$0xff] %v3611_v27  ;;  %v3625_v32 = vrot.slane %v360_v29, %v3608_v26  ;;  %v3628_v33 = vrot.slane %v360_v29, %v3611_v27  ;;  %v1890_v38 = vsub.s32 5, %v3604_v25  ;;  %vm3639_vm4 = vmand %vm778_vm2, %vm788_vm3  ;;  %vm808_vm5 = vcmp.ge.s32.totalorder %v3604_v25, 1  ;;  %s7171_s25 = smov (!%p308_p6, %s3442_s25), 1 }
  0x17   : > { %6567 = vst [vmem:[#allocation5_spill] sm:$0xff] %v3634_v35  ;;  %v3645_v40 = vrot.slane %v994_v31, %v3608_v26  ;;  %v3648_v41 = vrot.slane %v994_v31, %v3611_v27  ;;  %v3650_v42 = vrot.slane %v994_v31, %v1321_v30  ;;  %v3653_v43 = vrot.slane %v995_v34, %v3608_v26  ;;  %vm3670_vm7 = vmand %vm3639_vm4, %vm808_vm5  ;;  %s7173_s16 = smov (!%p310_p7, %s3602_s16), 15  ;;  %s3201_s23 = sshll.u32 %s7171_s25, 5 }
  0x18   : > { %s3541_s15 = scalar_lea.vmem %s6398_s0, %s3310_s12  ;;  %v3656_v44 = vrot.slane %v995_v34, %v3611_v27  ;;  %v770_v45 = vadd.s32 6, %v3613_v28  ;;  %v2138_v46 = vsub.s32 6, %v3604_v25  ;;  %v3660_v47 = vrot.slane %v995_v34, %v1321_v30  ;;  %s3200_s22 = sshll.u32 %s7173_s16, 1 }
  0x19   : > { %v3352_v4 = vld [vmem:[%s3541_s15] sm:$0xff]   ;;  %v3354_v6 = vld [vmem:[%s3541_s15 + $0x8] sm:$0xff]   ;;  %v3356_v8 = vld [vmem:[%s3541_s15 + $0x10] sm:$0xff]   ;;  %6570 = vst [vmem:[#allocation6_spill] sm:$0xff] %v3645_v40  ;;  %v3663_v48 = vadd.s32 1, %v3613_v28  ;;  %v2210_v49 = vsub.s32 7, %v3604_v25  ;;  %v3675_v52 = vrot.slane %v994_v31, %v1570_v36  ;;  %v3677_v53 = vrot.slane %v994_v31, %v1642_v37  ;;  %s314_s24 = sadd.s32 %s3201_s23, %s3200_s22 }
  0x1a   : > { %v3353_v5 = vld [vmem:[%s3541_s15 + $0x60] sm:$0xff]   ;;  %3225 = vmatmul.mubr.msk.bf16.vlgmr.msra.gmra.mrb[0].mxu0 %vm481_vm1, %v3352_v4  ;;  %v3355_v7 = vld [vmem:[%s3541_s15 + $0x68] sm:$0xff]   ;;  %v3357_v9 = vld [vmem:[%s3541_s15 + $0x70] sm:$0xff]   ;;  %6571 = vst [vmem:[#allocation7_spill] sm:$0xff] %v3650_v42  ;;  %vm843_vm9 = vcmp.le.s32.totalorder %v3634_v35, 16  ;;  %v3679_v54 = vrot.slane %v994_v31, %v1890_v38  ;;  %v3682_v57 = vrot.slane %v995_v34, %v1570_v36  ;;  %v3684_v58 = vrot.slane %v995_v34, %v1642_v37  ;;  %s3202_s8 = sshll.u32 %s314_s24, 3 }
  0x1b   : > { %3237 = vmatmul.mubr.msk.bf16.vlgmr.msra.gmra.mrb[0].mxu1 %vm481_vm1, %v3353_v5  ;;  %591 = vmatprep.mubr.bf16.mxu0 %v3456_v3  ;;  %v3358_v10 = vld [vmem:[%s3541_s15 + $0x18] sm:$0xff]   ;;  %v3360_v12 = vld [vmem:[%s3541_s15 + $0x20] sm:$0xff]   ;;  %v3362_v14 = vld [vmem:[%s3541_s15 + $0x28] sm:$0xff]   ;;  %6572 = vst [vmem:[#allocation8_spill] sm:$0xff] %v3653_v43  ;;  %v3686_v59 = vrot.slane %v995_v34, %v1890_v38  ;;  %vm784_vm10 = vcmp.ge.s32.totalorder %v770_v45, 0  ;;  %vm794_vm11 = vcmp.lt.s32.totalorder %v770_v45, 16  ;;  %v3689_v63 = vrot.slane %v994_v31, %v2138_v46  ;;  %s6349_s13 = scalar_lea.vmem %s6405_s7, %s3202_s8 }
  0x1c   : > { %699 = vmatprep.mubr.bf16.mxu1 %v3456_v3  ;;  %v3359_v11 = vld [vmem:[%s3541_s15 + $0x78] sm:$0xff]   ;;  %v3361_v13 = vld [vmem:[%s3541_s15 + $0x80] sm:$0xff]   ;;  %v3363_v15 = vld [vmem:[%s3541_s15 + $0x88] sm:$0xff]   ;;  %6573 = vst [vmem:[#allocation9_spill] sm:$0xff] %v3656_v44  ;;  %vm779_vm12 = vcmp.ge.s32.totalorder %v3663_v48, 0  ;;  %vm789_vm13 = vcmp.lt.s32.totalorder %v3663_v48, 16  ;;  %v3696_v4 = vrot.slane %v994_v31, %v2210_v49 }
  0x1d   : > { %v3364_v16 = vld [vmem:[%s3541_s15 + $0x30] sm:$0xff]   ;;  %v3366_v18 = vld [vmem:[%s3541_s15 + $0x38] sm:$0xff]   ;;  %v3368_v20 = vld [vmem:[%s3541_s15 + $0x40] sm:$0xff]   ;;  %6574 = vst [vmem:[#allocation10_spill] sm:$0xff] %v3660_v47 }
  0x1e   : > { %v3365_v17 = vld [vmem:[%s3541_s15 + $0x90] sm:$0xff]   ;;  %v3367_v19 = vld [vmem:[%s3541_s15 + $0x98] sm:$0xff]   ;;  %v3369_v21 = vld [vmem:[%s3541_s15 + $0x48] sm:$0xff]   ;;  %6577 = vst [vmem:[#allocation11_spill] sm:$0xff] %v3675_v52 }
  0x1f   : > { %v3370_v22 = vld [vmem:[%s3541_s15 + $0x50] sm:$0xff]   ;;  %v3371_v23 = vld [vmem:[%s3541_s15 + $0x58] sm:$0xff]   ;;  %6578 = vst [vmem:[#allocation12_spill] sm:$0xff] %v3682_v57  ;;  %6579 = vst [vmem:[#allocation13_spill] sm:$0xff] %v3684_v58 }
  0x20   : > { %6580 = vst [vmem:[#allocation14_spill] sm:$0xff] %v3686_v59  ;;  %6581 = vst [vmem:[#allocation15_spill] sm:$0xff] %v3689_v63 }
  0x21   : > { %vm3739_vm14 = vmand %vm3639_vm4, %vm843_vm9 }
  0x22   : > { %3226 = vmatmul.mubr.msk.bf16.gmra.mrb[4].mxu0 %vm481_vm1, %v3354_v6  ;;  %v3700_v6 = vrot.slane %v995_v34, %v2210_v49  ;;  %vm3748_vm15 = vmand %vm784_vm10, %vm794_vm11 }
  0x23   : > { %3238 = vmatmul.mubr.msk.bf16.gmra.mrb[4].mxu1 %vm481_vm1, %v3355_v7  ;;  %599 = vmatprep.mubr.bf16.mxu0 %v3456_v3  ;;  %v2704_v7 = vld [vmem:[%s6402_s4] sm:$0x3]  ;;  %vm3769_vm0 = vmand %vm3748_vm15, %vm808_vm5 }
  0x24   : > { %707 = vmatprep.mubr.bf16.mxu1 %v3456_v3  ;;  %vm3783_vm2 = vmand %vm779_vm12, %vm789_vm13 }
  0x25   : > { %vm3804_vm3 = vmand %vm3783_vm2, %vm808_vm5 }
  0x26   : > { %vm4158_vm11 = vmand %vm3783_vm2, %vm843_vm9 }
  0x2a   : > { %3227 = vmatmul.mubr.msk.bf16.gmra.mrb[8].mxu0 %vm481_vm1, %v3356_v8 }
  0x2b   : > { %3239 = vmatmul.mubr.msk.bf16.gmra.mrb[8].mxu1 %vm481_vm1, %v3357_v9  ;;  %609 = vmatprep.mubr.bf16.mxu0 %v3456_v3 }
  0x2c   : > { %717 = vmatprep.mubr.bf16.mxu1 %v3456_v3 }
  0x32   : > { %3228 = vmatmul.mubr.msk.bf16.gmra.mrb[12].mxu0 %vm481_vm1, %v3358_v10 }
  0x33   : > { %3240 = vmatmul.mubr.msk.bf16.gmra.mrb[12].mxu1 %vm481_vm1, %v3359_v11  ;;  %617 = vmatprep.mubr.bf16.mxu0 %v3456_v3 }
  0x34   : > { %725 = vmatprep.mubr.bf16.mxu1 %v3456_v3 }
  0x3a   : > { %3229 = vmatmul.mubr.msk.bf16.gmra.mrb[16].mxu0 %vm481_vm1, %v3360_v12  ;;  %v3712_v12 = vadd.s32 7, %v3613_v28 }
  0x3b   : > { %3241 = vmatmul.mubr.msk.bf16.gmra.mrb[16].mxu1 %vm481_vm1, %v3361_v13  ;;  %627 = vmatprep.mubr.bf16.mxu0 %v3456_v3 }
  0x3c   : > { %735 = vmatprep.mubr.bf16.mxu1 %v3456_v3  ;;  %vm795_vm10 = vcmp.lt.s32.totalorder %v3712_v12, 16 }
  0x42   : > { %3230 = vmatmul.mubr.msk.bf16.gmra.mrb[20].mxu0 %vm481_vm1, %v3362_v14 }
  0x43   : > { %3242 = vmatmul.mubr.msk.bf16.gmra.mrb[20].mxu1 %vm481_vm1, %v3363_v15  ;;  %635 = vmatprep.mubr.bf16.mxu0 %v3456_v3  ;;  %v3718_v15 = vadd.s32 2, %v3613_v28 }
  0x44   : > { %743 = vmatprep.mubr.bf16.mxu1 %v3456_v3 }
  0x45   : > { %6582 = vst [vmem:[#allocation16_spill] sm:$0xff] %v3718_v15 }
  0x4a   : > { %3231 = vmatmul.mubr.msk.bf16.gmra.mrb[24].mxu0 %vm481_vm1, %v3364_v16  ;;  %v3721_v16 = vadd.s32 8, %v3613_v28 }
  0x4b   : > { %3243 = vmatmul.mubr.msk.bf16.gmra.mrb[24].mxu1 %vm481_vm1, %v3365_v17  ;;  %645 = vmatprep.mubr.bf16.mxu0 %v3456_v3 }
  0x4c   : > { %753 = vmatprep.mubr.bf16.mxu1 %v3456_v3  ;;  %6583 = vst [vmem:[#allocation17_spill] sm:$0xff] %v3721_v16 }
  0x52   : > { %3232 = vmatmul.mubr.msk.bf16.gmra.mrb[28].mxu0 %vm481_vm1, %v3366_v18 }
  0x53   : > { %3244 = vmatmul.mubr.msk.bf16.gmra.mrb[28].mxu1 %vm481_vm1, %v3367_v19  ;;  %653 = vmatprep.mubr.bf16.mxu0 %v3456_v3  ;;  %v3725_v19 = vrot.slane %v995_v34, %v2138_v46 }
  0x55   : > { %6584 = vst [vmem:[#allocation18_spill] sm:$0xff] %v3725_v19 }
  0x5a   : > { %3233 = vmatmul.mubr.msk.bf16.gmra.mrb[32].mxu0 %vm481_vm1, %v3368_v20  ;;  %v3728_v20 = vrot.slane %v2704_v7, %v3608_v26 }
  0x5b   : > { %663 = vmatprep.mubr.bf16.mxu0 %v3456_v3 }
  0x5c   : > { %6585 = vst [vmem:[#allocation19_spill] sm:$0xff] %v3728_v20 }
  0x62   : > { %3234 = vmatmul.mubr.msk.bf16.gmra.mrb[36].mxu0 %vm481_vm1, %v3369_v21 }
  0x63   : > { %671 = vmatprep.mubr.bf16.mxu0 %v3456_v3 }
  0x6a   : > { %3235 = vmatmul.mubr.msk.bf16.gmra.mrb[40].mxu0 %vm481_vm1, %v3370_v22 }
  0x6b   : > { %681 = vmatprep.mubr.bf16.mxu0 %v3456_v3 }
  0x72   : > { %3236 = vmatmul.mubr.msk.bf16.gmra.mrb[44].mxu0 %vm481_vm1, %v3371_v23 }
  0xed   : > { %v583_v50 = vpop.f32.mrb[0].mxu0 }
  0xee   : > { %v584_v55 = vadd.f32 %v583_v50, %v3625_v32  ;;  %v585_v56 = vpop.f32.mrb[1].mxu0  ;;  %v691_v60 = vpop.f32.mrb[0].mxu1 }
  0xef   : > { %v586_v61 = vadd.f32 %v585_v56, %v3628_v33  ;;  %v587_v62 = vpop.f32.mrb[2].mxu0  ;;  %v693_v0 = vpop.f32.mrb[1].mxu1  ;;  %v692_v23 = vadd.f32 %v691_v60, %v3625_v32 }
  0xf0   : > { %v934_v1 = vsel %vm3670_vm7, %v584_v55, 0.0  ;;  %v588_v2 = vadd.f32 %v587_v62, %v3625_v32  ;;  %v589_v3 = vpop.f32.mrb[3].mxu0  ;;  %v3698_v5 = vpop.f32.mrb[2].mxu1  ;;  %v694_v24 = vadd.f32 %v693_v0, %v3628_v33 }
  0xf1   : > { %v1078_v8 = vmul.f32 %v3648_v41, %v934_v1  ;;  %v1327_v9 = vmul.f32 %v3650_v42, %v934_v1  ;;  %v935_v10 = vsel %vm3670_vm7, %v586_v61, 0.0  ;;  %v3709_v11 = vpop.f32.mrb[3].mxu1  ;;  %v590_v22 = vadd.f32 %v589_v3, %v3628_v33 }
  0xf2   : > { %v1079_v13 = vmul.f32 %v3656_v44, %v935_v10  ;;  %v936_v14 = vsel %vm3639_vm4, %v588_v2, 0.0  ;;  %v1328_v17 = vmul.f32 %v3660_v47, %v935_v10  ;;  %v1006_v29 = vmul.f32 %v3645_v40, %v934_v1 }
  0xf3   : > { %v1080_v18 = vmul.f32 %v3648_v41, %v936_v14  ;;  %v1329_v21 = vmul.f32 %v3650_v42, %v936_v14  ;;  %v1175_v30 = vrot.slane %v1078_v8, 1  ;;  %v1424_v31 = vrot.slane %v1327_v9, 2 }
  0xf4   : > { %v1178_v34 = vrot.slane %v1079_v13, 1  ;;  %v937_v46 = vsel %vm3639_vm4, %v590_v22, 0.0  ;;  %v1427_v56 = vrot.slane %v1328_v17, 2  ;;  %vm4024_vm4 = vmand %vm3748_vm15, %vm843_vm9  ;;  %vm785_vm7 = vcmp.ge.s32.totalorder %v3712_v12, 0 }
  0xf5   : > { %v1176_v36 = vrot.slane %v1080_v18, 1  ;;  %v593_v37 = vpop.f32.mrb[4].mxu0  ;;  %v1425_v38 = vrot.slane %v1329_v21, 2  ;;  %v1081_v61 = vmul.f32 %v3656_v44, %v937_v46  ;;  %v1330_v62 = vmul.f32 %v3660_v47, %v937_v46  ;;  %vm4235_vm12 = vmand %vm785_vm7, %vm795_vm10 }
  0xf6   : > { %v594_v49 = vadd.f32 %v593_v37, %v3625_v32  ;;  %v595_v50 = vpop.f32.mrb[5].mxu0  ;;  %v3752_v55 = vpop.f32.mrb[4].mxu1  ;;  %vm4264_vm13 = vmand %vm4235_vm12, %vm808_vm5 }
  0xf7   : > { %v1177_v60 = vsel %vm1174_vm6, %v1175_v30, %v1176_v36  ;;  %v597_v39 = vpop.f32.mrb[6].mxu0  ;;  %v3757_v0 = vpop.f32.mrb[5].mxu1  ;;  %v1426_v2 = vsel %vm1423_vm8, %v1424_v31, %v1425_v38  ;;  %v596_v3 = vadd.f32 %v595_v50, %v3628_v33  ;;  %v1179_v9 = vrot.slane %v1081_v61, 1 }
  0xf8   : > { %v1287_v1 = vadd.f32 %v1177_v60, %v1006_v29  ;;  %v938_v45 = vsel %vm3739_vm14, %v594_v49, 0.0  ;;  %v598_v7 = vpop.f32.mrb[7].mxu0  ;;  %v705_v8 = vpop.f32.mrb[6].mxu1  ;;  %v1428_v13 = vrot.slane %v1330_v62, 2  ;;  %v1007_v29 = vmul.f32 %v3653_v43, %v935_v10 }
  0xf9   : > { %v1082_v17 = vmul.f32 %v3648_v41, %v938_v45  ;;  %v1331_v18 = vmul.f32 %v3650_v42, %v938_v45  ;;  %v706_v22 = vpop.f32.mrb[7].mxu1  ;;  %v1008_v30 = vmul.f32 %v3645_v40, %v936_v14  ;;  %v939_v37 = vsel %vm3739_vm14, %v596_v3, 0.0 }
  0xfa   : > { %v1536_v31 = vadd.f32 %v1426_v2, %v1287_v1  ;;  %v1180_v49 = vsel %vm1174_vm6, %v1178_v34, %v1179_v9  ;;  %v1429_v50 = vsel %vm1423_vm8, %v1427_v56, %v1428_v13  ;;  %v1083_v14 = vmul.f32 %v3656_v44, %v939_v37 }
  0xfb   : > { %v1181_v60 = vrot.slane %v1082_v17, 1  ;;  %v1430_v61 = vrot.slane %v1331_v18, 2  ;;  %v1288_v10 = vadd.f32 %v1180_v49, %v1007_v29  ;;  %v1332_v26 = vmul.f32 %v3660_v47, %v939_v37 }
  0xfc   : > { %v3791_v34 = vsel %vm3769_vm0, %v692_v23, 0.0  ;;  %v1009_v56 = vmul.f32 %v3653_v43, %v937_v46  ;;  %v3798_v2 = vsel %vm3769_vm0, %v694_v24, 0.0  ;;  %v1183_v7 = vrot.slane %v1083_v14, 1  ;;  %vm4304_vm0 = vmand %vm4235_vm12, %vm843_vm9 }
  0xfd   : > { %v1182_v39 = vsel %vm1174_vm6, %v1176_v36, %v1181_v60  ;;  %v1431_v1 = vsel %vm1423_vm8, %v1425_v38, %v1430_v61  ;;  %v601_v48 = vpop.f32.mrb[8].mxu0  ;;  %6594 = vst [vmem:[#allocation20_spill] sm:$0xff] %v3798_v2  ;;  %v1537_v45 = vadd.f32 %v1429_v50, %v1288_v10  ;;  %v1432_v8 = vrot.slane %v1332_v26, 2 }
  0xfe   : > { %v1289_v3 = vadd.f32 %v1182_v39, %v1008_v30  ;;  %v603_v36 = vpop.f32.mrb[9].mxu0  ;;  %v3808_v46 = vpop.f32.mrb[8].mxu1  ;;  %v602_v38 = vadd.f32 %v601_v48, %v3625_v32  ;;  %v3814_v18 = vmul.f32 %v3648_v41, %v3791_v34  ;;  %v3818_v21 = vmul.f32 %v3650_v42, %v3791_v34 }
  0xff   : > { %v604_v24 = vadd.f32 %v603_v36, %v3628_v33  ;;  %v605_v17 = vpop.f32.mrb[10].mxu0  ;;  %v3820_v22 = vpop.f32.mrb[9].mxu1  ;;  %v1184_v30 = vsel %vm1174_vm6, %v1179_v9, %v1183_v7  ;;  %v1433_v37 = vsel %vm1423_vm8, %v1428_v13, %v1432_v8  ;;  %v3826_v50 = vadd.f32 %v3698_v5, %v3625_v32 }
 0x100   : > { %6597 = vst [vmem:[#allocation21_spill] sm:$0xff] %v3814_v18  ;;  %6598 = vst [vmem:[#allocation22_spill] sm:$0xff] %v3818_v21  ;;  %v1538_v29 = vadd.f32 %v1431_v1, %v1289_v3  ;;  %v607_v49 = vpop.f32.mrb[11].mxu0  ;;  %v3828_v60 = vpop.f32.mrb[10].mxu1  ;;  %v1290_v61 = vadd.f32 %v1184_v30, %v1009_v56  ;;  %v940_v10 = vsel %vm3804_vm3, %v602_v38, 0.0  ;;  %v3834_v14 = vmul.f32 %v3645_v40, %v3791_v34 }
 0x101   : > { %6599 = vst [vmem:[#allocation23_spill] sm:$0xff] %v3828_v60  ;;  %v3838_v9 = vmul.f32 %v3677_v53, %v3791_v34  ;;  %v3840_v13 = vpop.f32.mrb[11].mxu1  ;;  %v1084_v26 = vmul.f32 %v3648_v41, %v940_v10  ;;  %v1576_v5 = vmul.f32 %v3675_v52, %v940_v10  ;;  %v941_v56 = vsel %vm3804_vm3, %v604_v24, 0.0 }
 0x102   : > { %6600 = vst [vmem:[#allocation24_spill] sm:$0xff] %v3834_v14  ;;  %6601 = vst [vmem:[#allocation25_spill] sm:$0xff] %v3840_v13  ;;  %v606_v39 = vadd.f32 %v605_v17, %v3625_v32  ;;  %v3847_v1 = vadd.f32 %v1433_v37, %v1290_v61  ;;  %v1333_v48 = vmul.f32 %v3650_v42, %v940_v10 }
 0x103   : > { %v1608_v8 = vadd.f32 %v1576_v5, %v1536_v31  ;;  %v1648_v36 = vmul.f32 %v3677_v53, %v940_v10  ;;  %v1896_v38 = vmul.f32 %v3679_v54, %v940_v10  ;;  %v3856_v30 = vmul.f32 %v3675_v52, %v3791_v34 }
 0x104   : > { %v1010_v23 = vmul.f32 %v3645_v40, %v940_v10  ;;  %v1577_v24 = vmul.f32 %v3682_v57, %v941_v56  ;;  %v3863_v37 = vmul.f32 %v3679_v54, %v3791_v34  ;;  %v1185_v31 = vrot.slane %v1084_v26, 1 }
 0x105   : > { %6602 = vst [vmem:[#allocation26_spill] sm:$0xff] %v3856_v30  ;;  %v3865_v61 = vpop.f32.mrb[12].mxu0  ;;  %v3868_v5 = vmul.f32 %v3653_v43, %v941_v56  ;;  %v3871_v7 = vmul.f32 %v3656_v44, %v941_v56  ;;  %v942_v10 = vsel %vm3783_vm2, %v606_v39, 0.0  ;;  %v1434_v17 = vrot.slane %v1333_v48, 2 }
 0x106   : > { %v3875_v3 = vpop.f32.mrb[13].mxu0  ;;  %v3877_v30 = vpop.f32.mrb[12].mxu1  ;;  %v3880_v27 = vmul.f32 %v3660_v47, %v941_v56  ;;  %v3882_v28 = vadd.f32 %v1577_v24, %v1537_v45  ;;  %v3885_v26 = vmul.f32 %v3648_v41, %v942_v10  ;;  %v1744_v21 = vrot.slane %v1648_v36, 1 }
 0x107   : > { %6603 = vst [vmem:[#allocation27_spill] sm:$0xff] %v3877_v30  ;;  %v615_v20 = vpop.f32.mrb[14].mxu0  ;;  %v3887_v19 = vpop.f32.mrb[13].mxu1  ;;  %v1992_v14 = vrot.slane %v1896_v38, 2  ;;  %v3890_v39 = vmul.f32 %v3650_v42, %v942_v10  ;;  %v1578_v18 = vmul.f32 %v3675_v52, %v942_v10  ;;  %v1649_v30 = vmul.f32 %v3684_v58, %v941_v56 }
 0x108   : > { %6604 = vst [vmem:[#allocation28_spill] sm:$0xff] %v3887_v19  ;;  %v616_v16 = vpop.f32.mrb[15].mxu0  ;;  %v723_v48 = vpop.f32.mrb[14].mxu1  ;;  %v6420_v45 = vrot.slane %v3885_v26, 1  ;;  %v3896_v24 = vmul.f32 %v3677_v53, %v942_v10  ;;  %v3899_v20 = vmul.f32 %v3679_v54, %v942_v10  ;;  %v1188_v36 = vrot.slane %v3871_v7, 1 }
 0x109   : > { %v724_v19 = vpop.f32.mrb[15].mxu1  ;;  %v1897_v38 = vmul.f32 %v3686_v59, %v941_v56  ;;  %v6419_v13 = vrot.slane %v3890_v39, 2  ;;  %v3904_v52 = vadd.f32 %v1578_v18, %v1538_v29  ;;  %v1437_v16 = vrot.slane %v3880_v27, 2 }
 0x10a   : > { %v1187_v48 = vsel %vm1174_vm6, %v1185_v31, %v6420_v45  ;;  %v6418_v60 = vrot.slane %v3896_v24, 1  ;;  %v6417_v15 = vrot.slane %v3899_v20, 2  ;;  %v3913_v19 = vmul.f32 %v3645_v40, %v942_v10  ;;  %v3928_v10 = vld [vmem:[%s6401_s3 + $0x10] ss:$0 sm:$0xff] }
 0x10b   : > { %v1291_v7 = vadd.f32 %v1187_v48, %v1010_v23  ;;  %v1436_v56 = vsel %vm1423_vm8, %v1434_v17, %v6419_v13  ;;  %v608_v18 = vadd.f32 %v607_v49, %v3628_v33  ;;  %v1747_v29 = vrot.slane %v1649_v30, 1 }
 0x10c   : > { %v1746_v27 = vsel %vm1174_vm6, %v1744_v21, %v6418_v60  ;;  %v1994_v31 = vsel %vm1423_vm8, %v1992_v14, %v6417_v15  ;;  %v3932_v23 = vmul.f32 %v3696_v4, %v3791_v34  ;;  %v3940_v21 = vmul.f32 %v3928_v10, %v3791_v34 }
 0x10d   : > { %v3934_v17 = vpop.f32.mrb[16].mxu0  ;;  %v3936_v49 = vadd.f32 %v1436_v56, %v1291_v7  ;;  %v1856_v30 = vadd.f32 %v1746_v27, %v1608_v8  ;;  %v3944_v14 = vsel %vm3783_vm2, %v608_v18, 0.0  ;;  %v1995_v60 = vrot.slane %v1897_v38, 2 }
 0x10e   : > { %6605 = vst [vmem:[#allocation29_spill] sm:$0xff] %v3934_v17  ;;  %6607 = vst [vmem:[#allocation31_spill] sm:$0xff] %v3940_v21  ;;  %v3946_v48 = vpop.f32.mrb[17].mxu0  ;;  %v3948_v15 = vpop.f32.mrb[16].mxu1  ;;  %v3952_v13 = vmul.f32 %v3656_v44, %v3944_v14  ;;  %v3956_v8 = vmul.f32 %v3660_v47, %v3944_v14  ;;  %v1579_v7 = vmul.f32 %v3682_v57, %v3944_v14  ;;  %v2042_v45 = vrot.slane %v3863_v37, 2 }
 0x10f   : > { %6606 = vst [vmem:[#allocation30_spill] sm:$0xff] %v3936_v49  ;;  %6608 = vst [vmem:[#allocation32_spill] sm:$0xff] %v3946_v48  ;;  %v3960_v56 = vpop.f32.mrb[18].mxu0  ;;  %v3962_v18 = vpop.f32.mrb[17].mxu1  ;;  %v3964_v27 = vadd.f32 %v1994_v31, %v1856_v30  ;;  %v3969_v38 = vmul.f32 %v3684_v58, %v3944_v14  ;;  %v3981_v57 = vmul.f32 %v3689_v63, %v3791_v34 }
 0x110   : > { %6609 = vst [vmem:[#allocation33_spill] sm:$0xff] %v3948_v15  ;;  %6610 = vst [vmem:[#allocation34_spill] sm:$0xff] %v3960_v56  ;;  %v3973_v15 = vmul.f32 %v3686_v59, %v3944_v14  ;;  %v3975_v49 = vpop.f32.mrb[19].mxu0  ;;  %v3977_v48 = vpop.f32.mrb[18].mxu1  ;;  %v6426_v31 = vrot.slane %v3952_v13, 1  ;;  %v6425_v37 = vrot.slane %v3956_v8, 2  ;;  %v3986_v30 = vadd.f32 %v1579_v7, %v3847_v1 }
 0x111   : > { %6611 = vst [vmem:[#allocation35_spill] sm:$0xff] %v3962_v18  ;;  %6612 = vst [vmem:[#allocation36_spill] sm:$0xff] %v3964_v27  ;;  %v3988_v18 = vpop.f32.mrb[19].mxu1  ;;  %v2352_v56 = vrot.slane %v3932_v23, 1  ;;  %v4003_v1 = vsel %vm3748_vm15, %v3826_v50, 0.0  ;;  %v698_v23 = vadd.f32 %v3709_v11, %v3628_v33 }
 0x112   : > { %6613 = vst [vmem:[#allocation37_spill] sm:$0xff] %v3973_v15  ;;  %6614 = vst [vmem:[#allocation38_spill] sm:$0xff] %v3975_v49  ;;  %v6424_v49 = vrot.slane %v3969_v38, 1  ;;  %v1190_v34 = vsel %vm1174_vm6, %v1188_v36, %v6426_v31  ;;  %v1680_v51 = vmul.f32 %v3677_v53, %v4003_v1 }
 0x113   : > { %6615 = vst [vmem:[#allocation39_spill] sm:$0xff] %v3977_v48  ;;  %6616 = vst [vmem:[#allocation40_spill] sm:$0xff] %v3981_v57  ;;  %v6423_v48 = vrot.slane %v3973_v15, 2  ;;  %v1439_v57 = vsel %vm1423_vm8, %v1437_v16, %v6425_v37  ;;  %v1292_v7 = vadd.f32 %v1190_v34, %v3868_v5  ;;  %v4018_v16 = vmul.f32 %v3656_v44, %v3798_v2 }
 0x114   : > { %6617 = vst [vmem:[#allocation41_spill] sm:$0xff] %v3986_v30  ;;  %6618 = vst [vmem:[#allocation42_spill] sm:$0xff] %v3988_v18  ;;  %v1749_v27 = vsel %vm1174_vm6, %v1747_v29, %v6424_v49  ;;  %v4033_v5 = vsel %vm3748_vm15, %v698_v23, 0.0  ;;  %v1032_v29 = vmul.f32 %v3645_v40, %v4003_v1  ;;  %v4045_v49 = vmul.f32 %v3648_v41, %v4003_v1 }
 0x115   : > { %6619 = vst [vmem:[#allocation43_spill] sm:$0xff] %v4003_v1  ;;  %v4014_v36 = vsel %vm1423_vm8, %v1995_v60, %v6423_v48  ;;  %v4029_v50 = vadd.f32 %v1749_v27, %v3882_v28  ;;  %6624 = vst [vmem:[#allocation46_spill] sm:$0xff] %v4033_v5  ;;  %v702_v60 = vadd.f32 %v3752_v55, %v3625_v32  ;;  %v4039_v34 = vpop.f32.mrb[20].mxu0 }
 0x116   : > { %6620 = vst [vmem:[#allocation44_spill] sm:$0xff] %v4014_v36  ;;  %6625 = vst [vmem:[#allocation47_spill] sm:$0xff] %v4039_v34  ;;  %v4041_v48 = vadd.f32 %v1439_v57, %v1292_v7  ;;  %v4049_v28 = vmul.f32 %v3650_v42, %v4003_v1  ;;  %v4053_v27 = vpop.f32.mrb[20].mxu1  ;;  %v4055_v55 = vpop.f32.mrb[21].mxu0  ;;  %v1928_v57 = vmul.f32 %v3679_v54, %v4003_v1 }
 0x117   : > { %6623 = vst [vmem:[#allocation45_spill] sm:$0xff] %v4029_v50  ;;  %6627 = vst [vmem:[#allocation49_spill] sm:$0xff] %v4053_v27  ;;  %v974_v23 = vsel %vm4024_vm4, %v702_v60, 0.0  ;;  %v2242_v7 = vmul.f32 %v3696_v4, %v4003_v1  ;;  %v4065_v37 = vmul.f32 %v3928_v10, %v4003_v1  ;;  %v633_v31 = vpop.f32.mrb[22].mxu0  ;;  %v4067_v21 = vpop.f32.mrb[21].mxu1  ;;  %v6631_v50 = vrot.slane %v3838_v9, 1 }
 0x118   : > { %6626 = vst [vmem:[#allocation48_spill] sm:$0xff] %v4041_v48  ;;  %6628 = vst [vmem:[#allocation50_spill] sm:$0xff] %v4055_v55  ;;  %v1118_v36 = vmul.f32 %v3648_v41, %v974_v23  ;;  %v1367_v55 = vmul.f32 %v3650_v42, %v974_v23  ;;  %v634_v27 = vpop.f32.mrb[23].mxu0  ;;  %v741_v34 = vpop.f32.mrb[22].mxu1  ;;  %v1682_v18 = vmul.f32 %v3677_v53, %v974_v23  ;;  %v1795_v48 = vrot.slane %v1680_v51, 1 }
 0x119   : > { %6629 = vst [vmem:[#allocation51_spill] sm:$0xff] %v4065_v37  ;;  %6630 = vst [vmem:[#allocation52_spill] sm:$0xff] %v4067_v21  ;;  %v1930_v40 = vmul.f32 %v3679_v54, %v974_v23  ;;  %v2043_v1 = vrot.slane %v1928_v57, 2  ;;  %v742_v17 = vpop.f32.mrb[23].mxu1  ;;  %v2244_v21 = vmul.f32 %v3696_v4, %v974_v23  ;;  %v2353_v15 = vrot.slane %v2242_v7, 1 }
 0x11a   : > { %v1241_v31 = vrot.slane %v1118_v36, 1  ;;  %v1490_v63 = vrot.slane %v1367_v55, 2  ;;  %v4079_v30 = vsel %vm1174_vm6, %v6631_v50, %v1795_v48  ;;  %v1800_v60 = vrot.slane %v1682_v18, 1 }
 0x11b   : > { %6632 = vst [vmem:[#allocation53_spill] sm:$0xff] %v4079_v30  ;;  %v4082_v34 = vsel %vm1423_vm8, %v2042_v45, %v2043_v1  ;;  %v2048_v27 = vrot.slane %v1930_v40, 2  ;;  %v6634_v51 = vrot.slane %v4045_v49, 1  ;;  %v6635_v17 = vrot.slane %v4049_v28, 2 }
 0x11c   : > { %6633 = vst [vmem:[#allocation54_spill] sm:$0xff] %v4082_v34  ;;  %v4091_v55 = vsel %vm1174_vm6, %v2352_v56, %v2353_v15  ;;  %v2358_v9 = vrot.slane %v2244_v21, 1  ;;  %v4094_v50 = vsel %vm1174_vm6, %v1795_v48, %v1800_v60  ;;  %v2492_v40 = vmul.f32 %v3928_v10, %v974_v23 }
 0x11d   : > { %v1242_v57 = vsel %vm1174_vm6, %v6634_v51, %v1241_v31  ;;  %v1491_v36 = vsel %vm1423_vm8, %v6635_v17, %v1490_v63  ;;  %6636 = vst [vmem:[#allocation55_spill] sm:$0xff] %v4091_v55  ;;  %6637 = vst [vmem:[#allocation56_spill] sm:$0xff] %v4094_v50  ;;  %v4097_v45 = vsel %vm1423_vm8, %v2043_v1, %v2048_v27  ;;  %v4100_v18 = vpop.f32.mrb[24].mxu0  ;;  %v6436_v63 = vrot.slane %v4065_v37, 2 }
 0x11e   : > { %v1313_v7 = vadd.f32 %v1242_v57, %v1032_v29  ;;  %6638 = vst [vmem:[#allocation57_spill] sm:$0xff] %v4097_v45  ;;  %6639 = vst [vmem:[#allocation58_spill] sm:$0xff] %v4100_v18  ;;  %v4103_v31 = vsel %vm1174_vm6, %v2353_v15, %v2358_v9  ;;  %v704_v56 = vadd.f32 %v3757_v0, %v3628_v33  ;;  %v4110_v48 = vpop.f32.mrb[25].mxu0  ;;  %v4112_v29 = vpop.f32.mrb[24].mxu1  ;;  %v2606_v23 = vrot.slane %v2492_v40, 2  ;;  %v6714_v18 = vld [vmem:[#allocation32_spill] sm:$0xff] }
 0x11f   : > { %6640 = vst [vmem:[#allocation59_spill] sm:$0xff] %v4103_v31  ;;  %v1033_v21 = vmul.f32 %v3653_v43, %v4033_v5  ;;  %6641 = vst [vmem:[#allocation60_spill] sm:$0xff] %v4110_v48  ;;  %v4118_v60 = vmul.f32 %v3656_v44, %v4033_v5  ;;  %v4122_v15 = vmul.f32 %v3660_v47, %v4033_v5  ;;  %v4126_v0 = vpop.f32.mrb[26].mxu0  ;;  %v4128_v27 = vpop.f32.mrb[25].mxu1 }
 0x120   : > { %6642 = vst [vmem:[#allocation61_spill] sm:$0xff] %v4112_v29  ;;  %v4114_v1 = vadd.f32 %v1491_v36, %v1313_v7  ;;  %6643 = vst [vmem:[#allocation62_spill] sm:$0xff] %v4126_v0  ;;  %v975_v51 = vsel %vm4024_vm4, %v704_v56, 0.0  ;;  %v4134_v57 = vmul.f32 %v3684_v58, %v4033_v5  ;;  %v4138_v17 = vmul.f32 %v3686_v59, %v4033_v5  ;;  %v4142_v9 = vpop.f32.mrb[27].mxu0  ;;  %v4144_v7 = vpop.f32.mrb[26].mxu1 }
 0x121   : > { %6644 = vst [vmem:[#allocation63_spill] sm:$0xff] %v4128_v27  ;;  %v612_v36 = vadd.f32 %v3865_v61, %v3625_v32  ;;  %6647 = vst [vmem:[#allocation66_spill] sm:$0xff] %v4142_v9  ;;  %v4149_v11 = vsel %vm1423_vm8, %v6436_v63, %v2606_v23  ;;  %v1119_v40 = vmul.f32 %v3656_v44, %v975_v51  ;;  %v4162_v55 = vpop.f32.mrb[27].mxu1  ;;  %v6654_v27 = vrot.slane %v4122_v15, 2 }
 0x122   : > { %6645 = vst [vmem:[#allocation64_spill] sm:$0xff] %v4134_v57  ;;  %6646 = vst [vmem:[#allocation65_spill] sm:$0xff] %v4138_v17  ;;  %v1368_v34 = vmul.f32 %v3660_v47, %v975_v51  ;;  %v1683_v23 = vmul.f32 %v3684_v58, %v975_v51  ;;  %v1931_v56 = vmul.f32 %v3686_v59, %v975_v51 }
 0x123   : > { %6648 = vst [vmem:[#allocation67_spill] sm:$0xff] %v4144_v7  ;;  %6649 = vst [vmem:[#allocation68_spill] sm:$0xff] %v4149_v11  ;;  %v4170_v5 = vmul.f32 %v3653_v43, %v3798_v2  ;;  %v1243_v11 = vrot.slane %v1119_v40, 1  ;;  %v1013_v45 = vmul.f32 %v3653_v43, %v3944_v14  ;;  %v944_v37 = vsel %vm4158_vm11, %v612_v36, 0.0 }
 0x124   : > { %6652 = vst [vmem:[#allocation69_spill] sm:$0xff] %v4162_v55  ;;  %v1492_v62 = vrot.slane %v1368_v34, 2  ;;  %v1802_v50 = vrot.slane %v1683_v23, 1  ;;  %v2050_v30 = vrot.slane %v1931_v56, 2  ;;  %v6653_v55 = vrot.slane %v4118_v60, 1 }
 0x125   : > { %v1088_v40 = vmul.f32 %v3648_v41, %v944_v37  ;;  %v4185_v31 = vpop.f32.mrb[28].mxu0  ;;  %v4189_v14 = vmul.f32 %v3660_v47, %v3798_v2  ;;  %v6656_v36 = vrot.slane %v4134_v57, 1  ;;  %v1652_v63 = vmul.f32 %v3677_v53, %v944_v37 }
 0x126   : > { %v1244_v7 = vsel %vm1174_vm6, %v6653_v55, %v1243_v11  ;;  %v1493_v34 = vsel %vm1423_vm8, %v6654_v27, %v1492_v62  ;;  %6655 = vst [vmem:[#allocation70_spill] sm:$0xff] %v4185_v31  ;;  %v6658_v55 = vrot.slane %v4138_v17, 2  ;;  %v1337_v62 = vmul.f32 %v3650_v42, %v944_v37 }
 0x127   : > { %v1314_v56 = vadd.f32 %v1244_v7, %v1033_v21  ;;  %v4194_v23 = vsel %vm1174_vm6, %v6656_v36, %v1802_v50  ;;  %v1191_v27 = vrot.slane %v1088_v40, 1  ;;  %v1900_v31 = vmul.f32 %v3679_v54, %v944_v37  ;;  %v4218_v40 = vld [vmem:[%s6401_s3 + $0x18] ss:$0 sm:$0xff] }
 0x128   : > { %6657 = vst [vmem:[#allocation71_spill] sm:$0xff] %v4194_v23  ;;  %v4199_v11 = vsel %vm1423_vm8, %v6658_v55, %v2050_v30  ;;  %v4206_v21 = vmul.f32 %v3684_v58, %v3798_v2  ;;  %v4211_v50 = vmul.f32 %v3700_v6, %v975_v51  ;;  %v614_v30 = vadd.f32 %v3875_v3, %v3628_v33 }
 0x129   : > { %6659 = vst [vmem:[#allocation72_spill] sm:$0xff] %v4199_v11  ;;  %v4208_v7 = vadd.f32 %v1493_v34, %v1314_v56  ;;  %v6662_v36 = vrot.slane %v3885_v26, 1  ;;  %v1440_v55 = vrot.slane %v1337_v62, 2  ;;  %v1750_v17 = vrot.slane %v1652_v63, 1  ;;  %v4251_v62 = vpop.f32.mrb[29].mxu0 }
 0x12a   : > { %6660 = vst [vmem:[#allocation73_spill] sm:$0xff] %v4206_v21  ;;  %6661 = vst [vmem:[#allocation74_spill] sm:$0xff] %v4211_v50  ;;  %v1998_v11 = vrot.slane %v1900_v31, 2  ;;  %v4224_v34 = vmul.f32 %v4218_v40, %v975_v51  ;;  %v945_v3 = vsel %vm4158_vm11, %v614_v30, 0.0  ;;  %v710_v23 = vadd.f32 %v3808_v46, %v3625_v32  ;;  %v4239_v31 = vpop.f32.mrb[28].mxu1  ;;  %v6681_v21 = vld [vmem:[#allocation37_spill] sm:$0xff] }
 0x12b   : > { %v1192_v37 = vsel %vm1174_vm6, %v6662_v36, %v1191_v27  ;;  %6666 = vst [vmem:[#allocation76_spill] sm:$0xff] %v4239_v31  ;;  %v6667_v63 = vrot.slane %v3890_v39, 2  ;;  %v6668_v51 = vrot.slane %v3896_v24, 1  ;;  %v6669_v46 = vrot.slane %v3899_v20, 2  ;;  %6670 = vst [vmem:[#allocation77_spill] sm:$0xff] %v4251_v62  ;;  %v6706_v31 = vld [vmem:[#allocation29_spill] sm:$0xff] }
 0x12c   : > { %6663 = vst [vmem:[#allocation75_spill] sm:$0xff] %v4224_v34  ;;  %v1293_v56 = vadd.f32 %v1192_v37, %v3913_v19  ;;  %v1089_v12 = vmul.f32 %v3656_v44, %v945_v3  ;;  %v1338_v39 = vmul.f32 %v3660_v47, %v945_v3  ;;  %v1653_v37 = vmul.f32 %v3684_v58, %v945_v3 }
 0x12d   : > { %v1441_v19 = vsel %vm1423_vm8, %v6667_v63, %v1440_v55  ;;  %v1751_v61 = vsel %vm1174_vm6, %v6668_v51, %v1750_v17  ;;  %v1999_v27 = vsel %vm1423_vm8, %v6669_v46, %v1998_v11  ;;  %v651_v55 = vpop.f32.mrb[30].mxu0  ;;  %v1901_v20 = vmul.f32 %v3686_v59, %v945_v3  ;;  %v6675_v46 = vld [vmem:[#allocation16_spill] sm:$0xff]  ;;  %v6680_v3 = vld [vmem:[#allocation41_spill] sm:$0xff] }
 0x12e   : > { %v4253_v30 = vadd.f32 %v1441_v19, %v1293_v56  ;;  %v1858_v36 = vadd.f32 %v1751_v61, %v3904_v52  ;;  %v1193_v17 = vrot.slane %v1089_v12, 1  ;;  %v712_v52 = vadd.f32 %v3820_v22, %v3628_v33  ;;  %v652_v56 = vpop.f32.mrb[31].mxu0 }
 0x12f   : > { %v1442_v51 = vrot.slane %v1338_v39, 2  ;;  %v1752_v61 = vrot.slane %v1653_v37, 1  ;;  %vm780_vm14 = vcmp.ge.s32.totalorder %v6675_v46, 0  ;;  %vm790_vm15 = vcmp.lt.s32.totalorder %v6675_v46, 16 }
 0x130   : > { %6671 = vst [vmem:[#allocation78_spill] sm:$0xff] %v4253_v30  ;;  %v4271_v19 = vadd.f32 %v1999_v27, %v1858_v36  ;;  %v6676_v55 = vrot.slane %v3952_v13, 1  ;;  %v2000_v22 = vrot.slane %v1901_v20, 2  ;;  %v6677_v63 = vrot.slane %v3956_v8, 2  ;;  %v6684_v8 = vld [vmem:[#allocation23_spill] sm:$0xff]  ;;  %v6688_v20 = vld [vmem:[#allocation25_spill] sm:$0xff]  ;;  %vm4385_vm2 = vmand %vm780_vm14, %vm790_vm15 }
 0x131   : > { %v6678_v36 = vrot.slane %v3969_v38, 1  ;;  %v4288_v37 = vsel %vm4264_vm13, %v710_v23, 0.0  ;;  %v6682_v13 = vrot.slane %v6681_v21, 2  ;;  %v716_v11 = vadd.f32 %v6688_v20, %v3628_v33  ;;  %vm4421_vm7 = vmand %vm4385_vm2, %vm808_vm5 }
 0x132   : > { %6674 = vst [vmem:[#allocation79_spill] sm:$0xff] %v4271_v19  ;;  %v1194_v24 = vsel %vm1174_vm6, %v6676_v55, %v1193_v17  ;;  %v1443_v27 = vsel %vm1423_vm8, %v6677_v63, %v1442_v51  ;;  %6679 = vst [vmem:[#allocation16_spill] sm:$0xff] %v4288_v37  ;;  %v2246_v21 = vmul.f32 %v3696_v4, %v4288_v37  ;;  %v6728_v19 = vld [vmem:[#allocation6_spill] sm:$0xff] }
 0x133   : > { %v1294_v56 = vadd.f32 %v1194_v24, %v1013_v45  ;;  %v1753_v39 = vsel %vm1174_vm6, %v6678_v36, %v1752_v61  ;;  %v2001_v17 = vsel %vm1423_vm8, %v6682_v13, %v2000_v22  ;;  %v4296_v45 = vsel %vm4264_vm13, %v712_v52, 0.0  ;;  %v6689_v52 = vld [vmem:[#allocation27_spill] sm:$0xff] }
 0x134   : > { %v1859_v12 = vadd.f32 %v1753_v39, %v6680_v3  ;;  %6683 = vst [vmem:[#allocation41_spill] sm:$0xff] %v4296_v45  ;;  %v714_v24 = vadd.f32 %v6684_v8, %v3625_v32  ;;  %v720_v63 = vadd.f32 %v6689_v52, %v3625_v32  ;;  %v4320_v61 = vmul.f32 %v3677_v53, %v4288_v37  ;;  %v6691_v3 = vld [vmem:[#allocation15_spill] sm:$0xff]  ;;  %v6695_v8 = vld [vmem:[#allocation28_spill] sm:$0xff] }
 0x135   : > { %v4308_v23 = vadd.f32 %v1443_v27, %v1294_v56  ;;  %v4324_v55 = vmul.f32 %v6691_v3, %v4288_v37  ;;  %v4332_v56 = vmul.f32 %v3928_v10, %v4288_v37  ;;  %v2362_v20 = vrot.slane %v2246_v21, 1 }
 0x136   : > { %v4316_v51 = vadd.f32 %v2001_v17, %v1859_v12  ;;  %v4328_v22 = vsel %vm4235_vm12, %v714_v24, 0.0  ;;  %v4336_v12 = vmul.f32 %v3684_v58, %v4296_v45  ;;  %v980_v27 = vsel %vm4304_vm0, %v720_v63, 0.0 }
 0x137   : > { %6687 = vst [vmem:[#allocation37_spill] sm:$0xff] %v4308_v23  ;;  %6692 = vst [vmem:[#allocation25_spill] sm:$0xff] %v4324_v55  ;;  %v4342_v36 = vmul.f32 %v3648_v41, %v4328_v22  ;;  %v1124_v39 = vmul.f32 %v3648_v41, %v980_v27  ;;  %v4347_v13 = vmul.f32 %v3677_v53, %v4328_v22  ;;  %v4354_v52 = vsel %vm4235_vm12, %v716_v11, 0.0 }
 0x138   : > { %6690 = vst [vmem:[#allocation23_spill] sm:$0xff] %v4316_v51  ;;  %6693 = vst [vmem:[#allocation27_spill] sm:$0xff] %v4332_v56  ;;  %v1688_v17 = vmul.f32 %v3677_v53, %v980_v27  ;;  %v722_v24 = vadd.f32 %v6695_v8, %v3628_v33  ;;  %v2248_v63 = vmul.f32 %v3696_v4, %v4328_v22  ;;  %v6737_v23 = vrot.slane %v4045_v49, 1  ;;  %v6761_v49 = vld [vmem:[#allocation38_spill] sm:$0xff] }
 0x139   : > { %6694 = vst [vmem:[#allocation15_spill] sm:$0xff] %v4342_v36  ;;  %6696 = vst [vmem:[#allocation28_spill] sm:$0xff] %v4354_v52  ;;  %v2250_v55 = vmul.f32 %v3696_v4, %v980_v27  ;;  %v6446_v57 = vrot.slane %v4342_v36, 1  ;;  %v1251_v34 = vrot.slane %v1124_v39, 1  ;;  %v6447_v50 = vrot.slane %v4347_v13, 1 }
 0x13a   : > { %v1810_v2 = vrot.slane %v1688_v17, 1  ;;  %v4362_v51 = vmul.f32 %v3650_v42, %v980_v27  ;;  %v2363_v8 = vrot.slane %v2248_v63, 1  ;;  %v4366_v26 = vmul.f32 %v3928_v10, %v4328_v22  ;;  %vm4738_vm12 = vmand %vm4385_vm2, %vm843_vm9 }
 0x13b   : > { %v2368_v21 = vrot.slane %v2250_v55, 1  ;;  %v4371_v11 = vsel %vm1174_vm6, %v6446_v57, %v1251_v34  ;;  %v2498_v17 = vmul.f32 %v3928_v10, %v980_v27  ;;  %v981_v63 = vsel %vm4304_vm0, %v722_v24, 0.0  ;;  %v6702_v34 = vld [vmem:[#allocation17_spill] sm:$0xff] }
 0x13c   : > { %6697 = vst [vmem:[#allocation80_spill] sm:$0xff] %v4362_v51  ;;  %6698 = vst [vmem:[#allocation81_spill] sm:$0xff] %v4366_v26  ;;  %v4376_v39 = vsel %vm1174_vm6, %v6447_v50, %v1810_v2  ;;  %vm786_vm3 = vcmp.ge.s32.totalorder %v6702_v34, 0  ;;  %vm796_vm4 = vcmp.lt.s32.totalorder %v6702_v34, 16  ;;  %v4392_v2 = vsel %vm1174_vm6, %v2362_v20, %v2363_v8  ;;  %v6725_v51 = vld [vmem:[#allocation30_spill] sm:$0xff] }
 0x13d   : > { %6699 = vst [vmem:[#allocation82_spill] sm:$0xff] %v4371_v11  ;;  %6703 = vst [vmem:[#allocation17_spill] sm:$0xff] %v4392_v2  ;;  %v4395_v57 = vsel %vm1174_vm6, %v2363_v8, %v2368_v21  ;;  %v4400_v24 = vmul.f32 %v3656_v44, %v4354_v52  ;;  %v2616_v46 = vrot.slane %v2498_v17, 2  ;;  %v1125_v50 = vmul.f32 %v3656_v44, %v981_v63  ;;  %v6729_v17 = vld [vmem:[#allocation36_spill] sm:$0xff] }
 0x13e   : > { %6704 = vst [vmem:[#allocation83_spill] sm:$0xff] %v4395_v57  ;;  %v4405_v62 = vmul.f32 %v3684_v58, %v4354_v52  ;;  %v620_v20 = vadd.f32 %v6706_v31, %v3625_v32  ;;  %v4410_v2 = vmul.f32 %v3679_v54, %v980_v27  ;;  %v4414_v21 = vmul.f32 %v3660_v47, %v981_v63  ;;  %v3372_v31 = vld [vmem:[%s6403_s5] sm:$0xff]   ;;  %v4428_v27 = vpop.f32.mrb[32].mxu0  ;;  %vm4515_vm10 = vmand %vm786_vm3, %vm796_vm4 }
 0x13f   : > { %6705 = vst [vmem:[#allocation84_spill] sm:$0xff] %v4400_v24  ;;  %v1689_v38 = vmul.f32 %v3684_v58, %v981_v63  ;;  %6710 = vst [vmem:[#allocation85_spill] sm:$0xff] %v4428_v27  ;;  %v6711_v57 = vrot.slane %v4366_v26, 2  ;;  %v1253_v9 = vrot.slane %v1125_v50, 1  ;;  %v4439_v29 = vmul.f32 %v6691_v3, %v4328_v22  ;;  %3276 = vmatprep.subr.bf16.mxu1 %v3372_v31 }
 0x140   : > { %6707 = vst [vmem:[#allocation29_spill] sm:$0xff] %v4414_v21  ;;  %v6451_v36 = vrot.slane %v4405_v62, 1  ;;  %v622_v27 = vadd.f32 %v6714_v18, %v3628_v33  ;;  %v6715_v8 = vrot.slane %v4400_v24, 1  ;;  %v4453_v50 = vmul.f32 %v3700_v6, %v981_v63  ;;  %3277 = vmatpush3.bf16.msra.mxu1 %v3372_v31  ;;  %v6720_v31 = vld [vmem:[#allocation11_spill] sm:$0xff]  ;;  %vm4554_vm11 = vmand %vm4515_vm10, %vm808_vm5 }
 0x141   : > { %v4434_v11 = vsel %vm1423_vm8, %v6711_v57, %v2616_v46  ;;  %6713 = vst [vmem:[#allocation87_spill] sm:$0xff] %v4439_v29  ;;  %v1812_v48 = vrot.slane %v1689_v38, 1  ;;  %v4450_v57 = vmul.f32 %v3686_v59, %v981_v63  ;;  %v946_v46 = vsel %vm4421_vm7, %v620_v20, 0.0  ;;  %vm4827_vm13 = vmand %vm4515_vm10, %vm843_vm9 }
 0x142   : > { %6712 = vst [vmem:[#allocation86_spill] sm:$0xff] %v4434_v11  ;;  %v4447_v56 = vsel %vm1174_vm6, %v6715_v8, %v1253_v9  ;;  %6717 = vst [vmem:[#allocation88_spill] sm:$0xff] %v4453_v50  ;;  %v4465_v9 = vmul.f32 %v4218_v40, %v981_v63  ;;  %v4467_v8 = vpop.f32.mrb[33].mxu0  ;;  %v4470_v11 = vmul.f32 %v3648_v41, %v946_v46  ;;  %v4490_v29 = vsel %vm4421_vm7, %v622_v27, 0.0  ;;  %v6738_v50 = vld [vmem:[#allocation21_spill] sm:$0xff] }
 0x143   : > { %6716 = vst [vmem:[#allocation32_spill] sm:$0xff] %v4447_v56  ;;  %v4462_v0 = vsel %vm1174_vm6, %v6451_v36, %v1812_v48  ;;  %6719 = vst [vmem:[#allocation90_spill] sm:$0xff] %v4467_v8  ;;  %v4473_v20 = vmul.f32 %v3650_v42, %v946_v46  ;;  %v1580_v38 = vmul.f32 %v6720_v31, %v946_v46  ;;  %v4479_v26 = vpop.f32.mrb[34].mxu0  ;;  %v6742_v56 = vld [vmem:[#allocation48_spill] sm:$0xff] }
 0x144   : > { %6718 = vst [vmem:[#allocation89_spill] sm:$0xff] %v4465_v9  ;;  %v4477_v18 = vmul.f32 %v3677_v53, %v946_v46  ;;  %6722 = vst [vmem:[#allocation91_spill] sm:$0xff] %v4479_v26  ;;  %v4482_v48 = vmul.f32 %v3679_v54, %v946_v46  ;;  %v2144_v63 = vmul.f32 %v6691_v3, %v946_v46  ;;  %v4492_v8 = vpop.f32.mrb[35].mxu0  ;;  %v6736_v9 = vld [vmem:[#allocation33_spill] sm:$0xff] }
 0x145   : > { %v4486_v36 = vmul.f32 %v3696_v4, %v946_v46  ;;  %6723 = vst [vmem:[#allocation92_spill] sm:$0xff] %v4490_v29  ;;  %6724 = vst [vmem:[#allocation93_spill] sm:$0xff] %v4492_v8  ;;  %v4497_v26 = vadd.f32 %v1580_v38, %v6725_v51  ;;  %v4500_v24 = vmul.f32 %v3928_v10, %v946_v46  ;;  %v6731_v8 = vld [vmem:[#allocation34_spill] sm:$0xff]  ;;  %v4527_v21 = vpop.f32.mrb[36].mxu0 }
 0x146   : > { %6721 = vst [vmem:[#allocation11_spill] sm:$0xff] %v4477_v18  ;;  %v4504_v30 = vmul.f32 %v6728_v19, %v946_v46  ;;  %v4507_v27 = vadd.f32 %v2144_v63, %v6729_v17  ;;  %v624_v42 = vadd.f32 %v6731_v8, %v3625_v32  ;;  %v6734_v63 = vld [vmem:[#allocation12_spill] sm:$0xff]  ;;  %v3373_v8 = vld [vmem:[%s6403_s5 + $0x8] sm:$0xff]   ;;  %6735 = vst [vmem:[#allocation34_spill] sm:$0xff] %v4527_v21  ;;  %v6739_v46 = vrot.slane %v6738_v50, 1 }
 0x147   : > { %6726 = vst [vmem:[#allocation30_spill] sm:$0xff] %v4497_v26  ;;  %6727 = vst [vmem:[#allocation94_spill] sm:$0xff] %v4500_v24  ;;  %v1581_v17 = vmul.f32 %v6734_v63, %v4490_v29  ;;  %v728_v38 = vadd.f32 %v6736_v9, %v3625_v32  ;;  %v4541_v18 = vmul.f32 %v3656_v44, %v4490_v29  ;;  %3278 = vmatprep.subr.bf16.mxu1 %v3373_v8  ;;  %v6748_v9 = vld [vmem:[#allocation24_spill] sm:$0xff] }
 0x148   : > { %6730 = vst [vmem:[#allocation36_spill] sm:$0xff] %v4507_v27  ;;  %v1237_v27 = vsel %vm1174_vm6, %v6739_v46, %v6737_v23  ;;  %v4545_v34 = vmul.f32 %v3660_v47, %v4490_v29  ;;  %v4560_v23 = vmul.f32 %v3653_v43, %v4490_v29  ;;  %v4564_v50 = vmul.f32 %v3684_v58, %v4490_v29 }
 0x149   : > { %6740 = vst [vmem:[#allocation33_spill] sm:$0xff] %v4541_v18  ;;  %v4548_v21 = vadd.f32 %v1581_v17, %v6742_v56  ;;  %v1311_v56 = vadd.f32 %v1237_v27, %v6748_v9  ;;  %v6749_v46 = vrot.slane %v4049_v28, 2  ;;  %v6750_v17 = vld [vmem:[#allocation22_spill] sm:$0xff]  ;;  %3279 = vmatpush3.bf16.msra.mxu1 %v3373_v8  ;;  %v4574_v24 = vmul.f32 %v3686_v59, %v4490_v29 }
 0x14a   : > { %6741 = vst [vmem:[#allocation21_spill] sm:$0xff] %v4545_v34  ;;  %6746 = vst [vmem:[#allocation95_spill] sm:$0xff] %v4560_v23  ;;  %v6751_v26 = vrot.slane %v6750_v17, 2  ;;  %v4578_v23 = vsel %vm4385_vm2, %v624_v42, 0.0  ;;  %v1600_v25 = vmul.f32 %v6720_v31, %v4288_v37  ;;  %v1804_v27 = vrot.slane %v4320_v61, 1  ;;  %v6754_v42 = vld [vmem:[#allocation35_spill] sm:$0xff] }
 0x14b   : > { %6743 = vst [vmem:[#allocation48_spill] sm:$0xff] %v4548_v21  ;;  %6747 = vst [vmem:[#allocation96_spill] sm:$0xff] %v4564_v50  ;;  %v982_v28 = vsel %vm4554_vm11, %v728_v38, 0.0  ;;  %v1934_v8 = vmul.f32 %v3679_v54, %v4328_v22  ;;  %v6753_v29 = vrot.slane %v4347_v13, 1  ;;  %v730_v34 = vadd.f32 %v6754_v42, %v3628_v33 }
 0x14c   : > { %v1486_v21 = vsel %vm1423_vm8, %v6751_v26, %v6749_v46  ;;  %6752 = vst [vmem:[#allocation24_spill] sm:$0xff] %v4574_v24  ;;  %v1932_v26 = vmul.f32 %v3679_v54, %v4288_v37  ;;  %v4592_v17 = vmul.f32 %v3677_v53, %v982_v28  ;;  %v4599_v37 = vmul.f32 %v3679_v54, %v982_v28 }
 0x14d   : > { %v1560_v9 = vadd.f32 %v1486_v21, %v1311_v56  ;;  %v1806_v61 = vsel %vm1174_vm6, %v1804_v27, %v6753_v29  ;;  %v2053_v47 = vrot.slane %v1934_v8, 2  ;;  %v2168_v43 = vmul.f32 %v6691_v3, %v982_v28 }
 0x14e   : > { %v2052_v56 = vrot.slane %v1932_v26, 2  ;;  %v4603_v46 = vmul.f32 %v3696_v4, %v982_v28  ;;  %v6755_v29 = vrot.slane %v4118_v60, 1  ;;  %v6758_v26 = vrot.slane %v4189_v14, 2  ;;  %v4629_v14 = vpop.f32.mrb[37].mxu0 }
 0x14f   : > { %v1632_v21 = vadd.f32 %v1600_v25, %v1560_v9  ;;  %v6756_v25 = vrot.slane %v4018_v16, 1  ;;  %v6757_v9 = vrot.slane %v4122_v15, 2  ;;  %v4620_v50 = vmul.f32 %v6720_v31, %v982_v28  ;;  %6760 = vst [vmem:[#allocation35_spill] sm:$0xff] %v4629_v14 }
 0x150   : > { %v2054_v13 = vsel %vm1423_vm8, %v2052_v56, %v2053_v47  ;;  %v2500_v16 = vmul.f32 %v3928_v10, %v982_v28  ;;  %v1601_v15 = vmul.f32 %v6734_v63, %v4296_v45 }
 0x151   : > { %v1880_v18 = vadd.f32 %v1806_v61, %v1632_v21  ;;  %v1240_v27 = vsel %vm1174_vm6, %v6756_v25, %v6755_v29  ;;  %v1489_v8 = vsel %vm1423_vm8, %v6758_v26, %v6757_v9  ;;  %6759 = vst [vmem:[#allocation22_spill] sm:$0xff] %v4620_v50  ;;  %v983_v21 = vsel %vm4554_vm11, %v730_v34, 0.0 }
 0x152   : > { %v1312_v61 = vadd.f32 %v1240_v27, %v4170_v5  ;;  %v1807_v29 = vrot.slane %v4336_v12, 1  ;;  %v1933_v25 = vmul.f32 %v3686_v59, %v4296_v45  ;;  %v1935_v5 = vmul.f32 %v3686_v59, %v4354_v52 }
 0x153   : > { %v2128_v60 = vadd.f32 %v2054_v13, %v1880_v18  ;;  %v669_v18 = vpop.f32.mrb[38].mxu0  ;;  %v2372_v34 = vrot.slane %v4603_v46, 1  ;;  %v626_v27 = vadd.f32 %v6761_v49, %v3628_v33  ;;  %v2620_v42 = vrot.slane %v2500_v16, 2 }
 0x154   : > { %v1561_v56 = vadd.f32 %v1489_v8, %v1312_v61  ;;  %v670_v9 = vpop.f32.mrb[39].mxu0  ;;  %v6762_v8 = vrot.slane %v4405_v62, 1  ;;  %v2055_v61 = vrot.slane %v1933_v25, 2  ;;  %v2056_v38 = vrot.slane %v1935_v5, 2  ;;  %v6764_v18 = vld [vmem:[#allocation18_spill] sm:$0xff] }
 0x155   : > { %v2200_v13 = vadd.f32 %v2168_v43, %v2128_v60  ;;  %v4644_v24 = vmul.f32 %v3684_v58, %v983_v21  ;;  %v2169_v28 = vmul.f32 %v6764_v18, %v983_v21  ;;  %v6765_v43 = vld [vmem:[#allocation39_spill] sm:$0xff]  ;;  %v6766_v62 = vrot.slane %v4410_v2, 2  ;;  %v4727_v50 = vpop.f32.mrb[40].mxu0 }
 0x156   : > { %v1633_v26 = vadd.f32 %v1601_v15, %v1561_v56  ;;  %v1809_v12 = vsel %vm1174_vm6, %v1807_v29, %v6762_v8  ;;  %v732_v46 = vadd.f32 %v6765_v43, %v3625_v32  ;;  %v2057_v49 = vsel %vm1423_vm8, %v2055_v61, %v2056_v38  ;;  %6779 = vst [vmem:[#allocation102_spill] sm:$0xff] %v4727_v50 }
 0x157   : > { %6763 = vst [vmem:[#allocation38_spill] sm:$0xff] %v4644_v24  ;;  %v1602_v15 = vmul.f32 %v6720_v31, %v4328_v22  ;;  %v2059_v56 = vsel %vm1423_vm8, %v2053_v47, %v6766_v62  ;;  %v4657_v16 = vsel %vm4385_vm2, %v626_v27, 0.0  ;;  %v4660_v29 = vmul.f32 %v6734_v63, %v983_v21  ;;  %v6771_v47 = vld [vmem:[#allocation42_spill] sm:$0xff]  ;;  %v3374_v27 = vld [vmem:[%s6403_s5 + $0x10] sm:$0xff]  }
 0x158   : > { %v1881_v60 = vadd.f32 %v1809_v12, %v1633_v26  ;;  %6767 = vst [vmem:[#allocation18_spill] sm:$0xff] %v4657_v16  ;;  %v4663_v25 = vmul.f32 %v3686_v59, %v983_v21  ;;  %v984_v5 = vsel %vm4515_vm10, %v732_v46, 0.0  ;;  %v4668_v26 = vmul.f32 %v3700_v6, %v983_v21  ;;  %3280 = vmatprep.subr.bf16.mxu1 %v3374_v27  ;;  %v3375_v12 = vld [vmem:[%s6403_s5 + $0x18] sm:$0xff]  }
 0x159   : > { %6768 = vst [vmem:[#allocation39_spill] sm:$0xff] %v4660_v29  ;;  %v1634_v2 = vadd.f32 %v1602_v15, %v4114_v1  ;;  %v734_v8 = vadd.f32 %v6771_v47, %v3628_v33  ;;  %v4678_v61 = vmul.f32 %v4218_v40, %v983_v21  ;;  %v4681_v43 = vmul.f32 %v3696_v4, %v984_v5 }
 0x15a   : > { %6769 = vst [vmem:[#allocation97_spill] sm:$0xff] %v4663_v25  ;;  %v2129_v9 = vadd.f32 %v2057_v49, %v1881_v60  ;;  %6770 = vst [vmem:[#allocation98_spill] sm:$0xff] %v4668_v26  ;;  %v4684_v46 = vmul.f32 %v3928_v10, %v984_v5  ;;  %v4686_v60 = vpop.f32.mrb[29].mxu1  ;;  %v4691_v49 = vmul.f32 %v3677_v53, %v984_v5  ;;  %3281 = vmatpush3.bf16.msra.mxu1 %v3374_v27 }
 0x15b   : > { %6772 = vst [vmem:[#allocation42_spill] sm:$0xff] %v4678_v61  ;;  %6773 = vst [vmem:[#allocation99_spill] sm:$0xff] %v4686_v60  ;;  %v1882_v15 = vadd.f32 %v4376_v39, %v1634_v2  ;;  %v2170_v62 = vmul.f32 %v6691_v3, %v984_v5  ;;  %v759_v21 = vpop.f32.mrb[30].mxu1  ;;  %v4696_v47 = vmul.f32 %v3679_v54, %v984_v5  ;;  %v6775_v14 = vrot.slane %v4681_v43, 1 }
 0x15c   : > { %v4688_v1 = vadd.f32 %v2169_v28, %v2129_v9  ;;  %v1603_v28 = vmul.f32 %v6734_v63, %v4354_v52  ;;  %v760_v9 = vpop.f32.mrb[31].mxu1  ;;  %v4706_v21 = vsel %vm4515_vm10, %v734_v8, 0.0  ;;  %v6776_v27 = vrot.slane %v4684_v46, 2  ;;  %3282 = vmatprep.subr.bf16.mxu1 %v3375_v12 }
 0x15d   : > { %v2130_v2 = vadd.f32 %v2059_v56, %v1882_v15  ;;  %v2374_v60 = vsel %vm1174_vm6, %v2372_v34, %v6775_v14  ;;  %v6777_v56 = vrot.slane %v4450_v57, 2  ;;  %v4723_v39 = vmul.f32 %v6720_v31, %v984_v5 }
 0x15e   : > { %6774 = vst [vmem:[#allocation100_spill] sm:$0xff] %v4688_v1  ;;  %v2622_v9 = vsel %vm1423_vm8, %v2620_v42, %v6776_v27  ;;  %v1635_v1 = vadd.f32 %v1603_v28, %v4208_v7  ;;  %v2448_v29 = vadd.f32 %v2374_v60, %v2200_v13  ;;  %v2171_v57 = vmul.f32 %v6764_v18, %v4706_v21  ;;  %v4742_v13 = vpop.f32.mrb[41].mxu0 }
 0x15f   : > { %v2061_v15 = vsel %vm1423_vm8, %v2056_v38, %v6777_v56  ;;  %6778 = vst [vmem:[#allocation101_spill] sm:$0xff] %v4723_v39  ;;  %v4725_v26 = vadd.f32 %v2170_v62, %v2130_v2  ;;  %6782 = vst [vmem:[#allocation103_spill] sm:$0xff] %v4742_v13  ;;  %3283 = vmatpush3.bf16.msra.mxu1 %v3375_v12  ;;  %v4748_v5 = vmul.f32 %v6734_v63, %v4706_v21  ;;  %v4754_v55 = vpop.f32.mrb[42].mxu0  ;;  %v3376_v62 = vld [vmem:[%s6403_s5 + $0x20] sm:$0xff]   ;;  %v6786_v2 = vld [vmem:[#allocation7_spill] sm:$0xff] }
 0x160   : > { %v1883_v7 = vadd.f32 %v4462_v0, %v1635_v1  ;;  %v4744_v34 = vadd.f32 %v2622_v9, %v2448_v29  ;;  %v6784_v0 = vld [vmem:[#allocation47_spill] sm:$0xff]  ;;  %v1092_v1 = vmul.f32 %v3648_v41, %v4578_v23  ;;  %v4761_v29 = vmul.f32 %v3684_v58, %v4706_v21  ;;  %v4769_v9 = vpop.f32.mrb[43].mxu0  ;;  %3284 = vmatprep.subr.bf16.mxu1 %v3376_v62 }
 0x161   : > { %6783 = vst [vmem:[#allocation104_spill] sm:$0xff] %v4748_v5  ;;  %v630_v60 = vadd.f32 %v6784_v0, %v3625_v32  ;;  %6785 = vst [vmem:[#allocation47_spill] sm:$0xff] %v4754_v55  ;;  %v4765_v12 = vmul.f32 %v3686_v59, %v4706_v21  ;;  %v1341_v27 = vmul.f32 %v6786_v2, %v4578_v23  ;;  %v6790_v55 = vld [vmem:[#allocation78_spill] sm:$0xff] }
 0x162   : > { %v2131_v28 = vadd.f32 %v2061_v15, %v1883_v7  ;;  %6787 = vst [vmem:[#allocation7_spill] sm:$0xff] %v4769_v9  ;;  %v1016_v0 = vmul.f32 %v6728_v19, %v4578_v23  ;;  %v1196_v8 = vrot.slane %v1092_v1, 1  ;;  %v1582_v42 = vmul.f32 %v6720_v31, %v4578_v23 }
 0x163   : > { %v950_v56 = vsel %vm4738_vm12, %v630_v60, 0.0  ;;  %v1445_v61 = vrot.slane %v1341_v27, 2  ;;  %3285 = vmatpush3.bf16.msra.mxu1 %v3376_v62  ;;  %v6789_v9 = vrot.slane %v4470_v11, 1  ;;  %v1656_v1 = vmul.f32 %v3677_v53, %v4578_v23 }
 0x164   : > { %v4777_v14 = vadd.f32 %v2171_v57, %v2131_v28  ;;  %v1094_v15 = vmul.f32 %v3648_v41, %v950_v56  ;;  %v1343_v7 = vmul.f32 %v6786_v2, %v950_v56  ;;  %v1614_v13 = vadd.f32 %v1582_v42, %v6790_v55 }
 0x165   : > { %v1197_v60 = vsel %vm1174_vm6, %v6789_v9, %v1196_v8  ;;  %v1658_v50 = vmul.f32 %v3677_v53, %v950_v56  ;;  %v6791_v28 = vrot.slane %v4473_v20, 2  ;;  %v1755_v62 = vrot.slane %v1656_v1, 1 }
 0x166   : > { %6788 = vst [vmem:[#allocation105_spill] sm:$0xff] %v4777_v14  ;;  %v1201_v5 = vrot.slane %v1094_v15, 1  ;;  %v1295_v57 = vadd.f32 %v1197_v60, %v4504_v30  ;;  %v1450_v27 = vrot.slane %v1343_v7, 2  ;;  %v1904_v11 = vmul.f32 %v3679_v54, %v4578_v23  ;;  %v6792_v15 = vld [vmem:[#allocation11_spill] sm:$0xff] }
 0x167   : > { %v1446_v14 = vsel %vm1423_vm8, %v6791_v28, %v1445_v61  ;;  %v1760_v39 = vrot.slane %v1658_v50, 1  ;;  %v1906_v42 = vmul.f32 %v3679_v54, %v950_v56  ;;  %v2146_v30 = vmul.f32 %v6691_v3, %v4578_v23  ;;  %v6794_v28 = vld [vmem:[#allocation30_spill] sm:$0xff] }
 0x168   : > { %v1202_v55 = vsel %vm1174_vm6, %v1196_v8, %v1201_v5  ;;  %v1451_v9 = vsel %vm1423_vm8, %v1445_v61, %v1450_v27  ;;  %v4797_v25 = vadd.f32 %v1446_v14, %v1295_v57  ;;  %v6793_v60 = vrot.slane %v6792_v15, 1  ;;  %v6795_v8 = vld [vmem:[#allocation79_spill] sm:$0xff] }
 0x169   : > { %v1297_v20 = vadd.f32 %v1202_v55, %v1016_v0  ;;  %v1761_v50 = vsel %vm1174_vm6, %v1755_v62, %v1760_v39  ;;  %v2003_v1 = vrot.slane %v1904_v11, 2  ;;  %v2008_v45 = vrot.slane %v1906_v42, 2 }
 0x16a   : > { %v1756_v7 = vsel %vm1174_vm6, %v6793_v60, %v1755_v62  ;;  %v1862_v52 = vadd.f32 %v1761_v50, %v1614_v13  ;;  %v2178_v5 = vadd.f32 %v2146_v30, %v6795_v8  ;;  %v6796_v14 = vrot.slane %v4482_v48, 2 }
 0x16b   : > { %v1860_v24 = vadd.f32 %v1756_v7, %v6794_v28  ;;  %v4807_v61 = vadd.f32 %v1451_v9, %v1297_v20  ;;  %v2218_v0 = vmul.f32 %v3696_v4, %v4578_v23  ;;  %v2220_v27 = vmul.f32 %v3696_v4, %v950_v56  ;;  %v6801_v20 = vld [vmem:[#allocation50_spill] sm:$0xff] }
 0x16c   : > { %v2004_v57 = vsel %vm1423_vm8, %v6796_v14, %v2003_v1  ;;  %v2009_v39 = vsel %vm1423_vm8, %v2003_v1, %v2008_v45  ;;  %v4820_v13 = vmul.f32 %v3928_v10, %v4578_v23  ;;  %v2468_v11 = vmul.f32 %v3928_v10, %v950_v56 }
 0x16d   : > { %v4816_v62 = vadd.f32 %v2004_v57, %v1860_v24  ;;  %v4831_v42 = vadd.f32 %v2009_v39, %v1862_v52  ;;  %v2313_v55 = vrot.slane %v2218_v0, 1  ;;  %v2318_v45 = vrot.slane %v2220_v27, 1  ;;  %v6800_v24 = vld [vmem:[#allocation49_spill] sm:$0xff] }
 0x16e   : > { %6797 = vst [vmem:[#allocation78_spill] sm:$0xff] %v4820_v13  ;;  %v738_v9 = vadd.f32 %v6800_v24, %v3625_v32  ;;  %v6483_v30 = vrot.slane %v4820_v13, 2  ;;  %v2566_v56 = vrot.slane %v2468_v11, 2  ;;  %v632_v15 = vadd.f32 %v6801_v20, %v3628_v33  ;;  %v6807_v11 = vld [vmem:[#allocation8_spill] sm:$0xff] }
 0x16f   : > { %v4841_v51 = vmul.f32 %v3700_v6, %v4706_v21  ;;  %v6803_v52 = vrot.slane %v4486_v36, 1  ;;  %v2319_v7 = vsel %vm1174_vm6, %v2313_v55, %v2318_v45  ;;  %v4857_v14 = vmul.f32 %v3656_v44, %v4657_v16 }
 0x170   : > { %v986_v50 = vsel %vm4827_vm13, %v738_v9, 0.0  ;;  %v2426_v1 = vadd.f32 %v2319_v7, %v2178_v5  ;;  %v2567_v28 = vsel %vm1423_vm8, %v6483_v30, %v2566_v56  ;;  %v4861_v36 = vmul.f32 %v4218_v40, %v4706_v21  ;;  %v6808_v56 = vld [vmem:[#allocation10_spill] sm:$0xff] }
 0x171   : > { %6802 = vst [vmem:[#allocation11_spill] sm:$0xff] %v4841_v51  ;;  %v4846_v60 = vsel %vm1174_vm6, %v6803_v52, %v2313_v55  ;;  %v1694_v8 = vmul.f32 %v3677_v53, %v986_v50  ;;  %6805 = vst [vmem:[#allocation79_spill] sm:$0xff] %v4857_v14  ;;  %v2256_v57 = vmul.f32 %v3696_v4, %v986_v50  ;;  %v951_v5 = vsel %vm4738_vm12, %v632_v15, 0.0 }
 0x172   : > { %6804 = vst [vmem:[#allocation30_spill] sm:$0xff] %v4846_v60  ;;  %6806 = vst [vmem:[#allocation49_spill] sm:$0xff] %v4861_v36  ;;  %v2504_v0 = vmul.f32 %v3928_v10, %v986_v50  ;;  %v2674_v27 = vadd.f32 %v2567_v28, %v2426_v1  ;;  %v1017_v55 = vmul.f32 %v6807_v11, %v4657_v16  ;;  %v6810_v10 = vrot.slane %v4691_v49, 1 }
 0x173   : > { %v1820_v39 = vrot.slane %v1694_v8, 1  ;;  %v1095_v45 = vmul.f32 %v3656_v44, %v951_v5  ;;  %v2378_v24 = vrot.slane %v2256_v57, 1  ;;  %v4872_v21 = vmul.f32 %v6808_v56, %v4657_v16 }
 0x174   : > { %v2626_v9 = vrot.slane %v2504_v0, 2  ;;  %v1344_v20 = vmul.f32 %v6808_v56, %v951_v5  ;;  %v6486_v15 = vrot.slane %v4857_v14, 1  ;;  %v1583_v7 = vmul.f32 %v6734_v63, %v4657_v16 }
 0x175   : > { %6809 = vst [vmem:[#allocation50_spill] sm:$0xff] %v4872_v21  ;;  %v4878_v38 = vsel %vm1174_vm6, %v6810_v10, %v1820_v39  ;;  %v1203_v52 = vrot.slane %v1095_v45, 1  ;;  %v6811_v1 = vrot.slane %v4681_v43, 1  ;;  %v6812_v8 = vrot.slane %v4684_v46, 2  ;;  %v6813_v10 = vld [vmem:[#allocation37_spill] sm:$0xff] }
 0x176   : > { %v6485_v0 = vrot.slane %v4872_v21, 2  ;;  %v1452_v30 = vrot.slane %v1344_v20, 2  ;;  %v1615_v23 = vadd.f32 %v1583_v7, %v6813_v10  ;;  %v1657_v43 = vmul.f32 %v3684_v58, %v4657_v16 }
 0x177   : > { %v2379_v28 = vsel %vm1174_vm6, %v6811_v1, %v2378_v24  ;;  %v2627_v57 = vsel %vm1423_vm8, %v6812_v8, %v2626_v9  ;;  %v1204_v45 = vsel %vm1174_vm6, %v6486_v15, %v1203_v52  ;;  %v1659_v24 = vmul.f32 %v3684_v58, %v951_v5 }
 0x178   : > { %v2450_v39 = vadd.f32 %v2379_v28, %v4725_v26  ;;  %v1298_v13 = vadd.f32 %v1204_v45, %v1017_v55  ;;  %v1453_v46 = vsel %vm1423_vm8, %v6485_v0, %v1452_v30  ;;  %v4903_v9 = vmul.f32 %v3686_v59, %v4657_v16  ;;  %v6817_v45 = vld [vmem:[#allocation96_spill] sm:$0xff]  ;;  %v3377_v16 = vld [vmem:[%s6403_s5 + $0x28] sm:$0xff]  }
 0x179   : > { %v4906_v26 = vmul.f32 %v3679_v54, %v986_v50  ;;  %v1758_v52 = vrot.slane %v1657_v43, 1  ;;  %v1907_v7 = vmul.f32 %v3686_v59, %v951_v5  ;;  %v1762_v30 = vrot.slane %v1659_v24, 1  ;;  %3286 = vmatprep.subr.bf16.mxu1 %v3377_v16 }
 0x17a   : > { %6814 = vst [vmem:[#allocation8_spill] sm:$0xff] %v4903_v9  ;;  %v4908_v20 = vadd.f32 %v2627_v57, %v2450_v39  ;;  %v4913_v28 = vadd.f32 %v1453_v46, %v1298_v13  ;;  %v6818_v10 = vrot.slane %v6817_v45, 1  ;;  %v6487_v50 = vrot.slane %v4903_v9, 2  ;;  %v6820_v39 = vld [vmem:[#allocation19_spill] sm:$0xff]  ;;  %v6823_v46 = vld [vmem:[#allocation52_spill] sm:$0xff]  ;;  %3287 = vmatpush3.bf16.msra.mxu1 %v3377_v16  ;;  %v6868_v16 = vld [vmem:[#allocation41_spill] sm:$0xff] }
 0x17b   : > { %v2010_v57 = vrot.slane %v1907_v7, 2  ;;  %v4924_v43 = vadd.f32 %v6820_v39, %v4744_v34  ;;  %v1763_v15 = vsel %vm1174_vm6, %v1758_v52, %v1762_v30  ;;  %v4928_v13 = vmul.f32 %v3700_v6, %v951_v5  ;;  %v6824_v7 = vld [vmem:[#allocation4_spill] sm:$0xff] }
 0x17c   : > { %6815 = vst [vmem:[#allocation37_spill] sm:$0xff] %v4908_v20  ;;  %6816 = vst [vmem:[#allocation106_spill] sm:$0xff] %v4913_v28  ;;  %v4919_v0 = vsel %vm1174_vm6, %v6818_v10, %v1758_v52  ;;  %v740_v24 = vadd.f32 %v6823_v46, %v3628_v33  ;;  %v1863_v8 = vadd.f32 %v1763_v15, %v1615_v23  ;;  %v767_v55 = vadd.s32 3, %v6824_v7 }
 0x17d   : > { %6819 = vst [vmem:[#allocation96_spill] sm:$0xff] %v4919_v0  ;;  %6821 = vst [vmem:[#allocation107_spill] sm:$0xff] %v4924_v43  ;;  %v2011_v10 = vsel %vm1423_vm8, %v6487_v50, %v2010_v57  ;;  %v4938_v34 = vadd.f32 %v6820_v39, %v2674_v27  ;;  %v4941_v52 = vmul.f32 %v4218_v40, %v951_v5  ;;  %v773_v46 = vadd.s32 9, %v6824_v7  ;;  %v6828_v57 = vld [vmem:[#allocation58_spill] sm:$0xff]  ;;  %v6836_v43 = vld [vmem:[#allocation61_spill] sm:$0xff] }
 0x17e   : > { %6822 = vst [vmem:[#allocation108_spill] sm:$0xff] %v4928_v13  ;;  %v987_v30 = vsel %vm4827_vm13, %v740_v24, 0.0  ;;  %v4946_v1 = vadd.f32 %v2011_v10, %v1863_v8  ;;  %v638_v50 = vadd.f32 %v6828_v57, %v3625_v32  ;;  %vm781_vm14 = vcmp.ge.s32.totalorder %v767_v55, 0  ;;  %v6859_v7 = vld [vmem:[#allocation15_spill] sm:$0xff] }
 0x17f   : > { %6825 = vst [vmem:[#allocation52_spill] sm:$0xff] %v4938_v34  ;;  %6826 = vst [vmem:[#allocation109_spill] sm:$0xff] %v4941_v52  ;;  %v1695_v23 = vmul.f32 %v3684_v58, %v987_v30  ;;  %v2257_v15 = vmul.f32 %v3700_v6, %v987_v30  ;;  %v4954_v45 = vmul.f32 %v3686_v59, %v987_v30  ;;  %vm791_vm15 = vcmp.lt.s32.totalorder %v767_v55, 16  ;;  %v6834_v55 = vld [vmem:[#allocation60_spill] sm:$0xff] }
 0x180   : > { %6827 = vst [vmem:[#allocation110_spill] sm:$0xff] %v4946_v1  ;;  %vm4956_vm0 = vmand %vm781_vm14, %vm791_vm15  ;;  %vm787_vm2 = vcmp.ge.s32.totalorder %v773_v46, 0  ;;  %vm797_vm3 = vcmp.lt.s32.totalorder %v773_v46, 16  ;;  %v746_v20 = vadd.f32 %v6836_v43, %v3625_v32  ;;  %v6837_v36 = vrot.slane %v4761_v29, 1  ;;  %v5019_v46 = vld [vmem:[%s6401_s3 + $0x10] ss:$0 sm:$0xff] }
 0x181   : > { %v1822_v48 = vrot.slane %v1695_v23, 1  ;;  %v2380_v5 = vrot.slane %v2257_v15, 1  ;;  %vm4965_vm4 = vmand %vm4956_vm0, %vm808_vm5  ;;  %v640_v23 = vadd.f32 %v6834_v55, %v3628_v33  ;;  %v6835_v15 = vld [vmem:[#allocation62_spill] sm:$0xff]  ;;  %v6838_v21 = vrot.slane %v4841_v51, 1  ;;  %v6847_v52 = vld [vmem:[#allocation16_spill] sm:$0xff] }
 0x182   : > { %v642_v27 = vadd.f32 %v6835_v15, %v3625_v32  ;;  %v4986_v9 = vmul.f32 %v4218_v40, %v987_v30  ;;  %v952_v55 = vsel %vm4965_vm4, %v638_v50, 0.0  ;;  %vm4999_vm7 = vmand %vm787_vm2, %vm797_vm3  ;;  %v1120_v13 = vmul.f32 %v3648_v41, %v6847_v52 }
 0x183   : > { %v4978_v8 = vsel %vm1174_vm6, %v6837_v36, %v1822_v48  ;;  %v4983_v14 = vsel %vm1174_vm6, %v6838_v21, %v2380_v5  ;;  %v4992_v43 = vmul.f32 %v3648_v41, %v952_v55  ;;  %v4995_v0 = vmul.f32 %v6786_v2, %v952_v55  ;;  %vm5042_vm10 = vmand %vm4999_vm7, %vm808_vm5 }
 0x184   : > { %6839 = vst [vmem:[#allocation58_spill] sm:$0xff] %v4983_v14  ;;  %6840 = vst [vmem:[#allocation60_spill] sm:$0xff] %v4986_v9  ;;  %v1584_v36 = vmul.f32 %v6720_v31, %v952_v55  ;;  %v5004_v30 = vmul.f32 %v3677_v53, %v952_v55  ;;  %v5007_v50 = vmul.f32 %v3679_v54, %v952_v55  ;;  %v5026_v51 = vsel %vm4965_vm4, %v640_v23, 0.0 }
 0x185   : > { %v2148_v48 = vmul.f32 %v6691_v3, %v952_v55  ;;  %v5011_v5 = vmul.f32 %v3696_v4, %v952_v55  ;;  %v5022_v14 = vmul.f32 %v5019_v46, %v952_v55  ;;  %6846 = vst [vmem:[#allocation112_spill] sm:$0xff] %v5026_v51  ;;  %v1034_v23 = vmul.f32 %v6728_v19, %v6847_v52  ;;  %vm5215_vm11 = vmand %vm4956_vm0, %vm843_vm9 }
 0x186   : > { %6843 = vst [vmem:[#allocation62_spill] sm:$0xff] %v5007_v50  ;;  %v5014_v15 = vadd.f32 %v1584_v36, %v4797_v25  ;;  %v5036_v36 = vsel %vm4956_vm0, %v642_v27, 0.0  ;;  %v5049_v34 = vmul.f32 %v6728_v19, %v952_v55  ;;  %v5059_v10 = vmul.f32 %v6807_v11, %v5026_v51  ;;  %vm5309_vm12 = vmand %vm4999_vm7, %vm843_vm9 }
 0x187   : > { %6844 = vst [vmem:[#allocation61_spill] sm:$0xff] %v5011_v5  ;;  %6845 = vst [vmem:[#allocation111_spill] sm:$0xff] %v5022_v14  ;;  %v5032_v25 = vadd.f32 %v2148_v48, %v4816_v62  ;;  %v5063_v55 = vmul.f32 %v3656_v44, %v5026_v51  ;;  %v5067_v62 = vmul.f32 %v6808_v56, %v5026_v51  ;;  %v988_v27 = vsel %vm5042_vm10, %v746_v20, 0.0  ;;  %v5071_v48 = vpop.f32.mrb[44].mxu0 }
 0x188   : > { %6851 = vst [vmem:[#allocation113_spill] sm:$0xff] %v5059_v10  ;;  %v1245_v9 = vrot.slane %v1120_v13, 1  ;;  %6854 = vst [vmem:[#allocation116_spill] sm:$0xff] %v5071_v48  ;;  %v5078_v60 = vmul.f32 %v3684_v58, %v5026_v51  ;;  %v5082_v10 = vmul.f32 %v6764_v18, %v5026_v51  ;;  %v5086_v39 = vmul.f32 %v3700_v6, %v5026_v51  ;;  %v5090_v13 = vpop.f32.mrb[45].mxu0  ;;  %v3378_v48 = vld [vmem:[%s6403_s5 + $0x30] sm:$0xff]  }
 0x189   : > { %6848 = vst [vmem:[#allocation16_spill] sm:$0xff] %v5032_v25  ;;  %6852 = vst [vmem:[#allocation114_spill] sm:$0xff] %v5063_v55  ;;  %v1369_v20 = vmul.f32 %v6786_v2, %v6847_v52  ;;  %v6860_v1 = vrot.slane %v6859_v7, 1  ;;  %v6861_v59 = vrot.slane %v4691_v49, 1  ;;  %v6863_v52 = vrot.slane %v4696_v47, 2  ;;  %v687_v63 = vpop.f32.mrb[46].mxu0  ;;  %3288 = vmatprep.subr.bf16.mxu1 %v3378_v48 }
 0x18a   : > { %6853 = vst [vmem:[#allocation115_spill] sm:$0xff] %v5067_v62  ;;  %6855 = vst [vmem:[#allocation117_spill] sm:$0xff] %v5078_v60  ;;  %v5115_v49 = vmul.f32 %v3696_v4, %v988_v27  ;;  %3289 = vmatpush3.bf16.msra.mxu1 %v3378_v48  ;;  %v6877_v48 = vld [vmem:[#allocation22_spill] sm:$0xff] }
 0x18b   : > { %6856 = vst [vmem:[#allocation118_spill] sm:$0xff] %v5082_v10  ;;  %6857 = vst [vmem:[#allocation119_spill] sm:$0xff] %v5086_v39  ;;  %v1247_v60 = vsel %vm1174_vm6, %v1245_v9, %v6860_v1  ;;  %v1371_v10 = vmul.f32 %v6786_v2, %v4328_v22  ;;  %v6862_v39 = vrot.slane %v4592_v17, 1  ;;  %v5112_v9 = vmul.f32 %v4218_v40, %v5026_v51  ;;  %v688_v17 = vpop.f32.mrb[47].mxu0 }
 0x18c   : > { %6858 = vst [vmem:[#allocation120_spill] sm:$0xff] %v5090_v13  ;;  %v6864_v13 = vrot.slane %v4599_v37, 2  ;;  %v1315_v1 = vadd.f32 %v1247_v60, %v1034_v23  ;;  %v1494_v7 = vrot.slane %v1369_v20, 2  ;;  %v6866_v37 = vld [vmem:[#allocation66_spill] sm:$0xff]  ;;  %v3379_v60 = vld [vmem:[%s6403_s5 + $0x38] sm:$0xff]   ;;  %v2172_v23 = vmul.f32 %v6691_v3, %v988_v27 }
 0x18d   : > { %v1816_v58 = vsel %vm1174_vm6, %v6862_v39, %v6861_v59  ;;  %6865 = vst [vmem:[#allocation15_spill] sm:$0xff] %v5112_v9  ;;  %v1495_v59 = vrot.slane %v1371_v10, 2  ;;  %v2506_v39 = vmul.f32 %v5019_v46, %v988_v27  ;;  %v644_v62 = vadd.f32 %v6866_v37, %v3628_v33  ;;  %v6869_v27 = vld [vmem:[#allocation28_spill] sm:$0xff]  ;;  %3290 = vmatprep.subr.bf16.mxu1 %v3379_v60 }
 0x18e   : > { %v2064_v28 = vsel %vm1423_vm8, %v6864_v13, %v6863_v52  ;;  %v6867_v13 = vld [vmem:[#allocation63_spill] sm:$0xff]  ;;  %v2382_v20 = vrot.slane %v5115_v49, 1  ;;  %v1121_v10 = vmul.f32 %v3656_v44, %v6868_v16  ;;  %v1370_v52 = vmul.f32 %v6808_v56, %v6868_v16  ;;  %3291 = vmatpush3.bf16.msra.mxu1 %v3379_v60 }
 0x18f   : > { %v748_v63 = vadd.f32 %v6867_v13, %v3628_v33  ;;  %v1496_v17 = vsel %vm1423_vm8, %v1494_v7, %v1495_v59  ;;  %v2630_v37 = vrot.slane %v2506_v39, 2  ;;  %v1035_v51 = vmul.f32 %v6807_v11, %v6868_v16  ;;  %v6872_v39 = vld [vmem:[#allocation38_spill] sm:$0xff]  ;;  %v6875_v16 = vld [vmem:[#allocation97_spill] sm:$0xff] }
 0x190   : > { %v1564_v9 = vadd.f32 %v1496_v17, %v1315_v1  ;;  %v1248_v14 = vrot.slane %v1121_v10, 1  ;;  %v1372_v49 = vmul.f32 %v6808_v56, %v6869_v27  ;;  %v1497_v55 = vrot.slane %v1370_v52, 2 }
 0x191   : > { %v989_v13 = vsel %vm5042_vm10, %v748_v63, 0.0  ;;  %v5140_v44 = vsel %vm4956_vm0, %v644_v62, 0.0  ;;  %v6871_v7 = vrot.slane %v4761_v29, 1  ;;  %v6873_v25 = vrot.slane %v6872_v39, 1  ;;  %v6878_v62 = vld [vmem:[#allocation84_spill] sm:$0xff] }
 0x192   : > { %6870 = vst [vmem:[#allocation66_spill] sm:$0xff] %v5140_v44  ;;  %v6874_v63 = vrot.slane %v4765_v12, 2  ;;  %v6876_v1 = vrot.slane %v6875_v16, 2  ;;  %v5153_v17 = vmul.f32 %v3700_v6, %v989_v13  ;;  %v1636_v52 = vadd.f32 %v6877_v48, %v1564_v9  ;;  %v6880_v16 = vld [vmem:[#allocation67_spill] sm:$0xff]  ;;  %v6881_v48 = vld [vmem:[#allocation80_spill] sm:$0xff] }
 0x193   : > { %v1819_v57 = vsel %vm1174_vm6, %v6873_v25, %v6871_v7  ;;  %v6879_v56 = vrot.slane %v6878_v62, 1  ;;  %v1498_v44 = vrot.slane %v1372_v49, 2  ;;  %v2507_v39 = vmul.f32 %v4218_v40, %v989_v13 }
 0x194   : > { %v2067_v10 = vsel %vm1423_vm8, %v6876_v1, %v6874_v63  ;;  %v2173_v7 = vmul.f32 %v6764_v18, %v989_v13  ;;  %v750_v5 = vadd.f32 %v6880_v16, %v3625_v32  ;;  %v1036_v63 = vmul.f32 %v6728_v19, %v4328_v22 }
 0x195   : > { %v1250_v29 = vsel %vm1174_vm6, %v1248_v14, %v6879_v56  ;;  %v1884_v1 = vadd.f32 %v1816_v58, %v1636_v52  ;;  %v1499_v50 = vsel %vm1423_vm8, %v1497_v55, %v1498_v44  ;;  %v2385_v9 = vrot.slane %v5153_v17, 1  ;;  %v6883_v56 = vld [vmem:[#allocation82_spill] sm:$0xff] }
 0x196   : > { %v1316_v25 = vadd.f32 %v1250_v29, %v1035_v51  ;;  %v6882_v62 = vrot.slane %v6881_v48, 2  ;;  %v990_v51 = vsel %vm4999_vm7, %v750_v5, 0.0  ;;  %v1317_v13 = vadd.f32 %v6883_v56, %v1036_v63  ;;  %v6887_v5 = vld [vmem:[#allocation69_spill] sm:$0xff] }
 0x197   : > { %v6884_v49 = vrot.slane %v4906_v26, 2  ;;  %v6885_v22 = vrot.slane %v4696_v47, 2  ;;  %v2132_v55 = vadd.f32 %v2064_v28, %v1884_v1  ;;  %v2633_v52 = vrot.slane %v2507_v39, 2  ;;  %v6888_v39 = vld [vmem:[#allocation29_spill] sm:$0xff] }
 0x198   : > { %v1501_v14 = vsel %vm1423_vm8, %v1495_v59, %v6882_v62  ;;  %v1565_v40 = vadd.f32 %v1499_v50, %v1316_v25  ;;  %v5179_v17 = vmul.f32 %v3696_v4, %v990_v51  ;;  %v5182_v59 = vmul.f32 %v5019_v46, %v990_v51  ;;  %v6886_v50 = vld [vmem:[#allocation39_spill] sm:$0xff]  ;;  %v6890_v62 = vld [vmem:[#allocation101_spill] sm:$0xff] }
 0x199   : > { %v2069_v58 = vsel %vm1423_vm8, %v6885_v22, %v6884_v49  ;;  %v1566_v29 = vadd.f32 %v1501_v14, %v1317_v13  ;;  %v752_v25 = vadd.f32 %v6887_v5, %v3628_v33  ;;  %v1037_v26 = vmul.f32 %v6807_v11, %v6869_v27 }
 0x19a   : > { %v1637_v60 = vadd.f32 %v6886_v50, %v1565_v40  ;;  %v2204_v47 = vadd.f32 %v2172_v23, %v2132_v55  ;;  %v2383_v16 = vrot.slane %v5179_v17, 1  ;;  %v2631_v28 = vrot.slane %v5182_v59, 2  ;;  %v6891_v40 = vld [vmem:[#allocation32_spill] sm:$0xff] }
 0x19b   : > { %v6889_v63 = vrot.slane %v6888_v39, 2  ;;  %v1638_v56 = vadd.f32 %v6890_v62, %v1566_v29  ;;  %v991_v14 = vsel %vm4999_vm7, %v752_v25, 0.0  ;;  %v1318_v13 = vadd.f32 %v6891_v40, %v1037_v26 }
 0x19c   : > { %v1885_v48 = vadd.f32 %v1819_v57, %v1637_v60  ;;  %v2174_v49 = vmul.f32 %v6691_v3, %v990_v51  ;;  %v2384_v23 = vsel %vm1174_vm6, %v2382_v20, %v2383_v16  ;;  %v2632_v22 = vsel %vm1423_vm8, %v2630_v37, %v2631_v28 }
 0x19d   : > { %v1503_v1 = vsel %vm1423_vm8, %v1498_v44, %v6889_v63  ;;  %v6892_v44 = vrot.slane %v4954_v45, 2  ;;  %v6893_v57 = vrot.slane %v4765_v12, 2  ;;  %v1886_v60 = vadd.f32 %v4878_v38, %v1638_v56  ;;  %v5226_v12 = vld [vmem:[%s6401_s3 + $0x18] ss:$0 sm:$0xff] }
 0x19e   : > { %v2133_v50 = vadd.f32 %v2067_v10, %v1885_v48  ;;  %v2452_v29 = vadd.f32 %v2384_v23, %v2204_v47  ;;  %v1567_v5 = vadd.f32 %v1503_v1, %v1318_v13  ;;  %v2175_v37 = vmul.f32 %v6764_v18, %v991_v14  ;;  %v6896_v10 = vld [vmem:[#allocation70_spill] sm:$0xff]  ;;  %v6898_v47 = vld [vmem:[#allocation104_spill] sm:$0xff] }
 0x19f   : > { %v2071_v55 = vsel %vm1423_vm8, %v6893_v57, %v6892_v44  ;;  %v5221_v45 = vmul.f32 %v3700_v6, %v991_v14  ;;  %v5229_v38 = vmul.f32 %v5226_v12, %v991_v14  ;;  %v648_v24 = vadd.f32 %v6896_v10, %v3625_v32 }
 0x1a0   : > { %v2205_v51 = vadd.f32 %v2173_v7, %v2133_v50  ;;  %v2134_v25 = vadd.f32 %v2069_v58, %v1886_v60  ;;  %v5233_v26 = vadd.f32 %v2632_v22, %v2452_v29  ;;  %v1639_v39 = vadd.f32 %v6898_v47, %v1567_v5 }
 0x1a1   : > { %v6527_v63 = vrot.slane %v5221_v45, 1  ;;  %v6525_v1 = vrot.slane %v5229_v38, 2  ;;  %v956_v48 = vsel %vm5215_vm11, %v648_v24, 0.0  ;;  %v1098_v62 = vmul.f32 %v3648_v41, %v5036_v36 }
 0x1a2   : > { %6897 = vst [vmem:[#allocation63_spill] sm:$0xff] %v5233_v26  ;;  %v5242_v56 = vadd.f32 %v2174_v49, %v2134_v25  ;;  %v1887_v14 = vadd.f32 %v4978_v8, %v1639_v39  ;;  %v1020_v7 = vmul.f32 %v6728_v19, %v5036_v36  ;;  %v1100_v58 = vmul.f32 %v3648_v41, %v956_v48 }
 0x1a3   : > { %v2387_v40 = vsel %vm1174_vm6, %v2385_v9, %v6527_v63  ;;  %v5254_v13 = vsel %vm1423_vm8, %v2633_v52, %v6525_v1  ;;  %v1206_v23 = vrot.slane %v1098_v62, 1  ;;  %v1347_v49 = vmul.f32 %v6786_v2, %v5036_v36 }
 0x1a4   : > { %6899 = vst [vmem:[#allocation38_spill] sm:$0xff] %v5254_v13  ;;  %v2135_v22 = vadd.f32 %v2071_v55, %v1887_v14  ;;  %v5258_v8 = vadd.f32 %v2387_v40, %v2205_v51  ;;  %v1211_v44 = vrot.slane %v1100_v58, 1  ;;  %v1349_v57 = vmul.f32 %v6786_v2, %v956_v48  ;;  %v6937_v13 = vld [vmem:[#allocation4_spill] sm:$0xff] }
 0x1a5   : > { %v6901_v50 = vrot.slane %v4992_v43, 1  ;;  %v1455_v9 = vrot.slane %v1347_v49, 2  ;;  %v1586_v29 = vmul.f32 %v6720_v31, %v5036_v36  ;;  %v1662_v52 = vmul.f32 %v3677_v53, %v5036_v36 }
 0x1a6   : > { %6900 = vst [vmem:[#allocation97_spill] sm:$0xff] %v5258_v8  ;;  %v5268_v5 = vadd.f32 %v2175_v37, %v2135_v22  ;;  %v1212_v55 = vsel %vm1174_vm6, %v1206_v23, %v1211_v44  ;;  %v1460_v24 = vrot.slane %v1349_v57, 2  ;;  %v6902_v25 = vrot.slane %v4995_v0, 2 }
 0x1a7   : > { %v1207_v60 = vsel %vm1174_vm6, %v6901_v50, %v1206_v23  ;;  %v1301_v51 = vadd.f32 %v1212_v55, %v1020_v7  ;;  %v1618_v47 = vadd.f32 %v1586_v29, %v4807_v61  ;;  %v1664_v39 = vmul.f32 %v3677_v53, %v956_v48 }
 0x1a8   : > { %v1299_v10 = vadd.f32 %v1207_v60, %v5049_v34  ;;  %v1456_v43 = vsel %vm1423_vm8, %v6902_v25, %v1455_v9  ;;  %v1461_v62 = vsel %vm1423_vm8, %v1455_v9, %v1460_v24  ;;  %v1765_v37 = vrot.slane %v1662_v52, 1  ;;  %v6904_v52 = vld [vmem:[#allocation62_spill] sm:$0xff] }
 0x1a9   : > { %v1910_v58 = vmul.f32 %v3679_v54, %v5036_v36  ;;  %v5282_v40 = vadd.f32 %v1461_v62, %v1301_v51  ;;  %v1770_v34 = vrot.slane %v1664_v39, 1  ;;  %v1912_v7 = vmul.f32 %v3679_v54, %v956_v48 }
 0x1aa   : > { %v5278_v14 = vadd.f32 %v1456_v43, %v1299_v10  ;;  %v2150_v0 = vmul.f32 %v6691_v3, %v5036_v36  ;;  %v6903_v61 = vrot.slane %v5004_v30, 1  ;;  %v2224_v22 = vmul.f32 %v3696_v4, %v5036_v36 }
 0x1ab   : > { %v2013_v49 = vrot.slane %v1910_v58, 2  ;;  %v2226_v44 = vmul.f32 %v3696_v4, %v956_v48  ;;  %v1771_v57 = vsel %vm1174_vm6, %v1765_v37, %v1770_v34  ;;  %v2018_v60 = vrot.slane %v1912_v7, 2 }
 0x1ac   : > { %v1766_v23 = vsel %vm1174_vm6, %v6903_v61, %v1765_v37  ;;  %v2182_v9 = vadd.f32 %v2150_v0, %v4831_v42  ;;  %v1866_v29 = vadd.f32 %v1771_v57, %v1618_v47  ;;  %v6905_v55 = vrot.slane %v6904_v52, 2  ;;  %v6908_v47 = vld [vmem:[#allocation61_spill] sm:$0xff]  ;;  %v6917_v52 = vld [vmem:[#allocation111_spill] sm:$0xff] }
 0x1ad   : > { %v1864_v50 = vadd.f32 %v1766_v23, %v5014_v15  ;;  %v2323_v10 = vrot.slane %v2224_v22, 1  ;;  %v2328_v24 = vrot.slane %v2226_v44, 1  ;;  %v2019_v51 = vsel %vm1423_vm8, %v2013_v49, %v2018_v60  ;;  %v6913_v44 = vld [vmem:[#allocation77_spill] sm:$0xff] }
 0x1ae   : > { %v2014_v30 = vsel %vm1423_vm8, %v6905_v55, %v2013_v49  ;;  %v2472_v43 = vmul.f32 %v5019_v46, %v5036_v36  ;;  %v2474_v39 = vmul.f32 %v5019_v46, %v956_v48  ;;  %v5313_v15 = vadd.f32 %v2019_v51, %v1866_v29  ;;  %v6910_v36 = vld [vmem:[#allocation76_spill] sm:$0xff]  ;;  %v6915_v60 = vld [vmem:[#allocation9_spill] sm:$0xff] }
 0x1af   : > { %v5300_v25 = vadd.f32 %v2014_v30, %v1864_v50  ;;  %v6909_v62 = vrot.slane %v6908_v47, 1  ;;  %v2329_v58 = vsel %vm1174_vm6, %v2323_v10, %v2328_v24  ;;  %v756_v34 = vadd.f32 %v6910_v36, %v3625_v32  ;;  %v6911_v48 = vld [vmem:[#allocation16_spill] sm:$0xff]  ;;  %v6914_v50 = vld [vmem:[#allocation66_spill] sm:$0xff] }
 0x1b0   : > { %v2430_v0 = vadd.f32 %v2329_v58, %v2182_v9  ;;  %v2571_v61 = vrot.slane %v2472_v43, 2  ;;  %v2576_v21 = vrot.slane %v2474_v39, 2  ;;  %v650_v57 = vadd.f32 %v6913_v44, %v3628_v33 }
 0x1b1   : > { %v2324_v37 = vsel %vm1174_vm6, %v6909_v62, %v2323_v10  ;;  %v992_v22 = vsel %vm5309_vm12, %v756_v34, 0.0  ;;  %v5329_v29 = vmul.f32 %v6915_v60, %v6914_v50  ;;  %v6918_v55 = vrot.slane %v6917_v52, 2  ;;  %v6920_v34 = vld [vmem:[#allocation10_spill] sm:$0xff] }
 0x1b2   : > { %v2428_v7 = vadd.f32 %v2324_v37, %v6911_v48  ;;  %v2577_v9 = vsel %vm1423_vm8, %v2571_v61, %v2576_v21  ;;  %v2262_v10 = vmul.f32 %v3696_v4, %v992_v22  ;;  %v2510_v24 = vmul.f32 %v5019_v46, %v992_v22 }
 0x1b3   : > { %6916 = vst [vmem:[#allocation22_spill] sm:$0xff] %v5329_v29  ;;  %v2572_v30 = vsel %vm1423_vm8, %v6918_v55, %v2571_v61  ;;  %v2678_v47 = vadd.f32 %v2577_v9, %v2430_v0  ;;  %v957_v62 = vsel %vm5215_vm11, %v650_v57, 0.0  ;;  %v5343_v48 = vmul.f32 %v6920_v34, %v6914_v50  ;;  %v6923_v9 = vld [vmem:[#allocation106_spill] sm:$0xff] }
 0x1b4   : > { %v2676_v39 = vadd.f32 %v2572_v30, %v2428_v7  ;;  %v2388_v37 = vrot.slane %v2262_v10, 1  ;;  %v2636_v58 = vrot.slane %v2510_v24, 2  ;;  %v1101_v36 = vmul.f32 %v6915_v60, %v957_v62  ;;  %v6922_v7 = vld [vmem:[#allocation12_spill] sm:$0xff]  ;;  %v6924_v24 = vld [vmem:[#allocation13_spill] sm:$0xff] }
 0x1b5   : > { %6921 = vst [vmem:[#allocation84_spill] sm:$0xff] %v5343_v48  ;;  %v1021_v61 = vmul.f32 %v6807_v11, %v6914_v50  ;;  %v6524_v21 = vrot.slane %v5329_v29, 1  ;;  %v1350_v22 = vmul.f32 %v6920_v34, %v957_v62  ;;  %v1587_v0 = vmul.f32 %v6922_v7, %v6914_v50 }
 0x1b6   : > { %v2389_v20 = vsel %vm1174_vm6, %v2383_v16, %v2388_v37  ;;  %v2637_v44 = vsel %vm1423_vm8, %v2631_v28, %v2636_v58  ;;  %v1213_v57 = vrot.slane %v1101_v36, 1  ;;  %v6526_v52 = vrot.slane %v5343_v48, 2  ;;  %v6926_v16 = vld [vmem:[#allocation14_spill] sm:$0xff] }
 0x1b7   : > { %v2454_v55 = vadd.f32 %v2389_v20, %v5242_v56  ;;  %v1462_v30 = vrot.slane %v1350_v22, 2  ;;  %v1619_v10 = vadd.f32 %v1587_v0, %v6923_v9  ;;  %v5362_v43 = vmul.f32 %v6924_v24, %v6914_v50 }
 0x1b8   : > { %v1214_v17 = vsel %vm1174_vm6, %v6524_v21, %v1213_v57  ;;  %v1665_v59 = vmul.f32 %v6924_v24, %v957_v62  ;;  %v5370_v28 = vmul.f32 %v6926_v16, %v6914_v50  ;;  %v1913_v37 = vmul.f32 %v6926_v16, %v957_v62 }
 0x1b9   : > { %6925 = vst [vmem:[#allocation67_spill] sm:$0xff] %v5362_v43  ;;  %v5373_v56 = vadd.f32 %v2637_v44, %v2454_v55  ;;  %v1302_v58 = vadd.f32 %v1214_v17, %v1021_v61  ;;  %v1463_v36 = vsel %vm1423_vm8, %v6526_v52, %v1462_v30  ;;  %v6528_v22 = vrot.slane %v5362_v43, 1  ;;  %v6932_v17 = vld [vmem:[#allocation110_spill] sm:$0xff] }
 0x1ba   : > { %6927 = vst [vmem:[#allocation80_spill] sm:$0xff] %v5370_v28  ;;  %v1772_v0 = vrot.slane %v1665_v59, 1  ;;  %v6529_v20 = vrot.slane %v5370_v28, 2  ;;  %v2020_v57 = vrot.slane %v1913_v37, 2  ;;  %v2151_v9 = vmul.f32 %v6764_v18, %v6914_v50 }
 0x1bb   : > { %6928 = vst [vmem:[#allocation82_spill] sm:$0xff] %v5373_v56  ;;  %v5383_v1 = vadd.f32 %v1463_v36, %v1302_v58  ;;  %v5387_v61 = vmul.f32 %v3700_v6, %v6914_v50  ;;  %v2227_v44 = vmul.f32 %v3700_v6, %v957_v62  ;;  %v5401_v37 = vmul.f32 %v5226_v12, %v6914_v50 }
 0x1bc   : > { %v1773_v55 = vsel %vm1174_vm6, %v6528_v22, %v1772_v0  ;;  %v5396_v30 = vsel %vm1423_vm8, %v6529_v20, %v2020_v57  ;;  %v2183_v59 = vadd.f32 %v2151_v9, %v6932_v17  ;;  %v2475_v21 = vmul.f32 %v5226_v12, %v957_v62  ;;  %v6936_v57 = vld [vmem:[#allocation85_spill] sm:$0xff]  ;;  %v6941_v22 = vld [vmem:[#allocation19_spill] sm:$0xff] }
 0x1bd   : > { %6930 = vst [vmem:[#allocation39_spill] sm:$0xff] %v5387_v61  ;;  %6931 = vst [vmem:[#allocation69_spill] sm:$0xff] %v5396_v30  ;;  %v5403_v58 = vadd.f32 %v1773_v55, %v1619_v10  ;;  %v6530_v36 = vrot.slane %v5387_v61, 1  ;;  %v2330_v52 = vrot.slane %v2227_v44, 1  ;;  %v656_v20 = vadd.f32 %v6936_v57, %v3625_v32  ;;  %v6938_v55 = vld [vmem:[#allocation91_spill] sm:$0xff]  ;;  %v6939_v44 = vld [vmem:[#allocation93_spill] sm:$0xff] }
 0x1be   : > { %6933 = vst [vmem:[#allocation29_spill] sm:$0xff] %v5401_v37  ;;  %v768_v9 = vadd.s32 4, %v6937_v13  ;;  %v2578_v10 = vrot.slane %v2475_v21, 2  ;;  %v660_v17 = vadd.f32 %v6938_v55, %v3625_v32  ;;  %v662_v62 = vadd.f32 %v6939_v44, %v3628_v33  ;;  %v6947_v44 = vld [vmem:[#allocation90_spill] sm:$0xff] }
 0x1bf   : > { %6934 = vst [vmem:[#allocation101_spill] sm:$0xff] %v5403_v58  ;;  %v2331_v50 = vsel %vm1174_vm6, %v6530_v36, %v2330_v52  ;;  %v5421_v57 = vadd.f32 %v6941_v22, %v2676_v39  ;;  %v5424_v26 = vadd.f32 %v6941_v22, %v2678_v47  ;;  %v6944_v52 = vrot.slane %v5401_v37, 2  ;;  %v6954_v36 = vld [vmem:[#allocation99_spill] sm:$0xff] }
 0x1c0   : > { %v2431_v56 = vadd.f32 %v2331_v50, %v2183_v59  ;;  %vm782_vm13 = vcmp.ge.s32.totalorder %v768_v9, 0  ;;  %vm792_vm14 = vcmp.lt.s32.totalorder %v768_v9, 16  ;;  %v658_v0 = vadd.f32 %v6947_v44, %v3628_v33  ;;  %v6952_v50 = vld [vmem:[#allocation34_spill] sm:$0xff] }
 0x1c1   : > { %6942 = vst [vmem:[#allocation32_spill] sm:$0xff] %v5421_v57  ;;  %6943 = vst [vmem:[#allocation70_spill] sm:$0xff] %v5424_v26  ;;  %v2579_v21 = vsel %vm1423_vm8, %v6944_v52, %v2578_v10  ;;  %v666_v10 = vadd.f32 %v6952_v50, %v3625_v32  ;;  %v6953_v52 = vld [vmem:[#allocation35_spill] sm:$0xff]  ;;  %v5463_v27 = vadd.f32 %v6954_v36, %v3628_v33  ;;  %v5495_v58 = vadd.s32 5, %v6937_v13 }
 0x1c2   : > { %vm5429_vm15 = vmand %vm782_vm13, %vm792_vm14  ;;  %v5435_v59 = vadd.f32 %v2579_v21, %v2431_v56  ;;  %v5453_v44 = vadd.f32 %v6953_v52, %v3628_v33 }
 0x1c3   : > { %vm5441_vm0 = vmand %vm5429_vm15, %vm808_vm5  ;;  %v5447_v47 = vsel %vm5429_vm15, %v660_v17, 0.0  ;;  %v5459_v21 = vsel %vm5429_vm15, %v662_v62, 0.0  ;;  %v6955_v17 = vld [vmem:[#allocation102_spill] sm:$0xff]  ;;  %vm783_vm3 = vcmp.ge.s32.totalorder %v5495_v58, 0  ;;  %vm793_vm4 = vcmp.lt.s32.totalorder %v5495_v58, 16 }
 0x1c4   : > { %6948 = vst [vmem:[#allocation104_spill] sm:$0xff] %v5435_v59  ;;  %v958_v56 = vsel %vm5441_vm0, %v656_v20, 0.0  ;;  %v5467_v51 = vadd.f32 %v6955_v17, %v3625_v32  ;;  %v1104_v20 = vmul.f32 %v3648_v41, %v5447_v47  ;;  %v5484_v28 = vsel %vm5441_vm0, %v658_v0, 0.0  ;;  %vm5490_vm2 = vmand %vm5429_vm15, %vm843_vm9 }
 0x1c5   : > { %v1102_v50 = vmul.f32 %v3648_v41, %v958_v56  ;;  %v1351_v52 = vmul.f32 %v6786_v2, %v958_v56  ;;  %v1588_v48 = vmul.f32 %v6720_v31, %v958_v56  ;;  %v1666_v62 = vmul.f32 %v3677_v53, %v958_v56  ;;  %vm5641_vm7 = vmand %vm783_vm3, %vm793_vm4 }
 0x1c6   : > { %v1914_v23 = vmul.f32 %v3679_v54, %v958_v56  ;;  %v2152_v36 = vmul.f32 %v6691_v3, %v958_v56  ;;  %v2228_v29 = vmul.f32 %v3696_v4, %v958_v56  ;;  %v5480_v59 = vmul.f32 %v5019_v46, %v958_v56  ;;  %vm826_vm10 = vmand %vm5641_vm7, %vm808_vm5 }
 0x1c7   : > { %v1620_v17 = vadd.f32 %v1588_v48, %v5278_v14  ;;  %v1022_v14 = vmul.f32 %v6728_v19, %v958_v56  ;;  %v1215_v48 = vrot.slane %v1102_v50, 1  ;;  %v1024_v0 = vmul.f32 %v6728_v19, %v5447_v47  ;;  %vm5762_vm5 = vmand %vm5641_vm7, %vm843_vm9 }
 0x1c8   : > { %6956 = vst [vmem:[#allocation62_spill] sm:$0xff] %v5480_v59  ;;  %v5499_v49 = vadd.f32 %v2152_v36, %v5300_v25  ;;  %v1464_v39 = vrot.slane %v1351_v52, 2  ;;  %v1774_v43 = vrot.slane %v1666_v62, 1  ;;  %v2022_v26 = vrot.slane %v1914_v23, 2 }
 0x1c9   : > { %v2332_v55 = vrot.slane %v2228_v29, 1  ;;  %v962_v8 = vsel %vm5490_vm2, %v666_v10, 0.0  ;;  %v1216_v13 = vrot.slane %v1104_v20, 1  ;;  %v1353_v56 = vmul.f32 %v6786_v2, %v5447_v47 }
 0x1ca   : > { %6959 = vst [vmem:[#allocation61_spill] sm:$0xff] %v5499_v49  ;;  %v5510_v25 = vmul.f32 %v6807_v11, %v5484_v28  ;;  %v5514_v50 = vmul.f32 %v6915_v60, %v5484_v28  ;;  %v1106_v23 = vmul.f32 %v3648_v41, %v962_v8  ;;  %v1355_v29 = vmul.f32 %v6786_v2, %v962_v8 }
 0x1cb   : > { %v5520_v52 = vmul.f32 %v6920_v34, %v5484_v28  ;;  %v1217_v10 = vsel %vm1174_vm6, %v1215_v48, %v1216_v13  ;;  %v1465_v20 = vrot.slane %v1353_v56, 2  ;;  %v1590_v62 = vmul.f32 %v6720_v31, %v5447_v47 }
 0x1cc   : > { %6960 = vst [vmem:[#allocation76_spill] sm:$0xff] %v5510_v25  ;;  %6961 = vst [vmem:[#allocation16_spill] sm:$0xff] %v5514_v50  ;;  %v1221_v36 = vrot.slane %v1106_v23, 1  ;;  %v1303_v57 = vadd.f32 %v1217_v10, %v1022_v14  ;;  %v1470_v25 = vrot.slane %v1355_v29, 2  ;;  %v1668_v59 = vmul.f32 %v3677_v53, %v5447_v47 }
 0x1cd   : > { %6962 = vst [vmem:[#allocation77_spill] sm:$0xff] %v5520_v52  ;;  %v1466_v49 = vsel %vm1423_vm8, %v1464_v39, %v1465_v20  ;;  %v1622_v37 = vadd.f32 %v1590_v62, %v5282_v40  ;;  %v1670_v63 = vmul.f32 %v3677_v53, %v962_v8  ;;  %v1916_v61 = vmul.f32 %v3679_v54, %v5447_v47 }
 0x1ce   : > { %v1222_v48 = vsel %vm1174_vm6, %v1216_v13, %v1221_v36  ;;  %v1471_v56 = vsel %vm1423_vm8, %v1465_v20, %v1470_v25  ;;  %v5534_v35 = vadd.f32 %v1466_v49, %v1303_v57  ;;  %v1775_v14 = vrot.slane %v1668_v59, 1 }
 0x1cf   : > { %v1305_v23 = vadd.f32 %v1222_v48, %v1024_v0  ;;  %v1780_v29 = vrot.slane %v1670_v63, 1  ;;  %v1918_v10 = vmul.f32 %v3679_v54, %v962_v8  ;;  %v2023_v19 = vrot.slane %v1916_v61, 2 }
 0x1d0   : > { %v1776_v39 = vsel %vm1174_vm6, %v1774_v43, %v1775_v14  ;;  %v2154_v40 = vmul.f32 %v6691_v3, %v5447_v47  ;;  %v2230_v62 = vmul.f32 %v3696_v4, %v5447_v47  ;;  %v2232_v13 = vmul.f32 %v3696_v4, %v962_v8 }
 0x1d1   : > { %v5543_v36 = vadd.f32 %v1471_v56, %v1305_v23  ;;  %v1781_v49 = vsel %vm1174_vm6, %v1775_v14, %v1780_v29  ;;  %v1868_v57 = vadd.f32 %v1776_v39, %v1620_v17  ;;  %v2024_v63 = vsel %vm1423_vm8, %v2022_v26, %v2023_v19 }
 0x1d2   : > { %v1870_v59 = vadd.f32 %v1781_v49, %v1622_v37  ;;  %v2028_v0 = vrot.slane %v1918_v10, 2  ;;  %v2186_v61 = vadd.f32 %v2154_v40, %v5313_v15  ;;  %v2333_v43 = vrot.slane %v2230_v62, 1 }
 0x1d3   : > { %v5548_v25 = vadd.f32 %v2024_v63, %v1868_v57  ;;  %v2338_v20 = vrot.slane %v2232_v13, 1  ;;  %v5552_v48 = vmul.f32 %v5019_v46, %v5447_v47  ;;  %v2480_v56 = vmul.f32 %v5019_v46, %v962_v8 }
 0x1d4   : > { %v5557_v14 = vmul.f32 %v6924_v24, %v5484_v28  ;;  %v2029_v26 = vsel %vm1423_vm8, %v2023_v19, %v2028_v0  ;;  %v5561_v37 = vsel %vm1174_vm6, %v2332_v55, %v2333_v43  ;;  %v963_v15 = vsel %vm5490_vm2, %v5453_v44, 0.0 }
 0x1d5   : > { %v5566_v17 = vadd.f32 %v2029_v26, %v1870_v59  ;;  %v2339_v47 = vsel %vm1174_vm6, %v2333_v43, %v2338_v20  ;;  %v6547_v23 = vrot.slane %v5552_v48, 2  ;;  %v2586_v8 = vrot.slane %v2480_v56, 2 }
 0x1d6   : > { %6963 = vst [vmem:[#allocation66_spill] sm:$0xff] %v5557_v14  ;;  %v2434_v29 = vadd.f32 %v2339_v47, %v2186_v61  ;;  %v5572_v10 = vmul.f32 %v6915_v60, %v5459_v21  ;;  %v1107_v19 = vmul.f32 %v6915_v60, %v963_v15  ;;  %v5577_v55 = vmul.f32 %v6920_v34, %v5459_v21 }
 0x1d7   : > { %v2587_v30 = vsel %vm1423_vm8, %v6547_v23, %v2586_v8  ;;  %v1356_v44 = vmul.f32 %v6920_v34, %v963_v15  ;;  %v1591_v39 = vmul.f32 %v6922_v7, %v5459_v21  ;;  %v5587_v40 = vmul.f32 %v6924_v24, %v5459_v21 }
 0x1d8   : > { %6964 = vst [vmem:[#allocation9_spill] sm:$0xff] %v5572_v10  ;;  %6965 = vst [vmem:[#allocation111_spill] sm:$0xff] %v5577_v55  ;;  %v2682_v62 = vadd.f32 %v2587_v30, %v2434_v29  ;;  %v1025_v13 = vmul.f32 %v6807_v11, %v5459_v21  ;;  %v6544_v49 = vrot.slane %v5572_v10, 1  ;;  %v1223_v57 = vrot.slane %v1107_v19, 1  ;;  %v6990_v10 = vld [vmem:[#allocation23_spill] sm:$0xff] }
 0x1d9   : > { %6966 = vst [vmem:[#allocation10_spill] sm:$0xff] %v5587_v40  ;;  %v6543_v63 = vrot.slane %v5577_v55, 2  ;;  %v1472_v59 = vrot.slane %v1356_v44, 2  ;;  %v1623_v0 = vadd.f32 %v1591_v39, %v5383_v1  ;;  %v1671_v61 = vmul.f32 %v6924_v24, %v963_v15 }
 0x1da   : > { %v1224_v20 = vsel %vm1174_vm6, %v6544_v49, %v1223_v57  ;;  %v5601_v56 = vmul.f32 %v6926_v16, %v5459_v21  ;;  %v1919_v26 = vmul.f32 %v6926_v16, %v963_v15  ;;  %v6546_v1 = vrot.slane %v5587_v40, 1 }
 0x1db   : > { %v1306_v47 = vadd.f32 %v1224_v20, %v1025_v13  ;;  %v1473_v8 = vsel %vm1423_vm8, %v6543_v63, %v1472_v59  ;;  %v1782_v29 = vrot.slane %v1671_v61, 1  ;;  %v5610_v44 = vmul.f32 %v3700_v6, %v963_v15 }
 0x1dc   : > { %6967 = vst [vmem:[#allocation12_spill] sm:$0xff] %v5601_v56  ;;  %v6545_v19 = vrot.slane %v5601_v56, 2  ;;  %v2030_v30 = vrot.slane %v1919_v26, 2  ;;  %v993_v39 = vsel %vm5309_vm12, %v5463_v27, 0.0  ;;  %v5621_v59 = vmul.f32 %v5226_v12, %v963_v15  ;;  %v6971_v15 = vld [vmem:[#allocation103_spill] sm:$0xff] }
 0x1dd   : > { %v5615_v57 = vadd.f32 %v1473_v8, %v1306_v47  ;;  %v1783_v13 = vsel %vm1174_vm6, %v6546_v1, %v1782_v29  ;;  %v2263_v61 = vmul.f32 %v3700_v6, %v993_v39  ;;  %v2511_v27 = vmul.f32 %v5226_v12, %v993_v39  ;;  %v6976_v39 = vld [vmem:[#allocation44_spill] sm:$0xff]  ;;  %v6984_v1 = vld [vmem:[#allocation18_spill] sm:$0xff] }
 0x1de   : > { %6968 = vst [vmem:[#allocation106_spill] sm:$0xff] %v5621_v59  ;;  %v5625_v26 = vadd.f32 %v1783_v13, %v1623_v0  ;;  %v5630_v42 = vsel %vm1423_vm8, %v6545_v19, %v2030_v30  ;;  %v676_v8 = vadd.f32 %v6971_v15, %v3628_v33  ;;  %v5639_v0 = vadd.f32 %v6941_v22, %v2682_v62  ;;  %v6975_v30 = vld [vmem:[#allocation45_spill] sm:$0xff]  ;;  %v6978_v62 = vld [vmem:[#allocation47_spill] sm:$0xff]  ;;  %v6997_v59 = vld [vmem:[#allocation52_spill] sm:$0xff] }
 0x1df   : > { %6970 = vst [vmem:[#allocation14_spill] sm:$0xff] %v5630_v42  ;;  %v2390_v47 = vrot.slane %v2263_v61, 1  ;;  %v2638_v13 = vrot.slane %v2511_v27, 2  ;;  %v2105_v61 = vadd.f32 %v6976_v39, %v6975_v30  ;;  %v6977_v43 = vrot.slane %v5221_v45, 1  ;;  %v6980_v45 = vld [vmem:[#allocation7_spill] sm:$0xff] }
 0x1e0   : > { %6969 = vst [vmem:[#allocation13_spill] sm:$0xff] %v5625_v26  ;;  %6972 = vst [vmem:[#allocation110_spill] sm:$0xff] %v5639_v0  ;;  %v678_v27 = vadd.f32 %v6978_v62, %v3625_v32  ;;  %v6979_v30 = vrot.slane %v5229_v38, 2  ;;  %v964_v19 = vsel %vm826_vm10, %v5467_v51, 0.0  ;;  %v680_v29 = vadd.f32 %v6980_v45, %v3628_v33  ;;  %v6983_v45 = vld [vmem:[#allocation92_spill] sm:$0xff] }
 0x1e1   : > { %v2391_v15 = vsel %vm1174_vm6, %v6977_v43, %v2390_v47  ;;  %v5666_v43 = vmul.f32 %v3648_v41, %v964_v19  ;;  %v5669_v9 = vmul.f32 %v6786_v2, %v964_v19  ;;  %v1592_v47 = vmul.f32 %v6720_v31, %v964_v19 }
 0x1e2   : > { %v2455_v49 = vadd.f32 %v2391_v15, %v5268_v5  ;;  %v2639_v39 = vsel %vm1423_vm8, %v6979_v30, %v2638_v13  ;;  %v5672_v62 = vsel %vm826_vm10, %v676_v8, 0.0  ;;  %v5677_v38 = vmul.f32 %v3677_v53, %v964_v19 }
 0x1e3   : > { %6981 = vst [vmem:[#allocation85_spill] sm:$0xff] %v5672_v62  ;;  %v5680_v51 = vmul.f32 %v3679_v54, %v964_v19  ;;  %v2156_v13 = vmul.f32 %v6691_v3, %v964_v19  ;;  %v5684_v15 = vadd.f32 %v1592_v47, %v5534_v35  ;;  %v5687_v30 = vmul.f32 %v3696_v4, %v964_v19 }
 0x1e4   : > { %v5674_v5 = vadd.f32 %v2639_v39, %v2455_v49  ;;  %v2145_v8 = vmul.f32 %v6764_v18, %v6983_v45  ;;  %v2147_v49 = vmul.f32 %v6764_v18, %v6984_v1  ;;  %v6985_v39 = vld [vmem:[#allocation6_spill] sm:$0xff]  ;;  %v5700_v63 = vmul.f32 %v5019_v46, %v964_v19 }
 0x1e5   : > { %v5694_v58 = vmul.f32 %v6985_v39, %v964_v19  ;;  %v5697_v23 = vadd.f32 %v2156_v13, %v5548_v25  ;;  %v2217_v35 = vmul.f32 %v3700_v6, %v6983_v45  ;;  %v1225_v47 = vrot.slane %v5666_v43, 1  ;;  %v6992_v43 = vld [vmem:[#allocation30_spill] sm:$0xff] }
 0x1e6   : > { %6982 = vst [vmem:[#allocation4_spill] sm:$0xff] %v5674_v5  ;;  %6987 = vst [vmem:[#allocation93_spill] sm:$0xff] %v5700_v63  ;;  %v5709_v55 = vmul.f32 %v6915_v60, %v5672_v62  ;;  %v5715_v19 = vmul.f32 %v6807_v11, %v5672_v62  ;;  %v5719_v13 = vmul.f32 %v6920_v34, %v5672_v62  ;;  %v5729_v25 = vsel %vm5641_vm7, %v678_v27, 0.0  ;;  %v6993_v27 = vld [vmem:[#allocation78_spill] sm:$0xff] }
 0x1e7   : > { %6986 = vst [vmem:[#allocation91_spill] sm:$0xff] %v5697_v23  ;;  %v5724_v52 = vmul.f32 %v6924_v24, %v5672_v62  ;;  %v2177_v5 = vadd.f32 %v2145_v8, %v2105_v61  ;;  %v2179_v56 = vadd.f32 %v2147_v49, %v6990_v10  ;;  %v5733_v50 = vsel %vm5641_vm7, %v680_v29, 0.0  ;;  %v6991_v23 = vld [vmem:[#allocation36_spill] sm:$0xff]  ;;  %v6995_v49 = vld [vmem:[#allocation94_spill] sm:$0xff]  ;;  %v6998_v62 = vld [vmem:[#allocation3_spill] sm:$0xff] }
 0x1e8   : > { %6988 = vst [vmem:[#allocation19_spill] sm:$0xff] %v5709_v55  ;;  %6989 = vst [vmem:[#allocation90_spill] sm:$0xff] %v5715_v19  ;;  %v2219_v19 = vmul.f32 %v3700_v6, %v6984_v1  ;;  %v2424_v63 = vadd.f32 %v6992_v43, %v6991_v23  ;;  %v2465_v61 = vmul.f32 %v5226_v12, %v6983_v45  ;;  %v6994_v8 = vrot.slane %v6993_v27, 2  ;;  %v3414_v45 = vld [vmem:[%s6402_s4] sm:$0x3] }
 0x1e9   : > { %v2467_v10 = vmul.f32 %v5226_v12, %v6984_v1  ;;  %v6996_v42 = vrot.slane %v6995_v49, 2  ;;  %v2315_v26 = vrot.slane %v2217_v35, 1  ;;  %v2765_v0 = vmul.f32 0.044715, %v6997_v59  ;;  %v6999_v1 = vld [vmem:[#allocation116_spill] sm:$0xff] }
 0x1ea   : > { %v2316_v14 = vrot.slane %v2219_v19, 1  ;;  %v2563_v23 = vrot.slane %v2465_v61, 2  ;;  %v5754_v55 = vrot.slane %v3414_v45, %v6998_v62  ;;  %v684_v27 = vadd.f32 %v6999_v1, %v3625_v32  ;;  %v7003_v35 = vld [vmem:[#allocation108_spill] sm:$0xff]  ;;  %v7005_v45 = vld [vmem:[#allocation109_spill] sm:$0xff] }
 0x1eb   : > { %v2562_v29 = vsel %vm1423_vm8, %v6996_v42, %v6994_v8  ;;  %v2564_v43 = vrot.slane %v2467_v10, 2  ;;  %v7004_v19 = vrot.slane %v7003_v35, 1  ;;  %v2781_v10 = vmul.f32 %v2765_v0, %v6997_v59 }
 0x1ec   : > { %v2672_v40 = vadd.f32 %v2562_v29, %v2424_v63  ;;  %v2317_v42 = vsel %vm1174_vm6, %v2315_v26, %v2316_v14  ;;  %v7006_v20 = vrot.slane %v7005_v45, 2  ;;  %v5777_v49 = vmul.f32 0.5, %v6997_v59 }
 0x1ed   : > { %v2321_v61 = vsel %vm1174_vm6, %v2316_v14, %v7004_v19  ;;  %v2425_v8 = vadd.f32 %v2317_v42, %v2177_v5  ;;  %v2565_v29 = vsel %vm1423_vm8, %v2563_v23, %v2564_v43  ;;  %v2797_v35 = vmul.f32 %v2781_v10, %v6997_v59 }
 0x1ee   : > { %v2716_v62 = vadd.f32 %v6941_v22, %v2672_v40  ;;  %v2427_v32 = vadd.f32 %v2321_v61, %v2179_v56  ;;  %v2569_v1 = vsel %vm1423_vm8, %v2564_v43, %v7006_v20  ;;  %v968_v14 = vsel %vm5762_vm5, %v684_v27, 0.0 }
 0x1ef   : > { %v5782_v40 = vadd.f32 %v2565_v29, %v2425_v8  ;;  %v1110_v56 = vmul.f32 %v3648_v41, %v5729_v25  ;;  %v1112_v5 = vmul.f32 %v3648_v41, %v968_v14  ;;  %v2813_v43 = vadd.f32 %v2797_v35, %v6997_v59 }
 0x1f0   : > { %v2764_v26 = vmul.f32 0.044715, %v2716_v62  ;;  %v2675_v0 = vadd.f32 %v2569_v1, %v2427_v32  ;;  %v1359_v42 = vmul.f32 %v6786_v2, %v5729_v25  ;;  %v1361_v19 = vmul.f32 %v6786_v2, %v968_v14 }
 0x1f1   : > { %v5791_v61 = vmul.f32 0.5, %v2716_v62  ;;  %v1028_v27 = vmul.f32 %v6985_v39, %v5729_v25  ;;  %v1226_v10 = vrot.slane %v1110_v56, 1  ;;  %v1231_v8 = vrot.slane %v1112_v5, 1 }
 0x1f2   : > { %v2780_v23 = vmul.f32 %v2764_v26, %v2716_v62  ;;  %v2829_v29 = vmul.f32 0.7978846, %v2813_v43  ;;  %v1475_v45 = vrot.slane %v1359_v42, 2  ;;  %v1480_v20 = vrot.slane %v1361_v19, 2  ;;  %v7007_v26 = vld [vmem:[#allocation43_spill] sm:$0xff] }
 0x1f3   : > { %v1227_v41 = vsel %vm1174_vm6, %v1225_v47, %v1226_v10  ;;  %v1232_v59 = vsel %vm1174_vm6, %v1226_v10, %v1231_v8  ;;  %v1594_v1 = vmul.f32 %v6720_v31, %v5729_v25  ;;  %v1598_v2 = vmul.f32 %v6720_v31, %v7007_v26 }
 0x1f4   : > { %v2796_v32 = vmul.f32 %v2780_v23, %v2716_v62  ;;  %3380 = vtanh.f32 %v2829_v29  ;;  %v1307_v39 = vadd.f32 %v1227_v41, %v5694_v58  ;;  %v1309_v56 = vadd.f32 %v1232_v59, %v1028_v27 }
 0x1f5   : > { %v7008_v5 = vrot.slane %v5669_v9, 2  ;;  %v1481_v43 = vsel %vm1423_vm8, %v1475_v45, %v1480_v20  ;;  %v1626_v47 = vadd.f32 %v1594_v1, %v5543_v36  ;;  %v1674_v42 = vmul.f32 %v3677_v53, %v5729_v25 }
 0x1f6   : > { %v2812_v35 = vadd.f32 %v2796_v32, %v2716_v62  ;;  %v1558_v8 = vadd.f32 %v1481_v43, %v1309_v56  ;;  %v1676_v31 = vmul.f32 %v3677_v53, %v968_v14  ;;  %v1922_v58 = vmul.f32 %v3679_v54, %v5729_v25  ;;  %v7009_v32 = vld [vmem:[#allocation26_spill] sm:$0xff] }
 0x1f7   : > { %v1476_v23 = vsel %vm1423_vm8, %v7008_v5, %v1475_v45  ;;  %v1785_v62 = vrot.slane %v1674_v42, 1  ;;  %v1924_v9 = vmul.f32 %v3679_v54, %v968_v14  ;;  %v2158_v27 = vmul.f32 %v6691_v3, %v5729_v25  ;;  %v7012_v5 = vld [vmem:[#allocation56_spill] sm:$0xff] }
 0x1f8   : > { %v2828_v19 = vmul.f32 0.7978846, %v2812_v35  ;;  %v1556_v10 = vadd.f32 %v1476_v23, %v1307_v39  ;;  %v1630_v29 = vadd.f32 %v1598_v2, %v1558_v8  ;;  %v1790_v45 = vrot.slane %v1676_v31, 1  ;;  %v7011_v39 = vld [vmem:[#allocation53_spill] sm:$0xff] }
 0x1f9   : > { %v7010_v20 = vrot.slane %v5677_v38, 1  ;;  %v2033_v59 = vrot.slane %v1922_v58, 2  ;;  %v2038_v53 = vrot.slane %v1924_v9, 2  ;;  %v2162_v1 = vmul.f32 %v6691_v3, %v7007_v26  ;;  %v7014_v3 = vld [vmem:[#allocation57_spill] sm:$0xff] }
 0x1fa   : > { %3382 = vtanh.f32 %v2828_v19  ;;  %v1628_v36 = vadd.f32 %v7009_v32, %v1556_v10  ;;  %v1791_v35 = vsel %vm1174_vm6, %v1785_v62, %v1790_v45  ;;  %v1878_v23 = vadd.f32 %v7012_v5, %v1630_v29 }
 0x1fb   : > { %v1786_v41 = vsel %vm1174_vm6, %v7010_v20, %v1785_v62  ;;  %v1874_v2 = vadd.f32 %v1791_v35, %v1626_v47  ;;  %v7013_v43 = vrot.slane %v5680_v51, 2  ;;  %v2039_v42 = vsel %vm1423_vm8, %v2033_v59, %v2038_v53  ;;  %v7015_v62 = vld [vmem:[#allocation120_spill] sm:$0xff] }
 0x1fc   : > { %v1872_v54 = vadd.f32 %v1786_v41, %v5684_v15  ;;  %v5824_v56 = vadd.f32 %v7011_v39, %v1628_v36  ;;  %v2190_v19 = vadd.f32 %v2158_v27, %v5566_v17  ;;  %v2126_v26 = vadd.f32 %v7014_v3, %v1878_v23  ;;  %v7016_v27 = vld [vmem:[#allocation87_spill] sm:$0xff] }
 0x1fd   : > { %v2034_v38 = vsel %vm1423_vm8, %v7013_v43, %v2033_v59  ;;  %v2236_v15 = vmul.f32 %v3696_v4, %v5729_v25  ;;  %v2238_v8 = vmul.f32 %v3696_v4, %v968_v14  ;;  %v2122_v31 = vadd.f32 %v2039_v42, %v1874_v2 }
 0x1fe   : > { %v5832_v10 = vadd.f32 %v2034_v38, %v1872_v54  ;;  %v5840_v47 = vmul.f32 %v5019_v46, %v5729_v25  ;;  %v2486_v51 = vmul.f32 %v5019_v46, %v968_v14  ;;  %v686_v58 = vadd.f32 %v7015_v62, %v3628_v33  ;;  %v3381_v17 = vpop.eup %3380  ;;  %v7019_v38 = vld [vmem:[#allocation68_spill] sm:$0xff] }
 0x1ff   : > { %v2719_v9 = vadd.f32 %v5754_v55, %v2675_v0  ;;  %v5847_v32 = vadd.f32 %v7016_v27, %v2126_v26  ;;  %v2343_v36 = vrot.slane %v2236_v15, 1  ;;  %v2348_v29 = vrot.slane %v2238_v8, 1  ;;  %v7020_v27 = vld [vmem:[#allocation46_spill] sm:$0xff] }
 0x200   : > { %v2861_v45 = vadd.f32 1.0, %v3381_v17  ;;  %v2194_v4 = vadd.f32 %v2162_v1, %v2122_v31  ;;  %v2591_v20 = vrot.slane %v5840_v47, 2  ;;  %v2596_v41 = vrot.slane %v2486_v51, 2  ;;  %v7018_v1 = vld [vmem:[#allocation59_spill] sm:$0xff] }
 0x201   : > { %v7017_v25 = vrot.slane %v5687_v30, 1  ;;  %v2349_v33 = vsel %vm1174_vm6, %v2343_v36, %v2348_v29  ;;  %v969_v14 = vsel %vm5762_vm5, %v686_v58, 0.0  ;;  %v5860_v0 = vmul.f32 %v6915_v60, %v5733_v50 }
 0x202   : > { %v2877_v59 = vmul.f32 %v2861_v45, %v5777_v49  ;;  %v2438_v53 = vadd.f32 %v2349_v33, %v2190_v19  ;;  %v2442_v35 = vadd.f32 %v7018_v1, %v2194_v4  ;;  %v2597_v30 = vsel %vm1423_vm8, %v2591_v20, %v2596_v41  ;;  %v7022_v33 = vld [vmem:[#allocation96_spill] sm:$0xff] }
 0x203   : > { %v5853_v46 = vsel %vm1174_vm6, %v7017_v25, %v2343_v36  ;;  %v1113_v39 = vmul.f32 %v6915_v60, %v969_v14  ;;  %v6562_v5 = vrot.slane %v5860_v0, 1  ;;  %v5871_v63 = vmul.f32 %v6920_v34, %v5733_v50  ;;  %v7021_v25 = vld [vmem:[#allocation48_spill] sm:$0xff] }
 0x204   : > { %v3383_v54 = vpop.eup %3382  ;;  %v1362_v23 = vmul.f32 %v6920_v34, %v969_v14  ;;  %v2893_v49 = vmul.f32 %v2877_v59, %v2719_v9  ;;  %v2686_v43 = vadd.f32 %v2597_v30, %v2438_v53  ;;  %v5875_v42 = vadd.f32 %v7019_v38, %v2442_v35 }
 0x205   : > { %v2860_v2 = vadd.f32 1.0, %v3383_v54  ;;  %v1233_v19 = vrot.slane %v1113_v39, 1  ;;  %v6561_v3 = vrot.slane %v5871_v63, 2  ;;  %v1595_v60 = vmul.f32 %v6922_v7, %v5733_v50 }
 0x206   : > { %v1482_v26 = vrot.slane %v1362_v23, 2  ;;  %v2717_v15 = vadd.f32 %v5754_v55, %v5782_v40  ;;  %v1029_v34 = vmul.f32 %v6807_v11, %v5733_v50  ;;  %v5887_v31 = vmul.f32 %v6924_v24, %v5733_v50  ;;  %v7023_v23 = vld [vmem:[#allocation8_spill] sm:$0xff] }
 0x207   : > { %v2876_v8 = vmul.f32 %v2860_v2, %v5791_v61  ;;  %v1234_v51 = vsel %vm1174_vm6, %v6562_v5, %v1233_v19  ;;  %v1627_v58 = vadd.f32 %v1595_v60, %v5615_v57  ;;  %v1677_v40 = vmul.f32 %v6924_v24, %v969_v14 }
 0x208   : > { %v1483_v62 = vsel %vm1423_vm8, %v6561_v3, %v1482_v26  ;;  %v1310_v11 = vadd.f32 %v1234_v51, %v1029_v34  ;;  %v5900_v9 = vmul.f32 %v6926_v16, %v5733_v50  ;;  %v1599_v36 = vmul.f32 %v6922_v7, %v7020_v27  ;;  %v7027_v26 = vld [vmem:[#allocation39_spill] sm:$0xff] }
 0x209   : > { %v2892_v17 = vmul.f32 %v2876_v8, %v2717_v15  ;;  %v1788_v29 = vrot.slane %v5887_v31, 1  ;;  %v1792_v45 = vrot.slane %v1677_v40, 1  ;;  %v1925_v4 = vmul.f32 %v6926_v16, %v969_v14  ;;  %v7029_v15 = vld [vmem:[#allocation119_spill] sm:$0xff]  ;;  %v7031_v40 = vld [vmem:[#allocation29_spill] sm:$0xff] }
 0x20a   : > { %v1559_v57 = vadd.f32 %v1483_v62, %v1310_v11  ;;  %v5907_v24 = vmul.f32 %v3700_v6, %v969_v14  ;;  %v1861_v59 = vadd.f32 %v7022_v33, %v7021_v25  ;;  %v6563_v35 = vrot.slane %v5900_v9, 2  ;;  %v7033_v11 = vld [vmem:[#allocation15_spill] sm:$0xff]  ;;  %v7036_v33 = vld [vmem:[#allocation70_spill] sm:$0xff] }
 0x20b   : > { %v2908_v41 = vpack.c.bf16 %v2893_v49, %v2892_v17  ;;  %v1793_v1 = vsel %vm1174_vm6, %v1788_v29, %v1792_v45  ;;  %v2040_v30 = vrot.slane %v1925_v4, 2  ;;  %v7024_v2 = vrot.slane %v7023_v23, 2  ;;  %v7025_v49 = vld [vmem:[#allocation24_spill] sm:$0xff] }
 0x20c   : > { %v5916_v54 = vadd.f32 %v1599_v36, %v1559_v57  ;;  %v5918_v39 = vadd.f32 %v1793_v1, %v1627_v58  ;;  %v7026_v38 = vrot.slane %v7025_v49, 2  ;;  %v7028_v60 = vrot.slane %v7027_v26, 1  ;;  %v7035_v57 = vld [vmem:[#allocation32_spill] sm:$0xff] }
 0x20d   : > { %3292 = vmatprep.mubr.bf16.mxu1 %v2908_v41  ;;  %v7030_v8 = vrot.slane %v7029_v15, 1  ;;  %v5933_v51 = vsel %vm1423_vm8, %v6563_v35, %v2040_v30  ;;  %v5936_v62 = vmul.f32 %v5226_v12, %v969_v14  ;;  %v7032_v17 = vrot.slane %v7031_v40, 2  ;;  %v7037_v30 = vld [vmem:[#allocation118_spill] sm:$0xff]  ;;  %v7038_v14 = vld [vmem:[#allocation79_spill] sm:$0xff]  ;;  %v7056_v35 = vld [vmem:[#allocation61_spill] sm:$0xff] }
 0x20e   : > { %v2007_v19 = vsel %vm1423_vm8, %v7026_v38, %v7024_v2  ;;  %v7034_v36 = vrot.slane %v7033_v11, 2  ;;  %v5944_v4 = vadd.f32 %v6941_v22, %v2686_v43  ;;  %v2350_v41 = vrot.slane %v5907_v24, 1 }
 0x20f   : > { %v2327_v34 = vsel %vm1174_vm6, %v7030_v8, %v7028_v60  ;;  %v2109_v58 = vadd.f32 %v2007_v19, %v1861_v59  ;;  %v2766_v25 = vmul.f32 0.044715, %v7035_v57  ;;  %v2767_v1 = vmul.f32 0.044715, %v7036_v33  ;;  %v7040_v59 = vld [vmem:[#allocation33_spill] sm:$0xff]  ;;  %v7042_v19 = vld [vmem:[#allocation50_spill] sm:$0xff] }
 0x210   : > { %v2575_v45 = vsel %vm1423_vm8, %v7034_v36, %v7032_v17  ;;  %v7039_v2 = vrot.slane %v7038_v14, 1  ;;  %v7041_v49 = vrot.slane %v7040_v59, 1  ;;  %v7043_v26 = vrot.slane %v7042_v19, 2  ;;  %v7044_v60 = vld [vmem:[#allocation21_spill] sm:$0xff]  ;;  %v7046_v8 = vld [vmem:[#allocation112_spill] sm:$0xff] }
 0x211   : > { %v2181_v23 = vadd.f32 %v7037_v30, %v2109_v58  ;;  %v7045_v15 = vrot.slane %v7044_v60, 2  ;;  %v1585_v40 = vmul.f32 %v6922_v7, %v7046_v8  ;;  %v2782_v17 = vmul.f32 %v2766_v25, %v7035_v57  ;;  %v7047_v58 = vld [vmem:[#allocation95_spill] sm:$0xff]  ;;  %v7050_v59 = vld [vmem:[#allocation117_spill] sm:$0xff] }
 0x212   : > { %v1200_v38 = vsel %vm1174_vm6, %v7041_v49, %v7039_v2  ;;  %v2783_v11 = vmul.f32 %v2767_v1, %v7036_v33  ;;  %v7048_v30 = vld [vmem:[#allocation67_spill] sm:$0xff]  ;;  %v7051_v61 = vrot.slane %v7050_v59, 1  ;;  %v2598_v49 = vrot.slane %v5936_v62, 2  ;;  %v7052_v60 = vld [vmem:[#allocation101_spill] sm:$0xff] }
 0x213   : > { %v1449_v43 = vsel %vm1423_vm8, %v7045_v15, %v7043_v26  ;;  %v1296_v36 = vadd.f32 %v1200_v38, %v7047_v58  ;;  %v7049_v14 = vrot.slane %v7048_v30, 1  ;;  %v2429_v19 = vadd.f32 %v2327_v34, %v2181_v23  ;;  %v7053_v15 = vld [vmem:[#allocation69_spill] sm:$0xff] }
 0x214   : > { %v1909_v26 = vmul.f32 %v6926_v16, %v7046_v8  ;;  %v2115_v3 = vadd.f32 %v7053_v15, %v7052_v60  ;;  %v2798_v25 = vmul.f32 %v2782_v17, %v7035_v57  ;;  %v2799_v1 = vmul.f32 %v2783_v11, %v7036_v33  ;;  %v7054_v60 = vld [vmem:[#allocation80_spill] sm:$0xff] }
 0x215   : > { %v1769_v2 = vsel %vm1174_vm6, %v7051_v61, %v7049_v14  ;;  %v1545_v38 = vadd.f32 %v1449_v43, %v1296_v36  ;;  %v2155_v58 = vmul.f32 %v6764_v18, %v5459_v21  ;;  %v2677_v30 = vadd.f32 %v2575_v45, %v2429_v19 }
 0x216   : > { %v2015_v59 = vrot.slane %v1909_v26, 2  ;;  %v2229_v61 = vmul.f32 %v3700_v6, %v5484_v28  ;;  %v2231_v34 = vmul.f32 %v3700_v6, %v5459_v21  ;;  %v2814_v23 = vadd.f32 %v2798_v25, %v7035_v57 }
 0x217   : > { %v2815_v8 = vadd.f32 %v2799_v1, %v7036_v33  ;;  %v1617_v14 = vadd.f32 %v1585_v40, %v1545_v38  ;;  %v2187_v17 = vadd.f32 %v2155_v58, %v2115_v3  ;;  %v7055_v11 = vrot.slane %v7054_v60, 2 }
 0x218   : > { %v2153_v45 = vmul.f32 %v6764_v18, %v5484_v28  ;;  %v2335_v36 = vrot.slane %v2229_v61, 1  ;;  %v2336_v19 = vrot.slane %v2231_v34, 1  ;;  %v2830_v26 = vmul.f32 0.7978846, %v2814_v23  ;;  %v7059_v61 = vld [vmem:[#allocation62_spill] sm:$0xff] }
 0x219   : > { %v2017_v43 = vsel %vm1423_vm8, %v2015_v59, %v7055_v11  ;;  %v2831_v15 = vmul.f32 0.7978846, %v2815_v8  ;;  %v1865_v5 = vadd.f32 %v1769_v2, %v1617_v14  ;;  %v2432_v53 = vadd.f32 %v5561_v37, %v7056_v35  ;;  %v7061_v8 = vld [vmem:[#allocation104_spill] sm:$0xff]  ;;  %v7062_v11 = vld [vmem:[#allocation110_spill] sm:$0xff] }
 0x21a   : > { %v2337_v25 = vsel %vm1174_vm6, %v2335_v36, %v2336_v19  ;;  %v7057_v40 = vrot.slane %v5610_v44, 1  ;;  %v2477_v1 = vmul.f32 %v5226_v12, %v5484_v28  ;;  %v2479_v38 = vmul.f32 %v5226_v12, %v5459_v21  ;;  %v7063_v12 = vld [vmem:[#allocation22_spill] sm:$0xff] }
 0x21b   : > { %3384 = vtanh.f32 %v2830_v26  ;;  %v2113_v58 = vadd.f32 %v2017_v43, %v1865_v5  ;;  %v7058_v2 = vrot.slane %v5552_v48, 2  ;;  %v7060_v34 = vrot.slane %v7059_v61, 2  ;;  %v7065_v5 = vld [vmem:[#allocation114_spill] sm:$0xff]  ;;  %v7072_v61 = vld [vmem:[#allocation115_spill] sm:$0xff] }
 0x21c   : > { %v2341_v3 = vsel %vm1174_vm6, %v2336_v19, %v7057_v40  ;;  %3386 = vtanh.f32 %v2831_v15  ;;  %v2583_v35 = vrot.slane %v2477_v1, 2  ;;  %v2584_v44 = vrot.slane %v2479_v38, 2  ;;  %v7067_v19 = vld [vmem:[#allocation106_spill] sm:$0xff]  ;;  %v7069_v40 = vld [vmem:[#allocation113_spill] sm:$0xff] }
 0x21d   : > { %v2435_v59 = vadd.f32 %v2341_v3, %v2187_v17  ;;  %v2582_v37 = vsel %vm1423_vm8, %v7060_v34, %v7058_v2  ;;  %v2723_v14 = vadd.f32 %v5754_v55, %v7061_v8  ;;  %v2185_v60 = vadd.f32 %v2153_v45, %v2113_v58  ;;  %v7070_v58 = vld [vmem:[#allocation84_spill] sm:$0xff] }
 0x21e   : > { %v2680_v23 = vadd.f32 %v2582_v37, %v2432_v53  ;;  %v2769_v36 = vmul.f32 0.044715, %v7062_v11  ;;  %v7064_v21 = vrot.slane %v7063_v12, 1  ;;  %v7066_v17 = vrot.slane %v7065_v5, 1 }
 0x21f   : > { %v2585_v43 = vsel %vm1423_vm8, %v2583_v35, %v2584_v44  ;;  %v7068_v26 = vrot.slane %v7067_v19, 2  ;;  %v2433_v45 = vadd.f32 %v2337_v25, %v2185_v60  ;;  %v7071_v2 = vrot.slane %v7070_v58, 2 }
 0x220   : > { %v1210_v48 = vsel %vm1174_vm6, %v7066_v17, %v7064_v21  ;;  %v6018_v53 = vadd.f32 %v6941_v22, %v2680_v23  ;;  %v2785_v38 = vmul.f32 %v2769_v36, %v7062_v11  ;;  %v7073_v34 = vrot.slane %v7072_v61, 2  ;;  %v7074_v36 = vld [vmem:[#allocation10_spill] sm:$0xff] }
 0x221   : > { %v2589_v15 = vsel %vm1423_vm8, %v2584_v44, %v7068_v26  ;;  %v1300_v3 = vadd.f32 %v1210_v48, %v7069_v40  ;;  %v2750_v35 = vmul.f32 0.5, %v7035_v57  ;;  %v1589_v23 = vmul.f32 %v6922_v7, %v5484_v28  ;;  %v7076_v21 = vld [vmem:[#allocation66_spill] sm:$0xff]  ;;  %v7078_v26 = vld [vmem:[#allocation13_spill] sm:$0xff] }
 0x222   : > { %v6021_v1 = vadd.f32 %v2589_v15, %v2435_v59  ;;  %v1459_v37 = vsel %vm1423_vm8, %v7073_v34, %v7071_v2  ;;  %v2768_v44 = vmul.f32 0.044715, %v6018_v53  ;;  %v2751_v25 = vmul.f32 0.5, %v7036_v33  ;;  %v7079_v15 = vld [vmem:[#allocation14_spill] sm:$0xff] }
 0x223   : > { %v1549_v8 = vadd.f32 %v1459_v37, %v1300_v3  ;;  %v6034_v59 = vadd.f32 %v2585_v43, %v2433_v45  ;;  %v2801_v60 = vmul.f32 %v2785_v38, %v7062_v11  ;;  %v7075_v12 = vrot.slane %v7074_v36, 1  ;;  %v7080_v3 = vld [vmem:[#allocation85_spill] sm:$0xff] }
 0x224   : > { %v7077_v5 = vrot.slane %v7076_v21, 1  ;;  %v2784_v57 = vmul.f32 %v2768_v44, %v6018_v53  ;;  %v1915_v19 = vmul.f32 %v6926_v16, %v5484_v28  ;;  %v2119_v40 = vadd.f32 %v7079_v15, %v7078_v26  ;;  %v7082_v21 = vld [vmem:[#allocation12_spill] sm:$0xff] }
 0x225   : > { %v1621_v48 = vadd.f32 %v1589_v23, %v1549_v8  ;;  %v2721_v33 = vadd.f32 %v5754_v55, %v2677_v30  ;;  %v2817_v43 = vadd.f32 %v2801_v60, %v7062_v11  ;;  %v2157_v45 = vmul.f32 %v6764_v18, %v7080_v3  ;;  %v3385_v34 = vpop.eup %3384  ;;  %v7081_v8 = vld [vmem:[#allocation91_spill] sm:$0xff] }
 0x226   : > { %v1779_v17 = vsel %vm1174_vm6, %v7077_v5, %v7075_v12  ;;  %v2159_v38 = vmul.f32 %v6764_v18, %v5733_v50  ;;  %v2800_v58 = vmul.f32 %v2784_v57, %v6018_v53  ;;  %v2025_v61 = vrot.slane %v1915_v19, 2  ;;  %v3387_v60 = vpop.eup %3386 }
 0x227   : > { %v1869_v2 = vadd.f32 %v1779_v17, %v1621_v48  ;;  %v2235_v28 = vmul.f32 %v3700_v6, %v7080_v3  ;;  %v2833_v37 = vmul.f32 0.7978846, %v2817_v43  ;;  %v2237_v30 = vmul.f32 %v3700_v6, %v5733_v50  ;;  %v6067_v43 = vld [vmem:[%s6401_s3 + $0x18] ss:$0 sm:$0xff] }
 0x228   : > { %v2191_v44 = vadd.f32 %v2159_v38, %v2119_v40  ;;  %v2436_v23 = vadd.f32 %v5853_v46, %v7081_v8  ;;  %v2862_v36 = vadd.f32 1.0, %v3385_v34  ;;  %v2816_v12 = vadd.f32 %v2800_v58, %v6018_v53 }
 0x229   : > { %v7083_v5 = vrot.slane %v7082_v21, 2  ;;  %v2345_v57 = vrot.slane %v2235_v28, 1  ;;  %v2863_v48 = vadd.f32 1.0, %v3387_v60  ;;  %3388 = vtanh.f32 %v2833_v37  ;;  %v7084_v37 = vld [vmem:[#allocation93_spill] sm:$0xff] }
 0x22a   : > { %v2346_v26 = vrot.slane %v2237_v30, 1  ;;  %v2878_v15 = vmul.f32 %v2862_v36, %v2750_v35  ;;  %v2832_v40 = vmul.f32 0.7978846, %v2816_v12  ;;  %v2483_v46 = vmul.f32 %v6067_v43, %v7080_v3  ;;  %v7086_v21 = vld [vmem:[#allocation9_spill] sm:$0xff] }
 0x22b   : > { %v2027_v17 = vsel %vm1423_vm8, %v2025_v61, %v7083_v5  ;;  %v2485_v38 = vmul.f32 %v6067_v43, %v5733_v50  ;;  %v2879_v58 = vmul.f32 %v2863_v48, %v2751_v25  ;;  %v7085_v30 = vrot.slane %v7084_v37, 2 }
 0x22c   : > { %v2117_v19 = vadd.f32 %v2027_v17, %v1869_v2  ;;  %v2347_v28 = vsel %vm1174_vm6, %v2345_v57, %v2346_v26  ;;  %v2351_v35 = vsel %vm1174_vm6, %v2346_v26, %v2350_v41  ;;  %v2894_v2 = vmul.f32 %v2878_v15, %v2721_v33  ;;  %v7088_v33 = vld [vmem:[#allocation16_spill] sm:$0xff]  ;;  %v7091_v26 = vld [vmem:[#allocation111_spill] sm:$0xff] }
 0x22d   : > { %3390 = vtanh.f32 %v2832_v40  ;;  %v2439_v34 = vadd.f32 %v2351_v35, %v2191_v44  ;;  %v2592_v8 = vsel %vm1423_vm8, %v7085_v30, %v2591_v20  ;;  %v2895_v60 = vmul.f32 %v2879_v58, %v2723_v14  ;;  %v7090_v14 = vld [vmem:[#allocation76_spill] sm:$0xff]  ;;  %v7093_v40 = vld [vmem:[#allocation77_spill] sm:$0xff] }
 0x22e   : > { %v2189_v61 = vadd.f32 %v2157_v45, %v2117_v19  ;;  %v2593_v50 = vrot.slane %v2483_v46, 2  ;;  %v2594_v25 = vrot.slane %v2485_v38, 2  ;;  %v2753_v45 = vmul.f32 0.5, %v7062_v11 }
 0x22f   : > { %v2684_v12 = vadd.f32 %v2592_v8, %v2436_v23  ;;  %v2771_v24 = vmul.f32 0.044715, %v5944_v4  ;;  %v7087_v41 = vrot.slane %v7086_v21, 1  ;;  %v7089_v5 = vrot.slane %v7088_v33, 1 }
 0x230   : > { %v2437_v36 = vadd.f32 %v2347_v28, %v2189_v61  ;;  %v2909_v47 = vpack.c.bf16 %v2895_v60, %v2894_v2  ;;  %v2595_v17 = vsel %vm1423_vm8, %v2593_v50, %v2594_v25  ;;  %v2599_v20 = vsel %vm1423_vm8, %v2594_v25, %v2598_v49  ;;  %v7096_v60 = vld [vmem:[#allocation20_spill] sm:$0xff] }
 0x231   : > { %v1220_v44 = vsel %vm1174_vm6, %v7089_v5, %v7087_v41  ;;  %v6096_v11 = vadd.f32 %v2599_v20, %v2439_v34  ;;  %v6099_v23 = vadd.f32 %v6941_v22, %v2684_v12  ;;  %v2787_v19 = vmul.f32 %v2771_v24, %v5944_v4  ;;  %v7098_v12 = vld [vmem:[#allocation40_spill] sm:$0xff] }
 0x232   : > { %v1304_v57 = vadd.f32 %v1220_v44, %v7090_v14  ;;  %v6094_v48 = vadd.f32 %v2595_v17, %v2437_v36  ;;  %3293 = vmatmul.mubr.bf16.vlgmr.msra.gmra.mrb[32].mxu1 %v2909_v47  ;;  %v7092_v15 = vrot.slane %v7091_v26, 2  ;;  %v7094_v46 = vrot.slane %v7093_v40, 2 }
 0x233   : > { %v1593_v49 = vmul.f32 %v6922_v7, %v7080_v3  ;;  %v7095_v38 = vrot.slane %v5724_v52, 1  ;;  %v1921_v61 = vmul.f32 %v6926_v16, %v7080_v3  ;;  %v2725_v28 = vadd.f32 %v5754_v55, %v6034_v59  ;;  %v3389_v37 = vpop.eup %3388 }
 0x234   : > { %v1469_v62 = vsel %vm1423_vm8, %v7094_v46, %v7092_v15  ;;  %v2727_v35 = vadd.f32 %v5754_v55, %v6021_v1  ;;  %v2752_v2 = vmul.f32 0.5, %v6018_v53  ;;  %v2770_v34 = vmul.f32 0.044715, %v6099_v23 }
 0x235   : > { %v1789_v58 = vsel %vm1174_vm6, %v7095_v38, %v1788_v29  ;;  %v2803_v31 = vmul.f32 %v2787_v19, %v5944_v4  ;;  %v1553_v30 = vadd.f32 %v1469_v62, %v1304_v57  ;;  %v2035_v52 = vrot.slane %v1921_v61, 2  ;;  %v7099_v57 = vld [vmem:[#allocation55_spill] sm:$0xff] }
 0x236   : > { %v2123_v29 = vadd.f32 %v5933_v51, %v5918_v39  ;;  %v2865_v8 = vadd.f32 1.0, %v3389_v37  ;;  %v2786_v3 = vmul.f32 %v2770_v34, %v6099_v23  ;;  %v2161_v59 = vmul.f32 %v6764_v18, %v7096_v60  ;;  %v7100_v62 = vld [vmem:[#allocation51_spill] sm:$0xff]  ;;  %v7104_v37 = vld [vmem:[#allocation74_spill] sm:$0xff] }
 0x237   : > { %v2163_v1 = vmul.f32 %v6764_v18, %v7020_v27  ;;  %v2819_v53 = vadd.f32 %v2803_v31, %v5944_v4  ;;  %v1625_v36 = vadd.f32 %v1593_v49, %v1553_v30  ;;  %v7097_v50 = vrot.slane %v5900_v9, 2  ;;  %v3391_v39 = vpop.eup %3390  ;;  %v7102_v38 = vld [vmem:[#allocation31_spill] sm:$0xff] }
 0x238   : > { %v2192_v24 = vadd.f32 %v7098_v12, %v5832_v10  ;;  %v2881_v51 = vmul.f32 %v2865_v8, %v2753_v45  ;;  %v2802_v21 = vmul.f32 %v2786_v3, %v6099_v23  ;;  %v2241_v33 = vmul.f32 %v3700_v6, %v7096_v60  ;;  %v7109_v12 = vld [vmem:[#allocation19_spill] sm:$0xff] }
 0x239   : > { %v2037_v25 = vsel %vm1423_vm8, %v2035_v52, %v7097_v50  ;;  %v2195_v41 = vadd.f32 %v2163_v1, %v2123_v29  ;;  %v2864_v5 = vadd.f32 1.0, %v3391_v39  ;;  %v2835_v44 = vmul.f32 0.7978846, %v2819_v53 }
 0x23a   : > { %v1873_v47 = vadd.f32 %v1789_v58, %v1625_v36  ;;  %v2243_v17 = vmul.f32 %v3700_v6, %v7020_v27  ;;  %v2897_v9 = vmul.f32 %v2881_v51, %v2727_v35  ;;  %v2818_v20 = vadd.f32 %v2802_v21, %v6099_v23 }
 0x23b   : > { %v2355_v14 = vrot.slane %v2241_v33, 1  ;;  %v2440_v10 = vadd.f32 %v7099_v57, %v2192_v24  ;;  %v2880_v19 = vmul.f32 %v2864_v5, %v2752_v2  ;;  %3392 = vtanh.f32 %v2835_v44 }
 0x23c   : > { %v2121_v45 = vadd.f32 %v2037_v25, %v1873_v47  ;;  %v2356_v26 = vrot.slane %v2243_v17, 1  ;;  %v2834_v15 = vmul.f32 0.7978846, %v2818_v20  ;;  %v2489_v40 = vmul.f32 %v6067_v43, %v7096_v60  ;;  %v7116_v20 = vld [vmem:[#allocation73_spill] sm:$0xff] }
 0x23d   : > { %v2491_v46 = vmul.f32 %v6067_v43, %v7020_v27  ;;  %v7101_v49 = vrot.slane %v7100_v62, 2  ;;  %v7103_v58 = vrot.slane %v7102_v38, 2  ;;  %v2896_v35 = vmul.f32 %v2880_v19, %v2725_v28  ;;  %v7120_v38 = vld [vmem:[#allocation41_spill] sm:$0xff] }
 0x23e   : > { %v2193_v34 = vadd.f32 %v2161_v59, %v2121_v45  ;;  %v2357_v2 = vsel %vm1174_vm6, %v2355_v14, %v2356_v26  ;;  %v7105_v31 = vrot.slane %v7104_v37, 1  ;;  %3394 = vtanh.f32 %v2834_v15  ;;  %v7106_v59 = vld [vmem:[#allocation75_spill] sm:$0xff] }
 0x23f   : > { %v2602_v61 = vsel %vm1423_vm8, %v7103_v58, %v7101_v49  ;;  %v2603_v29 = vrot.slane %v2489_v40, 2  ;;  %v2604_v8 = vrot.slane %v2491_v46, 2  ;;  %v2910_v3 = vpack.c.bf16 %v2897_v9, %v2896_v35  ;;  %v7118_v15 = vld [vmem:[#allocation71_spill] sm:$0xff] }
 0x240   : > { %v2361_v30 = vsel %vm1174_vm6, %v2356_v26, %v7105_v31  ;;  %v2441_v27 = vadd.f32 %v2357_v2, %v2193_v34  ;;  %v2688_v1 = vadd.f32 %v2602_v61, %v2440_v10  ;;  %v6158_v53 = vadd.f32 %v6941_v22, %v5875_v42  ;;  %v7121_v61 = vld [vmem:[#allocation28_spill] sm:$0xff]  ;;  %v7123_v31 = vld [vmem:[#allocation25_spill] sm:$0xff] }
 0x241   : > { %v2443_v52 = vadd.f32 %v2361_v30, %v2195_v41  ;;  %v2605_v28 = vsel %vm1423_vm8, %v2603_v29, %v2604_v8  ;;  %v7107_v36 = vrot.slane %v7106_v59, 2  ;;  %v7108_v25 = vrot.slane %v5860_v0, 1  ;;  %3296 = vmatprep.mubr.bf16.mxu1 %v2910_v3 }
 0x242   : > { %v7110_v24 = vrot.slane %v7109_v12, 1  ;;  %v7111_v51 = vrot.slane %v5871_v63, 2  ;;  %v7112_v21 = vrot.slane %v5719_v13, 2  ;;  %v2755_v42 = vmul.f32 0.5, %v5944_v4  ;;  %v7113_v63 = vld [vmem:[#allocation90_spill] sm:$0xff]  ;;  %v7114_v13 = vld [vmem:[#allocation64_spill] sm:$0xff] }
 0x243   : > { %v2609_v50 = vsel %vm1423_vm8, %v2604_v8, %v7107_v36  ;;  %v6175_v33 = vadd.f32 %v2605_v28, %v2441_v27  ;;  %v6180_v44 = vadd.f32 %v6941_v22, %v2688_v1  ;;  %v2729_v0 = vadd.f32 %v5754_v55, %v6094_v48 }
 0x244   : > { %v1230_v39 = vsel %vm1174_vm6, %v7110_v24, %v7108_v25  ;;  %v1479_v41 = vsel %vm1423_vm8, %v7112_v21, %v7111_v51  ;;  %v6177_v5 = vadd.f32 %v2609_v50, %v2443_v52  ;;  %v2773_v47 = vmul.f32 0.044715, %v6158_v53 }
 0x245   : > { %v1308_v17 = vadd.f32 %v1230_v39, %v7113_v63  ;;  %v7115_v9 = vrot.slane %v7114_v13, 1  ;;  %v7117_v14 = vrot.slane %v7116_v20, 1  ;;  %v2731_v57 = vadd.f32 %v5754_v55, %v6096_v11  ;;  %v3393_v62 = vpop.eup %3392  ;;  %v7119_v11 = vld [vmem:[#allocation54_spill] sm:$0xff] }
 0x246   : > { %v2754_v10 = vmul.f32 0.5, %v6099_v23  ;;  %v2772_v19 = vmul.f32 0.044715, %v6180_v44  ;;  %v1597_v48 = vmul.f32 %v6922_v7, %v7096_v60  ;;  %v2789_v45 = vmul.f32 %v2773_v47, %v6158_v53 }
 0x247   : > { %v1799_v4 = vsel %vm1174_vm6, %v7117_v14, %v7115_v9  ;;  %v1557_v26 = vadd.f32 %v1479_v41, %v1308_v17  ;;  %v1879_v40 = vadd.f32 %v7118_v15, %v5916_v54  ;;  %v1927_v46 = vmul.f32 %v6926_v16, %v7096_v60  ;;  %v7122_v16 = vld [vmem:[#allocation72_spill] sm:$0xff]  ;;  %v7127_v17 = vld [vmem:[#allocation83_spill] sm:$0xff] }
 0x248   : > { %v2788_v49 = vmul.f32 %v2772_v19, %v6180_v44  ;;  %v2124_v23 = vadd.f32 %v7119_v11, %v5824_v56  ;;  %v2165_v58 = vmul.f32 %v6764_v18, %v7120_v38  ;;  %v2167_v7 = vmul.f32 %v6764_v18, %v7121_v61  ;;  %v3395_v52 = vpop.eup %3394  ;;  %v7124_v18 = vld [vmem:[#allocation65_spill] sm:$0xff]  ;;  %v7128_v14 = vld [vmem:[#allocation88_spill] sm:$0xff]  ;;  %v7132_v15 = vld [vmem:[#allocation27_spill] sm:$0xff] }
 0x249   : > { %v2867_v35 = vadd.f32 1.0, %v3393_v62  ;;  %v2805_v34 = vmul.f32 %v2789_v45, %v6158_v53  ;;  %v1629_v2 = vadd.f32 %v1597_v48, %v1557_v26  ;;  %v2045_v54 = vrot.slane %v1927_v46, 2  ;;  %v7130_v45 = vld [vmem:[#allocation81_spill] sm:$0xff] }
 0x24a   : > { %v2804_v37 = vmul.f32 %v2788_v49, %v6180_v44  ;;  %v2127_v60 = vadd.f32 %v7122_v16, %v1879_v40  ;;  %v2196_v30 = vadd.f32 %v7123_v31, %v2124_v23  ;;  %v2247_v56 = vmul.f32 %v3700_v6, %v7120_v38  ;;  %v7134_v49 = vld [vmem:[#allocation86_spill] sm:$0xff] }
 0x24b   : > { %v2883_v29 = vmul.f32 %v2867_v35, %v2755_v42  ;;  %v2821_v8 = vadd.f32 %v2805_v34, %v6158_v53  ;;  %v1877_v3 = vadd.f32 %v1799_v4, %v1629_v2  ;;  %v7125_v27 = vrot.slane %v7124_v18, 2  ;;  %v7126_v42 = vld [vmem:[#allocation17_spill] sm:$0xff]  ;;  %v7143_v16 = vld [vmem:[#allocation42_spill] sm:$0xff] }
 0x24c   : > { %v2866_v28 = vadd.f32 1.0, %v3395_v52  ;;  %v2820_v59 = vadd.f32 %v2804_v37, %v6180_v44  ;;  %v2199_v36 = vadd.f32 %v2167_v7, %v2127_v60  ;;  %v2249_v50 = vmul.f32 %v3700_v6, %v7121_v61  ;;  %v7137_v7 = vld [vmem:[#allocation98_spill] sm:$0xff]  ;;  %v7139_v2 = vld [vmem:[#allocation105_spill] sm:$0xff]  ;;  %v7145_v52 = vld [vmem:[#allocation100_spill] sm:$0xff] }
 0x24d   : > { %v2047_v1 = vsel %vm1423_vm8, %v2045_v54, %v7125_v27  ;;  %v2899_v25 = vmul.f32 %v2883_v29, %v2731_v57  ;;  %v2837_v12 = vmul.f32 0.7978846, %v2821_v8  ;;  %v2365_v39 = vrot.slane %v2247_v56, 1  ;;  %v7141_v54 = vld [vmem:[#allocation49_spill] sm:$0xff]  ;;  %v7146_v8 = vld [vmem:[#allocation60_spill] sm:$0xff] }
 0x24e   : > { %v2125_v24 = vadd.f32 %v2047_v1, %v1877_v3  ;;  %v2882_v51 = vmul.f32 %v2866_v28, %v2754_v10  ;;  %v2836_v21 = vmul.f32 0.7978846, %v2820_v59  ;;  %v2366_v41 = vrot.slane %v2249_v50, 1  ;;  %v7149_v1 = vld [vmem:[#allocation37_spill] sm:$0xff] }
 0x24f   : > { %v2444_v47 = vadd.f32 %v7126_v42, %v2196_v30  ;;  %3396 = vtanh.f32 %v2837_v12  ;;  %v2446_v13 = vadd.f32 %v7127_v17, %v5847_v32  ;;  %v2495_v9 = vmul.f32 %v6067_v43, %v7120_v38  ;;  %v7135_v38 = vld [vmem:[#allocation11_spill] sm:$0xff] }
 0x250   : > { %v2197_v63 = vadd.f32 %v2165_v58, %v2125_v24  ;;  %v2898_v20 = vmul.f32 %v2882_v51, %v2729_v0  ;;  %3398 = vtanh.f32 %v2836_v21  ;;  %v2367_v6 = vsel %vm1174_vm6, %v2365_v39, %v2366_v41  ;;  %v7152_v42 = vld [vmem:[#allocation63_spill] sm:$0xff] }
 0x251   : > { %v7129_v4 = vrot.slane %v7128_v14, 1  ;;  %v2497_v48 = vmul.f32 %v6067_v43, %v7121_v61  ;;  %v7131_v26 = vrot.slane %v7130_v45, 2  ;;  %v7133_v32 = vrot.slane %v7132_v15, 2  ;;  %v7140_v43 = vld [vmem:[#allocation58_spill] sm:$0xff] }
 0x252   : > { %v2445_v10 = vadd.f32 %v2367_v6, %v2197_v63  ;;  %v2911_v46 = vpack.c.bf16 %v2899_v25, %v2898_v20  ;;  %v2613_v0 = vrot.slane %v2495_v9, 2  ;;  %v2694_v11 = vadd.f32 %v7134_v49, %v2446_v13  ;;  %v7153_v63 = vld [vmem:[#allocation82_spill] sm:$0xff]  ;;  %v7154_v13 = vld [vmem:[#allocation107_spill] sm:$0xff] }
 0x253   : > { %v2371_v57 = vsel %vm1174_vm6, %v2366_v41, %v7129_v4  ;;  %v2612_v40 = vsel %vm1423_vm8, %v7133_v32, %v7131_v26  ;;  %v2614_v23 = vrot.slane %v2497_v48, 2  ;;  %v7136_v58 = vrot.slane %v7135_v38, 1  ;;  %v7155_v26 = vld [vmem:[#allocation97_spill] sm:$0xff] }
 0x254   : > { %v2447_v19 = vadd.f32 %v2371_v57, %v2199_v36  ;;  %v2692_v62 = vadd.f32 %v2612_v40, %v2444_v47  ;;  %v7138_v35 = vrot.slane %v7137_v7, 1  ;;  %v2451_v61 = vadd.f32 %v7140_v43, %v7139_v2  ;;  %3297 = vmatmul.mubr.bf16.gmra.mrb[36].mxu1 %v2911_v46  ;;  %v7150_v36 = vld [vmem:[#allocation89_spill] sm:$0xff] }
 0x255   : > { %v7142_v37 = vrot.slane %v7141_v54, 2  ;;  %v7144_v60 = vrot.slane %v7143_v16, 2  ;;  %v6255_v56 = vadd.f32 %v6941_v22, %v2694_v11  ;;  %v7147_v3 = vrot.slane %v7146_v8, 2 }
 0x256   : > { %v2377_v34 = vsel %vm1174_vm6, %v7138_v35, %v7136_v58  ;;  %v6252_v30 = vadd.f32 %v6941_v22, %v2692_v62  ;;  %v6265_v28 = vadd.f32 %v6941_v22, %v7149_v1  ;;  %v2615_v59 = vsel %vm1423_vm8, %v2613_v0, %v2614_v23 }
 0x257   : > { %v2625_v31 = vsel %vm1423_vm8, %v7144_v60, %v7142_v37  ;;  %v2449_v29 = vadd.f32 %v2377_v34, %v7145_v52  ;;  %v7148_v18 = vmov %v7142_v37  ;;  %v7151_v50 = vrot.slane %v7150_v36, 2 }
 0x258   : > { %v2629_v27 = vsel %vm1423_vm8, %v7148_v18, %v7147_v3  ;;  %v6273_v24 = vadd.f32 %v2615_v59, %v2445_v10  ;;  %v2774_v51 = vmul.f32 0.044715, %v6252_v30  ;;  %v2775_v21 = vmul.f32 0.044715, %v6255_v56 }
 0x259   : > { %v2619_v25 = vsel %vm1423_vm8, %v2614_v23, %v7151_v50  ;;  %v6271_v12 = vadd.f32 %v2629_v27, %v2451_v61  ;;  %v6279_v41 = vadd.f32 %v2625_v31, %v2449_v29  ;;  %v6283_v47 = vadd.f32 %v6941_v22, %v7152_v42  ;;  %v3397_v20 = vpop.eup %3396 }
 0x25a   : > { %v6275_v39 = vadd.f32 %v2619_v25, %v2447_v19  ;;  %v6287_v17 = vadd.f32 %v6941_v22, %v7153_v63  ;;  %v2776_v9 = vmul.f32 0.044715, %v7154_v13  ;;  %v2757_v6 = vmul.f32 0.5, %v6158_v53  ;;  %v3399_v10 = vpop.eup %3398  ;;  %v7156_v22 = vld [vmem:[#allocation38_spill] sm:$0xff] }
 0x25b   : > { %v2790_v14 = vmul.f32 %v2774_v51, %v6252_v30  ;;  %v2791_v4 = vmul.f32 %v2775_v21, %v6255_v56  ;;  %v2777_v57 = vmul.f32 0.044715, %v6265_v28  ;;  %v2756_v19 = vmul.f32 0.5, %v6180_v44 }
 0x25c   : > { %v2869_v48 = vadd.f32 1.0, %v3397_v20  ;;  %v2792_v45 = vmul.f32 %v2776_v9, %v7154_v13  ;;  %v6298_v15 = vadd.f32 %v7156_v22, %v7155_v26  ;;  %v2868_v32 = vadd.f32 1.0, %v3399_v10 }
 0x25d   : > { %v2806_v40 = vmul.f32 %v2790_v14, %v6252_v30  ;;  %v2807_v53 = vmul.f32 %v2791_v4, %v6255_v56  ;;  %v2793_v46 = vmul.f32 %v2777_v57, %v6265_v28  ;;  %v2733_v0 = vadd.f32 %v5754_v55, %v6175_v33 }
 0x25e   : > { %v2735_v44 = vadd.f32 %v5754_v55, %v6177_v5  ;;  %v2885_v62 = vmul.f32 %v2869_v48, %v2757_v6  ;;  %v2808_v49 = vmul.f32 %v2792_v45, %v7154_v13  ;;  %v2884_v11 = vmul.f32 %v2868_v32, %v2756_v19 }
 0x25f   : > { %v2822_v23 = vadd.f32 %v2806_v40, %v6252_v30  ;;  %v2823_v38 = vadd.f32 %v2807_v53, %v6255_v56  ;;  %v2809_v58 = vmul.f32 %v2793_v46, %v6265_v28  ;;  %v2778_v34 = vmul.f32 0.044715, %v6283_v47 }
 0x260   : > { %v2901_v7 = vmul.f32 %v2885_v62, %v2735_v44  ;;  %v2824_v35 = vadd.f32 %v2808_v49, %v7154_v13  ;;  %v2900_v2 = vmul.f32 %v2884_v11, %v2733_v0  ;;  %v2779_v54 = vmul.f32 0.044715, %v6287_v17 }
 0x261   : > { %v2838_v33 = vmul.f32 0.7978846, %v2822_v23  ;;  %v2839_v43 = vmul.f32 0.7978846, %v2823_v38  ;;  %v2825_v5 = vadd.f32 %v2809_v58, %v6265_v28  ;;  %v2794_v37 = vmul.f32 %v2778_v34, %v6283_v47 }
 0x262   : > { %v2840_v61 = vmul.f32 0.7978846, %v2824_v35  ;;  %v2912_v16 = vpack.c.bf16 %v2901_v7, %v2900_v2  ;;  %v2795_v31 = vmul.f32 %v2779_v54, %v6287_v17  ;;  %v2758_v36 = vmul.f32 0.5, %v6252_v30 }
 0x263   : > { %3400 = vtanh.f32 %v2838_v33  ;;  %v2841_v60 = vmul.f32 0.7978846, %v2825_v5  ;;  %v2810_v52 = vmul.f32 %v2794_v37, %v6283_v47  ;;  %v2760_v25 = vmul.f32 0.5, %v7154_v13 }
 0x264   : > { %3402 = vtanh.f32 %v2839_v43  ;;  %3300 = vmatprep.mubr.bf16.mxu1 %v2912_v16  ;;  %v2811_v29 = vmul.f32 %v2795_v31, %v6287_v17  ;;  %v2759_v21 = vmul.f32 0.5, %v6255_v56  ;;  %v2761_v63 = vmul.f32 0.5, %v6265_v28 }
 0x265   : > { %3404 = vtanh.f32 %v2840_v61  ;;  %v2826_v8 = vadd.f32 %v2810_v52, %v6283_v47  ;;  %v2737_v20 = vadd.f32 %v5754_v55, %v6273_v24  ;;  %v2741_v14 = vadd.f32 %v5754_v55, %v6279_v41 }
 0x266   : > { %3406 = vtanh.f32 %v2841_v60  ;;  %v2827_v3 = vadd.f32 %v2811_v29, %v6287_v17  ;;  %v2739_v30 = vadd.f32 %v5754_v55, %v6275_v39  ;;  %v2743_v28 = vadd.f32 %v5754_v55, %v6271_v12 }
 0x267   : > { %v2842_v18 = vmul.f32 0.7978846, %v2826_v8  ;;  %v2762_v45 = vmul.f32 0.5, %v6283_v47  ;;  %v2745_v41 = vadd.f32 %v5754_v55, %v6298_v15  ;;  %v2763_v39 = vmul.f32 0.5, %v6287_v17  ;;  %v7157_v47 = vld [vmem:[#allocation4_spill] sm:$0xff] }
 0x268   : > { %v2843_v27 = vmul.f32 0.7978846, %v2827_v3  ;;  %v2747_v44 = vadd.f32 %v5754_v55, %v7157_v47  ;;  %v3249_v17 = vld [vmem:[%s6404_s6] ss:$0 sm:$0xff] }
 0x269   : > { %3408 = vtanh.f32 %v2842_v18 }
 0x26a   : > { %3410 = vtanh.f32 %v2843_v27 }
 0x26d   : > { %v3401_v1 = vpop.eup %3400 }
 0x26e   : > { %v3403_v59 = vpop.eup %3402  ;;  %v2870_v50 = vadd.f32 1.0, %v3401_v1 }
 0x26f   : > { %v3405_v51 = vpop.eup %3404  ;;  %v2871_v42 = vadd.f32 1.0, %v3403_v59 }
 0x270   : > { %v3407_v9 = vpop.eup %3406  ;;  %v2886_v6 = vmul.f32 %v2870_v50, %v2758_v36  ;;  %v2872_v4 = vadd.f32 1.0, %v3405_v51 }
 0x271   : > { %v2887_v57 = vmul.f32 %v2871_v42, %v2759_v21  ;;  %v2873_v13 = vadd.f32 1.0, %v3407_v9 }
 0x272   : > { %v2902_v10 = vmul.f32 %v2886_v6, %v2737_v20  ;;  %v2888_v19 = vmul.f32 %v2872_v4, %v2760_v25 }
 0x273   : > { %v2903_v56 = vmul.f32 %v2887_v57, %v2739_v30  ;;  %v2889_v48 = vmul.f32 %v2873_v13, %v2761_v63  ;;  %v3409_v24 = vpop.eup %3408 }
 0x274   : > { %v2904_v26 = vmul.f32 %v2888_v19, %v2741_v14  ;;  %v2874_v40 = vadd.f32 1.0, %v3409_v24  ;;  %v3411_v53 = vpop.eup %3410 }
 0x275   : > { %v2913_v22 = vpack.c.bf16 %v2903_v56, %v2902_v10  ;;  %v2905_v32 = vmul.f32 %v2889_v48, %v2743_v28  ;;  %v2875_v46 = vadd.f32 1.0, %v3411_v53 }
 0x276   : > { %v2890_v0 = vmul.f32 %v2874_v40, %v2762_v45 }
 0x277   : > { %3301 = vmatmul.mubr.bf16.gmra.mrb[40].mxu1 %v2913_v22  ;;  %v2914_v12 = vpack.c.bf16 %v2905_v32, %v2904_v26  ;;  %v2891_v62 = vmul.f32 %v2875_v46, %v2763_v39 }
 0x278   : > { %v2906_v15 = vmul.f32 %v2890_v0, %v2745_v41 }
 0x279   : > { %3304 = vmatprep.mubr.bf16.mxu1 %v2914_v12  ;;  %v2907_v49 = vmul.f32 %v2891_v62, %v2747_v44 }
 0x27b   : > { %v2915_v11 = vpack.c.bf16 %v2907_v49, %v2906_v15 }
 0x27f   : > { %3305 = vmatmul.mubr.bf16.gmra.mrb[44].mxu1 %v2915_v11 }
 0x305   : > { %v3294_v55 = vpop.f32.mrb[32].mxu1 }
 0x306   : > { %v3030_v23 = vadd.f32 %v3294_v55, %v3249_v17  ;;  %v3021_v38 = vpop.f32.mrb[33].mxu1 }
 0x307   : > { %v3022_v58 = vadd.f32 %v3249_v17, %v3021_v38  ;;  %v3295_v7 = vpop.f32.mrb[34].mxu1 }
 0x308   : > { %3086 = vst.msk [vmem:[%s6349_s13 + $0x10] sm:$0xff] %vm481_vm1, %v3030_v23  ;;  %v3033_v35 = vadd.f32 %v3295_v7, %v3249_v17  ;;  %v3024_v34 = vpop.f32.mrb[35].mxu1 }
 0x309   : > { %3084 = vst.msk [vmem:[%s6349_s13] sm:$0xff] %vm481_vm1, %v3022_v58  ;;  %v3025_v2 = vadd.f32 %v3249_v17, %v3024_v34 }
 0x30a   : > { %3087 = vst.msk [vmem:[%s6349_s13 + $0x18] sm:$0xff] %vm481_vm1, %v3033_v35 }
 0x30b   : > { %3085 = vst.msk [vmem:[%s6349_s13 + $0x8] sm:$0xff] %vm481_vm1, %v3025_v2 }
 0x327   : > { %v3298_v33 = vpop.f32.mrb[36].mxu1 }
 0x328   : > { %v3046_v43 = vadd.f32 %v3298_v33, %v3249_v17  ;;  %v3037_v5 = vpop.f32.mrb[37].mxu1 }
 0x329   : > { %v3038_v61 = vadd.f32 %v3249_v17, %v3037_v5  ;;  %v3299_v54 = vpop.f32.mrb[38].mxu1 }
 0x32a   : > { %3090 = vst.msk [vmem:[%s6349_s13 + $0x30] sm:$0xff] %vm481_vm1, %v3046_v43  ;;  %v3049_v37 = vadd.f32 %v3299_v54, %v3249_v17  ;;  %v3040_v16 = vpop.f32.mrb[39].mxu1 }
 0x32b   : > { %3088 = vst.msk [vmem:[%s6349_s13 + $0x20] sm:$0xff] %vm481_vm1, %v3038_v61  ;;  %v3041_v60 = vadd.f32 %v3249_v17, %v3040_v16 }
 0x32c   : > { %3091 = vst.msk [vmem:[%s6349_s13 + $0x38] sm:$0xff] %vm481_vm1, %v3049_v37 }
 0x32d   : > { %3089 = vst.msk [vmem:[%s6349_s13 + $0x28] sm:$0xff] %vm481_vm1, %v3041_v60 }
 0x34a   : > { %v3302_v31 = vpop.f32.mrb[40].mxu1 }
 0x34b   : > { %v3062_v52 = vadd.f32 %v3302_v31, %v3249_v17  ;;  %v3053_v29 = vpop.f32.mrb[41].mxu1 }
 0x34c   : > { %v3054_v8 = vadd.f32 %v3249_v17, %v3053_v29  ;;  %v3303_v3 = vpop.f32.mrb[42].mxu1 }
 0x34d   : > { %3094 = vst.msk [vmem:[%s6349_s13 + $0x50] sm:$0xff] %vm481_vm1, %v3062_v52  ;;  %v3065_v18 = vadd.f32 %v3303_v3, %v3249_v17  ;;  %v3056_v27 = vpop.f32.mrb[43].mxu1 }
 0x34e   : > { %3092 = vst.msk [vmem:[%s6349_s13 + $0x40] sm:$0xff] %vm481_vm1, %v3054_v8  ;;  %v3057_v1 = vadd.f32 %v3249_v17, %v3056_v27 }
 0x34f   : > { %3095 = vst.msk [vmem:[%s6349_s13 + $0x58] sm:$0xff] %vm481_vm1, %v3065_v18 }
 0x350   : > { %3093 = vst.msk [vmem:[%s6349_s13 + $0x48] sm:$0xff] %vm481_vm1, %v3057_v1 }
 0x352   : > { %v3306_v59 = vpop.f32.mrb[44].mxu1 }
 0x353   : > { %v3078_v36 = vadd.f32 %v3306_v59, %v3249_v17  ;;  %v3069_v50 = vpop.f32.mrb[45].mxu1 }
 0x354   : > { %v3070_v25 = vadd.f32 %v3249_v17, %v3069_v50  ;;  %v3307_v51 = vpop.f32.mrb[46].mxu1 }
 0x355   : > { %3098 = vst.msk [vmem:[%s6349_s13 + $0x70] sm:$0xff] %vm481_vm1, %v3078_v36  ;;  %v3081_v21 = vadd.f32 %v3307_v51, %v3249_v17  ;;  %v3072_v42 = vpop.f32.mrb[47].mxu1 }
 0x356   : > { %3096 = vst.msk [vmem:[%s6349_s13 + $0x60] sm:$0xff] %vm481_vm1, %v3070_v25  ;;  %v3073_v63 = vadd.f32 %v3249_v17, %v3072_v42 }
 0x357   : > { %3099 = vst.msk [vmem:[%s6349_s13 + $0x78] sm:$0xff] %vm481_vm1, %v3081_v21 }
 0x358   : > { %3097 = vst.msk [vmem:[%s6349_s13 + $0x68] sm:$0xff] %vm481_vm1, %v3073_v63 }
 0x359 PF: > { %s17_s28 = sadd.s32 1, %s3454_s28   ;;  %s7158_s24 = smov %s3446_s26 }
 0x35a   : > { %p14_p8 = scmp.ge.s32.totalorder %s17_s28, 6   ;;  %s7159_s25 = smov %s3450_s27 }
 0x35b   : > { %s7160_s26 = smov %s7163_s29  ;;  %s7161_s27 = smov %s7167_s30 }
 0x35c   :  { %16 = sbr.rel (!%p14_p8) target bundleno = 3 (0x3), region = 78 }

</bundles_post_ra>
